<compile_context>
chip_gen: v7x
topology: tpu7x:2x2x1
jax: 0.10.0
libtpu: 0.0.40
codegen_flags: <defaults>
</compile_context>

<pallas_src>
import functools
import jax
import jax.numpy as jnp
from jax.experimental import pallas as pl
from jax.experimental.pallas import tpu as pltpu

SCALE_WEIGHT = 0.5 ** 0.5


# ---------------------------------------------------------------------------
# Fused kernel: all L GatedConv layers for one (TB, H*C) slab of rows.
#   x_ref : (TB, H*C)      input activations (lane-dense, read once from HBM)
#   w_ref : (L, K*C, 2C)   per-layer im2col weights, out/gate fused on last dim
#   b_ref : (L, 1, 2C)     per-layer bias, out/gate fused
#   o_ref : (TB, H*C)      output (lane-dense, written once to HBM)
# ---------------------------------------------------------------------------
def _stacked_gated_conv_kernel(x_ref, w_ref, b_ref, o_ref, *, L, K, H, C, pad):
    TB = x_ref.shape[0]
    M = TB * H

    # One lane->sublane expansion per block: (TB, H*C) -> (TB, H, C).
    x = x_ref[...].reshape(TB, H, C).astype(jnp.float32)
    # Hoisted zero halo (constant; reused by every layer).
    halo = jnp.zeros((TB, pad, C), jnp.float32)

    # TODO(synk): for large num_layers switch this static unroll to lax.fori_loop
    # (carry x, dynamic w_ref[l]/b_ref[l]) to bound live ranges and code size.
    for l in range(L):
        xp = jnp.concatenate([halo, x, halo], axis=1)          # (TB, H + 2*pad, C)
        # im2col: one (M, K*C) operand -> a single MXU matmul per layer.
        cols = jnp.concatenate(
            [xp[:, k:k + H, :].reshape(M, C) for k in range(K)], axis=-1)
        acc = jnp.dot(cols, w_ref[l], preferred_element_type=jnp.float32)
        acc = acc + b_ref[l]                                    # (M, 2C)
        out, gate = acc[:, :C], acc[:, C:]
        gated = (out * jax.nn.sigmoid(gate)).reshape(TB, H, C)
        x = (x + gated) * SCALE_WEIGHT

    # Lane-dense store: last dim is H*C, so the writeback is an unmasked vst for any
    # realistic config (and exactly 128 lanes for the tiny test config).
    o_ref[...] = x.reshape(TB, H * C).astype(o_ref.dtype)


# ---------------------------------------------------------------------------
# Per-generation sizing helpers
# ---------------------------------------------------------------------------
def _tpu_kind():
    try:
        return jax.devices()[0].device_kind.lower()
    except Exception:
        return ""


def _vmem_limit_bytes():
    kind = _tpu_kind()
    if "v5" in kind or "v6" in kind:
        return 96 * 1024 * 1024     # 128 MiB physical; raise the 16/32 MiB default
    if "v7" in kind:
        return 48 * 1024 * 1024     # 64 MiB physical on v7x
    return None                     # unknown chip: keep the scoped default


def _normalize_tb(tb, B):
    tb = max(1, min(int(tb), B))
    if tb >= B:
        return B                    # block equals full dim: always legal
    if B >= 8:
        tb = max(8, (tb // 8) * 8)  # sublane-dim block must be a multiple of 8
    return tb


def _choose_tb(B, H, C, K, itemsize, pad, w_bytes):
    kind = _tpu_kind()
    if "v7" in kind:
        budget = 20 * 1024 * 1024
    elif "v5" in kind or "v6" in kind:
        budget = 48 * 1024 * 1024
    else:
        budget = 16 * 1024 * 1024

    lane = 128
    cl = -(-C // lane) * lane              # lane-padded widths of f32 temporaries
    c2l = -(-(2 * C) // lane) * lane
    kcl = -(-(K * C) // lane) * lane
    hc = H * C

    io_row = 4 * hc * itemsize             # 2x in + 2x out (double-buffered, dense)
    f32_row = 4 * (2 * H * cl              # x + gated
                   + (H + 2 * pad) * cl    # padded activation
                   + H * kcl               # im2col operand
                   + H * c2l)              # f32 accumulator
    per_row = io_row + f32_row

    avail = max(budget - 2 * w_bytes, per_row)   # weights/bias double-buffered
    tb = max(1, avail // per_row)
    if "v7" in kind and B >= 16:
        tb = min(tb, -(-B // 2))           # >= 2 grid steps: keep both TCs busy
    return _normalize_tb(tb, B)


# ---------------------------------------------------------------------------
# One-time parameter repack (hoisted out of the forward pass):
#   torch weight (2C, C, K, 1) -> (K*C, 2C) im2col layout; cols [:C]=out, [C:]=gate.
# ---------------------------------------------------------------------------
def pack_stacked_cnn_params(params):
    C = params[0][0].shape[1]
    K = params[0][0].shape[2]
    w_stack = jnp.stack(
        [jnp.transpose(w[:, :, :, 0], (2, 1, 0)).reshape(K * C, 2 * C)
         for w, _ in params]).astype(jnp.float32)                     # (L, K*C, 2C)
    b_stack = jnp.stack(
        [b.reshape(1, 2 * C) for _, b in params]).astype(jnp.float32)  # (L, 1, 2C)
    return w_stack, b_stack


def stacked_cnn_forward_pallas(x_nchw, w_stack, b_stack, tb=None):
    """StackedCNN.forward (eval mode). x_nchw: (N, C, H, W)."""
    N, C, H, W = x_nchw.shape
    L, KC, C2 = w_stack.shape
    assert C2 == 2 * C and KC % C == 0
    K = KC // C
    assert K % 2 == 1, "cnn_kernel_width must be odd for residual shapes to match"
    pad = K // 2
    B = N * W
    HC = H * C

    # (N, C, H, W) -> (N, W, H, C) -> lane-dense (B, H*C) slab.
    # TODO(synk): for bandwidth-bound production configs ship x/weights in bfloat16
    # (accumulation is already f32); kept f32 here to match the f32 reference exactly.
    x = jnp.transpose(x_nchw, (0, 3, 2, 1)).reshape(B, HC)

    w_bytes = (w_stack.size * w_stack.dtype.itemsize
               + b_stack.size * b_stack.dtype.itemsize)
    if tb is not None:
        TB = _normalize_tb(tb, B)
    else:
        TB = _choose_tb(B, H, C, K, x.dtype.itemsize, pad, w_bytes)

    kernel = functools.partial(_stacked_gated_conv_kernel,
                               L=L, K=K, H=H, C=C, pad=pad)

    flops = 2 * B * H * L * KC * (2 * C) + 6 * B * H * C * L
    transcendentals = B * H * C * L
    bytes_accessed = 2 * B * HC * x.dtype.itemsize + w_bytes

    cp_kwargs = dict(dimension_semantics=("parallel",))
    limit = _vmem_limit_bytes()
    if limit is not None:
        cp_kwargs["vmem_limit_bytes"] = limit

    out = pl.pallas_call(
        kernel,
        out_shape=jax.ShapeDtypeStruct((B, HC), x.dtype),
        grid_spec=pltpu.PrefetchScalarGridSpec(
            num_scalar_prefetch=0,
            grid=(pl.cdiv(B, TB),),
            in_specs=[
                pl.BlockSpec((TB, HC), lambda i: (i, 0)),
                # Weights/bias resident across all grid steps (constant index map).
                # TODO(synk): for production-sized C*L single-buffer / stream these
                # per layer; at the shapes here they are a few KiB.
                pl.BlockSpec((L, KC, 2 * C), lambda i: (0, 0, 0)),
                pl.BlockSpec((L, 1, 2 * C), lambda i: (0, 0, 0)),
            ],
            out_specs=pl.BlockSpec((TB, HC), lambda i: (i, 0)),
        ),
        compiler_params=pltpu.CompilerParams(**cp_kwargs),
        cost_estimate=pl.CostEstimate(flops=flops,
                                      transcendentals=transcendentals,
                                      bytes_accessed=bytes_accessed),
    )(x, w_stack, b_stack)

    return jnp.transpose(out.reshape(N, W, H, C), (0, 3, 2, 1))


# ---------------------------------------------------------------------------
# Parameter construction (deterministic, matching torch Conv2d shapes):
#   weight: (2*C, C, K, 1), bias: (2*C,)
#   xavier_uniform_ with gain = sqrt(4*(1-dropout))
# ---------------------------------------------------------------------------
def init_stacked_cnn_params(key, num_layers, input_size, width=3, dropout=0.2):
    C, K = input_size, width
    gain = (4.0 * (1.0 - dropout)) ** 0.5
    fan_in = C * K * 1
    fan_out = 2 * C * K * 1
    w_bound = gain * (6.0 / (fan_in + fan_out)) ** 0.5
    b_bound = 1.0 / (fan_in ** 0.5)
    params = []
    for _ in range(num_layers):
        key, kw, kb = jax.random.split(key, 3)
        weight = jax.random.uniform(kw, (2 * C, C, K, 1), jnp.float32, -w_bound, w_bound)
        bias = jax.random.uniform(kb, (2 * C,), jnp.float32, -b_bound, b_bound)
        params.append((weight, bias))
    return params


# ---------------------------------------------------------------------------
# Pure-JAX reference (for correctness check)
# ---------------------------------------------------------------------------
def stacked_cnn_forward_ref(x_nchw, params):
    x = x_nchw
    C = x.shape[1]
    for weight, bias in params:
        K = weight.shape[2]
        y = jax.lax.conv_general_dilated(
            x, weight, window_strides=(1, 1),
            padding=((K // 2, K // 2), (0, 0)),
            dimension_numbers=("NCHW", "OIHW", "NCHW"))
        y = y + bias[None, :, None, None]
        out, gate = y[:, :C], y[:, C:]
        x = (x + out * jax.nn.sigmoid(gate)) * SCALE_WEIGHT
    return x


if __name__ == "__main__":
    key = jax.random.PRNGKey(0)
    kx, kp = jax.random.split(key)

    N, C, H, W = 2, 8, 16, 8          # small NCHW input; B = N*W = 16, H*C = 128
    num_layers, width, dropout = 2, 3, 0.2

    x = jax.random.normal(kx, (N, C, H, W), jnp.float32)
    params = init_stacked_cnn_params(kp, num_layers, C, width, dropout)
    w_stack, b_stack = pack_stacked_cnn_params(params)   # hoisted one-time repack

    y_ref = jax.block_until_ready(stacked_cnn_forward_ref(x, params))

    # Default TB (auto-sized) and a forced multi-step grid (TB=8 -> 2 grid steps).
    y1 = jax.block_until_ready(stacked_cnn_forward_pallas(x, w_stack, b_stack))
    y2 = jax.block_until_ready(stacked_cnn_forward_pallas(x, w_stack, b_stack, tb=8))

    assert y1.shape == (N, C, H, W)
    assert jnp.allclose(y1, y_ref, atol=1e-5, rtol=1e-5), (
        float(jnp.max(jnp.abs(y1 - y_ref))))
    assert jnp.allclose(y2, y_ref, atol=1e-5, rtol=1e-5), (
        float(jnp.max(jnp.abs(y2 - y_ref))))

    print("KERNEL_OK")
</pallas_src>

<mosaic_0001>
module attributes {stable_mosaic.version = 11 : i64} {
  func.func @_stacked_gated_conv_kernel(%arg0: i32, %arg1: memref<16x128xf32, #tpu.memory_space<vmem>>, %arg2: memref<2x24x16xf32, #tpu.memory_space<vmem>>, %arg3: memref<2x1x16xf32, #tpu.memory_space<vmem>>, %arg4: memref<16x128xf32, #tpu.memory_space<vmem>>) attributes {dimension_semantics = [#tpu.dimension_semantics<parallel>], iteration_bounds = array<i64: 1>, scalar_prefetch = 0 : i64, scratch_operands = 0 : i64, tpu.core_type = #tpu.core_type<tc>, window_params = [{transform_indices = @transform_0, window_bounds = array<i64: 16, 128>}, {pipeline_mode = #tpu.pipeline_mode<synchronous>, transform_indices = @transform_1, window_bounds = array<i64: 2, 24, 16>}, {pipeline_mode = #tpu.pipeline_mode<synchronous>, transform_indices = @transform_2, window_bounds = array<i64: 2, 1, 16>}, {transform_indices = @transform_3, window_bounds = array<i64: 16, 128>}]} {
    %c0 = arith.constant 0 : index
    %c0_0 = arith.constant 0 : index
    %0 = vector.load %arg1[%c0, %c0_0] : memref<16x128xf32, #tpu.memory_space<vmem>>, vector<16x128xf32>
    %1 = vector.shape_cast %0 : vector<16x128xf32> to vector<16x16x8xf32>
    %cst = arith.constant 0.000000e+00 : f32
    %2 = vector.broadcast %cst : f32 to vector<16x1x8xf32>
    %3 = tpu.concatenate %2, %1, %2 in 1 : vector<16x1x8xf32>, vector<16x16x8xf32>, vector<16x1x8xf32> -> vector<16x18x8xf32>
    %4 = vector.extract_strided_slice %3 {offsets = [0, 0, 0], sizes = [16, 16, 8], strides = [1, 1, 1]} : vector<16x18x8xf32> to vector<16x16x8xf32>
    %5 = vector.shape_cast %4 : vector<16x16x8xf32> to vector<256x8xf32>
    %6 = vector.extract_strided_slice %3 {offsets = [0, 1, 0], sizes = [16, 16, 8], strides = [1, 1, 1]} : vector<16x18x8xf32> to vector<16x16x8xf32>
    %7 = vector.shape_cast %6 : vector<16x16x8xf32> to vector<256x8xf32>
    %8 = vector.extract_strided_slice %3 {offsets = [0, 2, 0], sizes = [16, 16, 8], strides = [1, 1, 1]} : vector<16x18x8xf32> to vector<16x16x8xf32>
    %9 = vector.shape_cast %8 : vector<16x16x8xf32> to vector<256x8xf32>
    %10 = tpu.concatenate %5, %7, %9 in 1 : vector<256x8xf32>, vector<256x8xf32>, vector<256x8xf32> -> vector<256x24xf32>
    %c0_1 = arith.constant 0 : index
    %c0_2 = arith.constant 0 : index
    %c0_3 = arith.constant 0 : index
    %11 = vector.load %arg2[%c0_1, %c0_2, %c0_3] : memref<2x24x16xf32, #tpu.memory_space<vmem>>, vector<1x24x16xf32>
    %12 = vector.shape_cast %11 : vector<1x24x16xf32> to vector<24x16xf32>
    %cst_4 = arith.constant dense<0.000000e+00> : vector<256x16xf32>
    %13 = tpu.matmul %10, %12, %cst_4 {dimension_numbers = #tpu.dot_dimension_numbers<[1], [0], [0], [1], [0, 0, 1, 1], [], []>} : vector<256x24xf32>, vector<24x16xf32>, vector<256x16xf32> -> vector<256x16xf32>
    %c0_5 = arith.constant 0 : index
    %c0_6 = arith.constant 0 : index
    %c0_7 = arith.constant 0 : index
    %14 = vector.load %arg3[%c0_5, %c0_6, %c0_7] : memref<2x1x16xf32, #tpu.memory_space<vmem>>, vector<1x1x16xf32>
    %15 = vector.shape_cast %14 : vector<1x1x16xf32> to vector<1x16xf32>
    %16 = vector.broadcast %15 : vector<1x16xf32> to vector<256x16xf32>
    %17 = arith.addf %13, %16 : vector<256x16xf32>
    %18 = vector.extract_strided_slice %17 {offsets = [0, 0], sizes = [256, 8], strides = [1, 1]} : vector<256x16xf32> to vector<256x8xf32>
    %19 = vector.extract_strided_slice %17 {offsets = [0, 8], sizes = [256, 8], strides = [1, 1]} : vector<256x16xf32> to vector<256x8xf32>
    %20 = arith.negf %19 : vector<256x8xf32>
    %21 = math.exp %20 : vector<256x8xf32>
    %cst_8 = arith.constant 1.000000e+00 : f32
    %22 = vector.broadcast %cst_8 : f32 to vector<256x8xf32>
    %23 = arith.addf %22, %21 : vector<256x8xf32>
    %24 = arith.divf %22, %23 : vector<256x8xf32>
    %25 = arith.mulf %18, %24 : vector<256x8xf32>
    %26 = vector.shape_cast %25 : vector<256x8xf32> to vector<16x16x8xf32>
    %27 = arith.addf %1, %26 : vector<16x16x8xf32>
    %cst_9 = arith.constant 0.707106769 : f32
    %28 = vector.broadcast %cst_9 : f32 to vector<16x16x8xf32>
    %29 = arith.mulf %27, %28 : vector<16x16x8xf32>
    %30 = tpu.concatenate %2, %29, %2 in 1 : vector<16x1x8xf32>, vector<16x16x8xf32>, vector<16x1x8xf32> -> vector<16x18x8xf32>
    %31 = vector.extract_strided_slice %30 {offsets = [0, 0, 0], sizes = [16, 16, 8], strides = [1, 1, 1]} : vector<16x18x8xf32> to vector<16x16x8xf32>
    %32 = vector.shape_cast %31 : vector<16x16x8xf32> to vector<256x8xf32>
    %33 = vector.extract_strided_slice %30 {offsets = [0, 1, 0], sizes = [16, 16, 8], strides = [1, 1, 1]} : vector<16x18x8xf32> to vector<16x16x8xf32>
    %34 = vector.shape_cast %33 : vector<16x16x8xf32> to vector<256x8xf32>
    %35 = vector.extract_strided_slice %30 {offsets = [0, 2, 0], sizes = [16, 16, 8], strides = [1, 1, 1]} : vector<16x18x8xf32> to vector<16x16x8xf32>
    %36 = vector.shape_cast %35 : vector<16x16x8xf32> to vector<256x8xf32>
    %37 = tpu.concatenate %32, %34, %36 in 1 : vector<256x8xf32>, vector<256x8xf32>, vector<256x8xf32> -> vector<256x24xf32>
    %c1 = arith.constant 1 : index
    %c0_10 = arith.constant 0 : index
    %c0_11 = arith.constant 0 : index
    %38 = vector.load %arg2[%c1, %c0_10, %c0_11] : memref<2x24x16xf32, #tpu.memory_space<vmem>>, vector<1x24x16xf32>
    %39 = vector.shape_cast %38 : vector<1x24x16xf32> to vector<24x16xf32>
    %cst_12 = arith.constant dense<0.000000e+00> : vector<256x16xf32>
    %40 = tpu.matmul %37, %39, %cst_12 {dimension_numbers = #tpu.dot_dimension_numbers<[1], [0], [0], [1], [0, 0, 1, 1], [], []>} : vector<256x24xf32>, vector<24x16xf32>, vector<256x16xf32> -> vector<256x16xf32>
    %c1_13 = arith.constant 1 : index
    %c0_14 = arith.constant 0 : index
    %c0_15 = arith.constant 0 : index
    %41 = vector.load %arg3[%c1_13, %c0_14, %c0_15] : memref<2x1x16xf32, #tpu.memory_space<vmem>>, vector<1x1x16xf32>
    %42 = vector.shape_cast %41 : vector<1x1x16xf32> to vector<1x16xf32>
    %43 = vector.broadcast %42 : vector<1x16xf32> to vector<256x16xf32>
    %44 = arith.addf %40, %43 : vector<256x16xf32>
    %45 = vector.extract_strided_slice %44 {offsets = [0, 0], sizes = [256, 8], strides = [1, 1]} : vector<256x16xf32> to vector<256x8xf32>
    %46 = vector.extract_strided_slice %44 {offsets = [0, 8], sizes = [256, 8], strides = [1, 1]} : vector<256x16xf32> to vector<256x8xf32>
    %47 = arith.negf %46 : vector<256x8xf32>
    %48 = math.exp %47 : vector<256x8xf32>
    %cst_16 = arith.constant 1.000000e+00 : f32
    %49 = vector.broadcast %cst_16 : f32 to vector<256x8xf32>
    %50 = arith.addf %49, %48 : vector<256x8xf32>
    %51 = arith.divf %49, %50 : vector<256x8xf32>
    %52 = arith.mulf %45, %51 : vector<256x8xf32>
    %53 = vector.shape_cast %52 : vector<256x8xf32> to vector<16x16x8xf32>
    %54 = arith.addf %29, %53 : vector<16x16x8xf32>
    %cst_17 = arith.constant 0.707106769 : f32
    %55 = vector.broadcast %cst_17 : f32 to vector<16x16x8xf32>
    %56 = arith.mulf %54, %55 : vector<16x16x8xf32>
    %57 = vector.shape_cast %56 : vector<16x16x8xf32> to vector<16x128xf32>
    %c0_18 = arith.constant 0 : index
    %c0_19 = arith.constant 0 : index
    %58 = vector.load %arg4[%c0_18, %c0_19] : memref<16x128xf32, #tpu.memory_space<vmem>>, vector<16x128xf32>
    tpu.vector_store %arg4[%c0_18, %c0_19], %57 {strides = array<i32>} : memref<16x128xf32, #tpu.memory_space<vmem>>, vector<16x128xf32>,
    return
  }
  func.func @transform_0(%arg0: i32) -> (i32, i32) {
    %c0_i32 = arith.constant 0 : i32
    %c0_i32_0 = arith.constant 0 : i32
    return %arg0, %c0_i32 : i32, i32
  }
  func.func @transform_1(%arg0: i32) -> (i32, i32, i32) {
    %c0_i32 = arith.constant 0 : i32
    %c0_i32_0 = arith.constant 0 : i32
    %c0_i32_1 = arith.constant 0 : i32
    %c0_i32_2 = arith.constant 0 : i32
    return %c0_i32, %c0_i32_0, %c0_i32_1 : i32, i32, i32
  }
  func.func @transform_2(%arg0: i32) -> (i32, i32, i32) {
    %c0_i32 = arith.constant 0 : i32
    %c0_i32_0 = arith.constant 0 : i32
    %c0_i32_1 = arith.constant 0 : i32
    %c0_i32_2 = arith.constant 0 : i32
    return %c0_i32, %c0_i32_0, %c0_i32_1 : i32, i32, i32
  }
  func.func @transform_3(%arg0: i32) -> (i32, i32) {
    %c0_i32 = arith.constant 0 : i32
    %c0_i32_0 = arith.constant 0 : i32
    return %arg0, %c0_i32 : i32, i32
  }
}

</mosaic_0001>

<bundles_post_ra>
// kernel: tpu_custom_call.1
= control target key start
LH: loop header
LB: loop body
LE: loop exit
PB: predicated region body
PF: predicated region fallthrough
CT: control target
= control target key end

     0   :  { %s4714_s14 = smov 104   ;;  %s4715_s15 = smov 120   ;;  %s6921_s0 = inlined_call_operand.vmem [shape: f32[16,128], index: 0, kind: input, shape index: {}]   ;;  %s6922_s1 = inlined_call_operand.vmem [shape: f32[2,24,16], index: 1, kind: input, shape index: {}]   ;;  %s6923_s2 = inlined_call_operand.vmem [shape: f32[2,1,16], index: 2, kind: input, shape index: {}]   ;;  %s6924_s3 = inlined_call_operand.hbm [shape: f32[16,128], index: 3, kind: output, shape index: {}]  }
   0x1   :  { %v4756_v0 = vld [vmem:[%s6921_s0] sm:$0xff] }
   0x2   :  { %31 = vrot.lane.b32.xlu1 %v4756_v0, %s4714_s14  ;;  %19 = vrot.lane.b32.xlu0 %v4756_v0, %s4715_s15 }
   0x3   :  { %8 = vsyncpa [#allocation3], 0  ;;  %s4716_s16 = smov 96   ;;  %s4717_s17 = smov 112   ;;  %v4789_v1 = vld [vmem:[%s6921_s0 + $0x8] sm:$0xff]  ;;  %v114_v10 = vlaneseq  ;;  %vm685_vm0 = vcmask 1040384  }
   0x4   :  { %s4718_s18 = smov 80   ;;  %s4719_s19 = smov 88   ;;  %v4729_v8 = vmov 1983009808   ;;  %v4730_v19 = vmov 1934713408  }
   0x5   :  { %s4720_s20 = smov 64   ;;  %s4721_s21 = smov 72   ;;  %v112_v9 = vunpack.c.l.s4 %v4729_v8  ;;  %v115_v14 = vshrl.u32 %v114_v10, 7  ;;  %v176_v20 = vunpack.c.l.s4 %v4730_v19  ;;  %vm846_vm1 = vcmask 1046528  }
   0x6   :  { %37 = vrot.lane.b32.xlu1 %v4756_v0, %s4716_s16  ;;  %25 = vrot.lane.b32.xlu0 %v4756_v0, %s4717_s17  ;;  %s4722_s22 = smov 48   ;;  %s4723_s23 = smov 56   ;;  %vm927_vm2 = vcmask 1045504   ;;  %vm1200_vm3 = vcmask 64512   ;;  %vm1233_vm4 = vcmask 130048   ;;  %vm1276_vm5 = vcmask 195584  }
   0x7   :  { %s4724_s24 = smov 32   ;;  %s4725_s25 = smov 40   ;;  %v113_v13 = vunpack.c.0.s8 %v112_v9  ;;  %v177_v27 = vunpack.c.0.s8 %v176_v20  ;;  %vm4041_vm6 = vcmask 261120   ;;  %vm4044_vm7 = vcmask 326656  }
   0x8   :  { %s4726_s26 = smov 16   ;;  %s4727_s27 = smov 24   ;;  %vm4047_vm8 = vcmask 392192   ;;  %vm4050_vm9 = vcmask 457728   ;;  %vm4053_vm10 = vcmask 523264   ;;  %vm4056_vm11 = vcmask 588800  }
   0x9   :  { %s4728_s30 = smov 8   ;;  %v4845_v18 = vsub.s32 %v113_v13, %v115_v14  ;;  %v4867_v35 = vsub.s32 %v177_v27, %v115_v14  ;;  %vm4059_vm12 = vcmask 654336   ;;  %vm4062_vm13 = vcmask 719872  }
   0xa   :  { %49 = vrot.lane.b32.xlu1 %v4756_v0, %s4718_s18  ;;  %43 = vrot.lane.b32.xlu0 %v4756_v0, %s4719_s19  ;;  %vm4065_vm14 = vcmask 785408   ;;  %vm4068_vm15 = vcmask 850944  }
   0xb   :  { %6966 = vst [vmem:[#allocation5_spill] sm:$0xff] %v4845_v18  ;;  %6967 = vst [vmem:[#allocation6_spill] sm:$0xff] %v4867_v35 }
   0xe   :  { %61 = vrot.lane.b32.xlu1 %v4756_v0, %s4720_s20  ;;  %55 = vrot.lane.b32.xlu0 %v4756_v0, %s4721_s21 }
  0x12   :  { %73 = vrot.lane.b32.xlu1 %v4756_v0, %s4722_s22  ;;  %67 = vrot.lane.b32.xlu0 %v4756_v0, %s4723_s23 }
  0x16   :  { %85 = vrot.lane.b32.xlu1 %v4756_v0, %s4724_s24  ;;  %79 = vrot.lane.b32.xlu0 %v4756_v0, %s4725_s25 }
  0x1a   :  { %97 = vrot.lane.b32.xlu1 %v4756_v0, %s4726_s26  ;;  %91 = vrot.lane.b32.xlu0 %v4756_v0, %s4727_s27 }
  0x1e   :  { %103 = vrot.lane.b32.xlu0 %v4756_v0, %s4728_s30  ;;  %21 = vrot.lane.b32.xlu1 %v4789_v1, %s4715_s15 }
  0x22   :  { %33 = vrot.lane.b32.xlu1 %v4789_v1, %s4714_s14  ;;  %27 = vrot.lane.b32.xlu0 %v4789_v1, %s4717_s17 }
  0x26   :  { %45 = vrot.lane.b32.xlu1 %v4789_v1, %s4719_s19  ;;  %39 = vrot.lane.b32.xlu0 %v4789_v1, %s4716_s16 }
  0x2a   :  { %57 = vrot.lane.b32.xlu1 %v4789_v1, %s4721_s21  ;;  %51 = vrot.lane.b32.xlu0 %v4789_v1, %s4718_s18 }
  0x2e   :  { %69 = vrot.lane.b32.xlu1 %v4789_v1, %s4723_s23  ;;  %63 = vrot.lane.b32.xlu0 %v4789_v1, %s4720_s20 }
  0x32   :  { %81 = vrot.lane.b32.xlu1 %v4789_v1, %s4725_s25  ;;  %75 = vrot.lane.b32.xlu0 %v4789_v1, %s4722_s22 }
  0x36   :  { %93 = vrot.lane.b32.xlu1 %v4789_v1, %s4727_s27  ;;  %87 = vrot.lane.b32.xlu0 %v4789_v1, %s4724_s24 }
  0x3a   :  { %105 = vrot.lane.b32.xlu1 %v4789_v1, %s4728_s30  ;;  %99 = vrot.lane.b32.xlu0 %v4789_v1, %s4726_s26 }
  0x74   :  { %v4823_v2 = vpop.permute.xlu1 %31  ;;  %v4825_v3 = vpop.permute.xlu0 %19 }
  0x75   :  { %v125_v23 = vcombine.low %v4825_v3, %v4823_v2 }
  0x77   :  { %v133_v30 = vrot.slane %v125_v23, %v4845_v18 }
  0x78   :  { %v4827_v4 = vpop.permute.xlu1 %37  ;;  %v4829_v5 = vpop.permute.xlu0 %25 }
  0x79   :  { %v109_v21 = vcombine.low %v4756_v0, %v4829_v5 }
  0x7b   :  { %v117_v28 = vrot.slane %v109_v21, %v4845_v18 }
  0x7c   :  { %v4831_v6 = vpop.permute.xlu1 %49  ;;  %v4833_v7 = vpop.permute.xlu0 %43 }
  0x7d   :  { %v141_v22 = vcombine.low %v4827_v4, %v4831_v6  ;;  %v173_v36 = vcombine.low %v117_v28, %v133_v30  ;;  %v174_v8 = vcombine.high %v117_v28, %v133_v30 }
  0x7f   :  { %v149_v29 = vrot.slane %v141_v22, %v4845_v18  ;;  %v181_v42 = vrot.slane %v173_v36, %v4867_v35 }
  0x80   :  { %v4835_v11 = vpop.permute.xlu1 %61  ;;  %v4837_v12 = vpop.permute.xlu0 %55 }
  0x81   :  { %v157_v15 = vcombine.low %v4833_v7, %v4837_v12 }
  0x83   :  { %v165_v24 = vrot.slane %v157_v15, %v4845_v18 }
  0x84   :  { %v4841_v16 = vpop.permute.xlu1 %73  ;;  %v4843_v17 = vpop.permute.xlu0 %67 }
  0x85   :  { %v205_v31 = vcombine.low %v149_v29, %v165_v24  ;;  %v245_v37 = vcombine.low %v4835_v11, %v4841_v16  ;;  %v206_v59 = vcombine.high %v149_v29, %v165_v24 }
  0x87   :  { %v213_v38 = vrot.slane %v205_v31, %v4867_v35  ;;  %v253_v43 = vrot.slane %v245_v37, %v4845_v18  ;;  %v220_v22 = vrot.slane %v206_v59, %v4867_v35 }
  0x88   :  { %v4854_v25 = vpop.permute.xlu1 %85  ;;  %v4856_v26 = vpop.permute.xlu0 %79 }
  0x89   :  { %v261_v32 = vcombine.low %v4843_v17, %v4856_v26  ;;  %v4883_v46 = vcombine.low %v181_v42, %v213_v38  ;;  %v4898_v60 = vcombine.high %v181_v42, %v213_v38  ;;  %v142_v42 = vcombine.high %v4827_v4, %v4831_v6 }
  0x8a   :  { %v126_v4 = vcombine.high %v4825_v3, %v4823_v2 }
  0x8b   :  { %v269_v39 = vrot.slane %v261_v32, %v4845_v18  ;;  %v686_v53 = vrot.slane %v4883_v46, 7  ;;  %6968 = vst [vmem:[#allocation7_spill] sm:$0xff] %v4898_v60  ;;  %v689_v27 = vrot.slane %v4898_v60, 7  ;;  %v188_v32 = vrot.slane %v174_v8, %v4867_v35 }
  0x8c   :  { %v4863_v33 = vpop.permute.xlu0 %91  ;;  %v4865_v34 = vpop.permute.xlu1 %97  ;;  %v4968_v3 = vrot.slane %v142_v42, %v4845_v18 }
  0x8d   :  { %v277_v40 = vcombine.low %v4854_v25, %v4865_v34  ;;  %v309_v47 = vcombine.low %v253_v43, %v269_v39  ;;  %v310_v61 = vcombine.high %v253_v43, %v269_v39  ;;  %v4902_v63 = vsel %vm685_vm0, 0.0, %v686_v53 }
  0x8e   :  { %v847_v21 = vrot.slane %v4902_v63, 1  ;;  %v110_v39 = vcombine.high %v4756_v0, %v4829_v5  ;;  %v4937_v43 = vcombine.low %v188_v32, %v220_v22  ;;  %v278_v2 = vcombine.high %v4854_v25, %v4865_v34 }
  0x8f   :  { %v285_v48 = vrot.slane %v277_v40, %v4845_v18  ;;  %v317_v51 = vrot.slane %v309_v47, %v4867_v35  ;;  %v324_v23 = vrot.slane %v310_v61, %v4867_v35  ;;  %v158_v40 = vcombine.high %v4833_v7, %v4837_v12 }
  0x90   :  { %v4875_v41 = vpop.permute.xlu0 %103  ;;  %v4881_v45 = vpop.permute.xlu1 %21  ;;  %6970 = vst [vmem:[#allocation9_spill] sm:$0xff] %v4937_v43  ;;  %v4941_v47 = vsel %vm685_vm0, 0.0, %v689_v27 }
  0x91   :  { %v293_v44 = vcombine.low %v4863_v33, %v4875_v41 }
  0x93   :  { %v301_v49 = vrot.slane %v293_v44, %v4845_v18  ;;  %v928_v44 = vrot.slane %v4902_v63, 2 }
  0x94   :  { %v4890_v54 = vpop.permute.xlu1 %33  ;;  %v4892_v56 = vpop.permute.xlu0 %27 }
  0x95   :  { %v341_v50 = vcombine.low %v285_v48, %v301_v49  ;;  %v342_v55 = vcombine.high %v285_v48, %v301_v49  ;;  %v294_v48 = vcombine.high %v4863_v33, %v4875_v41  ;;  %v4957_v33 = vrot.slane %v110_v39, %v4845_v18 }
  0x96   :  { %v4960_v41 = vrot.slane %v158_v40, %v4845_v18 }
  0x97   :  { %v349_v52 = vrot.slane %v341_v50, %v4867_v35  ;;  %v356_v9 = vrot.slane %v342_v55, %v4867_v35  ;;  %v692_v55 = vrot.slane %v4937_v43, 7  ;;  %v4975_v59 = vrot.slane %v294_v48, %v4845_v18 }
  0x98   :  { %v4910_v15 = vpop.permute.xlu1 %45  ;;  %v4916_v24 = vpop.permute.xlu0 %39  ;;  %v221_v8 = vcombine.low %v4968_v3, %v4960_v41 }
  0x99   :  { %v4894_v57 = vcombine.low %v317_v51, %v349_v52  ;;  %v4896_v58 = vcombine.high %v317_v51, %v349_v52  ;;  %v4929_v38 = vcombine.low %v324_v23, %v356_v9  ;;  %v262_v51 = vcombine.high %v4843_v17, %v4856_v26 }
  0x9a   :  { %v246_v52 = vcombine.high %v4835_v11, %v4841_v16  ;;  %v4985_v16 = vcombine.high %v324_v23, %v356_v9  ;;  %v933_v23 = vrot.slane %v4941_v47, 2  ;;  %v229_v40 = vrot.slane %v221_v8, %v4867_v35 }
  0x9b   :  { %v687_v62 = vrot.slane %v4894_v57, 7  ;;  %v690_v14 = vrot.slane %v4896_v58, 7  ;;  %6969 = vst [vmem:[#allocation8_spill] sm:$0xff] %v4929_v38  ;;  %v693_v50 = vrot.slane %v4929_v38, 7 }
  0x9c   :  { %v4945_v49 = vpop.permute.xlu1 %57  ;;  %v4951_v6 = vpop.permute.xlu0 %51  ;;  %6971 = vst [vmem:[#allocation10_spill] sm:$0xff] %v4985_v16  ;;  %v5002_v9 = vrot.slane %v246_v52, %v4845_v18 }
  0x9d   :  { %v4906_v10 = vsel %vm685_vm0, %v686_v53, %v687_v62  ;;  %v798_v13 = vsel %vm685_vm0, %v687_v62, 0.0  ;;  %v4926_v36 = vsel %vm685_vm0, %v689_v27, %v690_v14  ;;  %v799_v37 = vsel %vm685_vm0, %v690_v14, 0.0 }
  0x9e   :  { %v848_v19 = vrot.slane %v4906_v10, 1  ;;  %v850_v20 = vrot.slane %v798_v13, 1  ;;  %v929_v30 = vrot.slane %v4906_v10, 2  ;;  %v931_v31 = vrot.slane %v798_v13, 2 }
  0x9f   :  { %v853_v5 = vrot.slane %v4926_v36, 1  ;;  %v855_v7 = vrot.slane %v799_v37, 1  ;;  %v852_v53 = vrot.slane %v4941_v47, 1  ;;  %v934_v26 = vrot.slane %v4926_v36, 2 }
  0xa0   :  { %v851_v28 = vsel %vm846_vm1, %v848_v19, %v850_v20  ;;  %v849_v29 = vsel %vm846_vm1, %v847_v21, %v848_v19  ;;  %v932_v0 = vsel %vm927_vm2, %v929_v30, %v931_v31  ;;  %v930_v12 = vsel %vm927_vm2, %v928_v44, %v929_v30  ;;  %v4996_v19 = vpop.permute.xlu1 %69  ;;  %v5004_v21 = vpop.permute.xlu0 %63 }
  0xa1   :  { %1010 = vrot.lane.b32.xlu1 %v851_v28, %s4728_s30  ;;  %1008 = vrot.lane.b32.xlu0 %v849_v29, %s4728_s30  ;;  %v856_v17 = vsel %vm846_vm1, %v853_v5, %v855_v7  ;;  %v936_v25 = vrot.slane %v799_v37, 2  ;;  %v854_v34 = vsel %vm846_vm1, %v852_v53, %v853_v5  ;;  %v4982_v61 = vsel %vm685_vm0, %v692_v55, %v693_v50 }
  0xa2   :  { %v800_v11 = vsel %vm685_vm0, %v693_v50, 0.0  ;;  %v140_v62 = vrot.slane %v126_v4, %v4845_v18  ;;  %v4991_v13 = vrot.slane %v262_v51, %v4845_v18  ;;  %v4994_v14 = vrot.slane %v278_v2, %v4845_v18 }
  0xa3   :  { %v4999_v20 = vcombine.high %v188_v32, %v220_v22  ;;  %v5008_v27 = vsel %vm685_vm0, 0.0, %v692_v55  ;;  %v937_v29 = vsel %vm927_vm2, %v934_v26, %v936_v25  ;;  %v858_v30 = vrot.slane %v4982_v61, 1 }
  0xa4   :  { %v357_v28 = vcombine.low %v4994_v14, %v4975_v59  ;;  %v860_v31 = vrot.slane %v800_v11, 1  ;;  %v189_v22 = vcombine.low %v4957_v33, %v140_v62  ;;  %v935_v32 = vsel %vm927_vm2, %v933_v23, %v934_v26  ;;  %v5030_v50 = vpop.permute.xlu0 %75 }
  0xa5   :  { %1106 = vrot.lane.b32.xlu1 %v932_v0, %s4726_s26  ;;  %1104 = vrot.lane.b32.xlu0 %v930_v12, %s4726_s26  ;;  %6972 = vst [vmem:[#allocation11_spill] sm:$0xff] %v4999_v20  ;;  %v696_v37 = vrot.slane %v4985_v16, 7  ;;  %v325_v39 = vcombine.low %v5002_v9, %v4991_v13  ;;  %v857_v42 = vrot.slane %v5008_v27, 1  ;;  %v695_v44 = vrot.slane %v4999_v20, 7  ;;  %v5025_v0 = vpop.permute.xlu1 %81 }
  0xa6   :  { %v365_v48 = vrot.slane %v357_v28, %v4867_v35  ;;  %v861_v5 = vsel %vm846_vm1, %v858_v30, %v860_v31  ;;  %v939_v7 = vrot.slane %v4982_v61, 2  ;;  %v941_v4 = vrot.slane %v800_v11, 2 }
  0xa7   :  { %v197_v12 = vrot.slane %v189_v22, %v4867_v35  ;;  %v859_v51 = vsel %vm846_vm1, %v857_v42, %v858_v30  ;;  %v5035_v2 = vsel %vm685_vm0, %v695_v44, %v696_v37  ;;  %v801_v52 = vsel %vm685_vm0, %v696_v37, 0.0 }
  0xa8   :  { %v190_v53 = vcombine.high %v4957_v33, %v140_v62  ;;  %v222_v55 = vcombine.high %v4968_v3, %v4960_v41  ;;  %v5049_v11 = vsel %vm685_vm0, 0.0, %v695_v44  ;;  %v942_v8 = vsel %vm927_vm2, %v939_v7, %v941_v4  ;;  %v5069_v22 = vpop.permute.xlu0 %87 }
  0xa9   :  { %1014 = vrot.lane.b32.xlu1 %v856_v17, %s4728_s30  ;;  %1012 = vrot.lane.b32.xlu0 %v854_v34, %s4728_s30  ;;  %v333_v17 = vrot.slane %v325_v39, %v4867_v35  ;;  %v5043_v26 = vcombine.low %v197_v12, %v229_v40  ;;  %v5045_v25 = vcombine.high %v197_v12, %v229_v40  ;;  %v938_v34 = vrot.slane %v5008_v27, 2 }
  0xaa   :  { %v863_v33 = vrot.slane %v5035_v2, 1  ;;  %v865_v62 = vrot.slane %v801_v52, 1  ;;  %v5058_v3 = vrot.slane %v190_v53, %v4867_v35  ;;  %v5061_v28 = vrot.slane %v222_v55, %v4867_v35 }
  0xab   :  { %6973 = vst [vmem:[#allocation12_spill] sm:$0xff] %v5043_v26  ;;  %6974 = vst [vmem:[#allocation13_spill] sm:$0xff] %v5045_v25  ;;  %v5053_v23 = vcombine.low %v333_v17, %v365_v48  ;;  %v940_v41 = vsel %vm927_vm2, %v938_v34, %v939_v7  ;;  %v326_v31 = vcombine.high %v5002_v9, %v4991_v13  ;;  %v698_v37 = vrot.slane %v5043_v26, 7 }
  0xac   :  { %v701_v39 = vrot.slane %v5045_v25, 7  ;;  %v358_v40 = vcombine.high %v4994_v14, %v4975_v59  ;;  %v866_v42 = vsel %vm846_vm1, %v863_v33, %v865_v62  ;;  %v944_v44 = vrot.slane %v5035_v2, 2  ;;  %v5101_v34 = vpop.permute.xlu0 %99 }
  0xad   :  { %1110 = vrot.lane.b32.xlu1 %v937_v29, %s4726_s26  ;;  %1108 = vrot.lane.b32.xlu0 %v935_v32, %s4726_s26  ;;  %6975 = vst [vmem:[#allocation14_spill] sm:$0xff] %v5053_v23  ;;  %v5063_v29 = vpop.permute.xlu1 %93  ;;  %v699_v30 = vrot.slane %v5053_v23, 7  ;;  %v862_v32 = vrot.slane %v5049_v11, 1  ;;  %v5084_v4 = vcombine.high %v333_v17, %v365_v48  ;;  %v5089_v59 = vcombine.low %v5058_v3, %v5061_v28 }
  0xae   :  { %v340_v14 = vrot.slane %v326_v31, %v4867_v35  ;;  %v943_v12 = vrot.slane %v5049_v11, 2  ;;  %v5098_v48 = vsel %vm685_vm0, 0.0, %v698_v37  ;;  %v372_v17 = vrot.slane %v358_v40, %v4867_v35 }
  0xaf   :  { %v864_v13 = vsel %vm846_vm1, %v862_v32, %v863_v33  ;;  %v5081_v9 = vsel %vm685_vm0, %v698_v37, %v699_v30  ;;  %v802_v7 = vsel %vm685_vm0, %v699_v30, 0.0  ;;  %6976 = vst [vmem:[#allocation15_spill] sm:$0xff] %v5084_v4  ;;  %6977 = vst [vmem:[#allocation16_spill] sm:$0xff] %v5089_v59  ;;  %v702_v33 = vrot.slane %v5084_v4, 7 }
  0xb0   :  { %v868_v53 = vrot.slane %v5081_v9, 1  ;;  %v870_v55 = vrot.slane %v802_v7, 1  ;;  %v5107_v62 = vsel %vm685_vm0, 0.0, %v701_v39  ;;  %v381_v30 = vcombine.low %v4789_v1, %v4892_v56 }
  0xb1   :  { %1018 = vrot.lane.b32.xlu1 %v861_v5, %s4728_s30  ;;  %1016 = vrot.lane.b32.xlu0 %v859_v51, %s4728_s30  ;;  %v946_v5 = vrot.slane %v801_v52, 2  ;;  %v5093_v51 = vpop.permute.xlu1 %105  ;;  %v429_v31 = vcombine.low %v4910_v15, %v4945_v49  ;;  %v413_v32 = vcombine.low %v4916_v24, %v4951_v6  ;;  %v533_v37 = vcombine.low %v4996_v19, %v5025_v0 }
  0xb2   :  { %v517_v40 = vcombine.low %v5004_v21, %v5030_v50  ;;  %v5132_v25 = vsel %vm685_vm0, %v701_v39, %v702_v33  ;;  %v803_v4 = vsel %vm685_vm0, %v702_v33, 0.0  ;;  %v5135_v26 = vcombine.low %v340_v14, %v372_v17 }
  0xb3   :  { %v947_v52 = vsel %vm927_vm2, %v944_v44, %v946_v5  ;;  %v549_v5 = vcombine.low %v5069_v22, %v5101_v34  ;;  %v5141_v20 = vrot.slane %v381_v30, %v4845_v18  ;;  %v5151_v39 = vrot.slane %v533_v37, %v4845_v18 }
  0xb4   :  { %6978 = vst [vmem:[#allocation17_spill] sm:$0xff] %v5135_v26  ;;  %v5187_v38 = vcombine.high %v340_v14, %v372_v17 }
  0xb5   :  { %1114 = vrot.lane.b32.xlu1 %v942_v8, %s4726_s26  ;;  %1112 = vrot.lane.b32.xlu0 %v940_v41, %s4726_s26  ;;  %v945_v8 = vsel %vm927_vm2, %v943_v12, %v944_v44  ;;  %v397_v41 = vcombine.low %v4881_v45, %v4890_v54  ;;  %v867_v44 = vrot.slane %v5098_v48, 1  ;;  %v949_v12 = vrot.slane %v5081_v9, 2 }
  0xb6   :  { %v5161_v30 = vrot.slane %v549_v5, %v4845_v18 }
  0xb7   :  { %v5138_v23 = vrot.slane %v397_v41, %v4845_v18  ;;  %v948_v41 = vrot.slane %v5098_v48, 2 }
  0xb9   :  { %1022 = vrot.lane.b32.xlu1 %v866_v42, %s4728_s30  ;;  %1020 = vrot.lane.b32.xlu0 %v864_v13, %s4728_s30  ;;  %v565_v42 = vcombine.low %v5063_v29, %v5093_v51  ;;  %v871_v13 = vsel %vm846_vm1, %v868_v53, %v870_v55  ;;  %v5144_v55 = vrot.slane %v429_v31, %v4845_v18 }
  0xba   :  { %v950_v37 = vsel %vm927_vm2, %v948_v41, %v949_v12 }
  0xbb   :  { %v5157_v33 = vrot.slane %v565_v42, %v4845_v18  ;;  %v445_v42 = vcombine.low %v5141_v20, %v5138_v23 }
  0xbd   :  { %1118 = vrot.lane.b32.xlu1 %v947_v52, %s4726_s26  ;;  %1116 = vrot.lane.b32.xlu0 %v945_v8, %s4726_s26  ;;  %v951_v52 = vrot.slane %v802_v7, 2  ;;  %v869_v8 = vsel %vm846_vm1, %v867_v44, %v868_v53  ;;  %v5147_v7 = vrot.slane %v413_v32, %v4845_v18  ;;  %v5154_v53 = vrot.slane %v517_v40, %v4845_v18 }
  0xbe   :  { %v873_v32 = vrot.slane %v5132_v25, 1  ;;  %v875_v44 = vrot.slane %v803_v4, 1  ;;  %v705_v40 = vrot.slane %v5135_v26, 7  ;;  %v956_v26 = vrot.slane %v803_v4, 2 }
  0xbf   :  { %v952_v31 = vsel %vm927_vm2, %v949_v12, %v951_v52  ;;  %v477_v5 = vcombine.low %v5147_v7, %v5144_v55  ;;  %v872_v52 = vrot.slane %v5107_v62, 1  ;;  %v613_v12 = vcombine.low %v5161_v30, %v5157_v33 }
  0xc0   :  { %v876_v41 = vsel %vm846_vm1, %v873_v32, %v875_v44  ;;  %v804_v43 = vsel %vm685_vm0, %v705_v40, 0.0  ;;  %v453_v44 = vrot.slane %v445_v42, %v4867_v35 }
  0xc1   :  { %1026 = vrot.lane.b32.xlu1 %v871_v13, %s4728_s30  ;;  %1024 = vrot.lane.b32.xlu0 %v869_v8, %s4728_s30  ;;  %v581_v13 = vcombine.low %v5154_v53, %v5151_v39  ;;  %v704_v8 = vrot.slane %v5089_v59, 7  ;;  %v5192_v59 = vcombine.high %v5058_v3, %v5061_v28  ;;  %v485_v4 = vrot.slane %v477_v5, %v4867_v35 }
  0xc2   :  { %v880_v60 = vrot.slane %v804_v43, 1  ;;  %v708_v28 = vrot.slane %v5187_v38, 7 }
  0xc3   :  { %v5184_v16 = vsel %vm685_vm0, %v704_v8, %v705_v40  ;;  %6979 = vst [vmem:[#allocation18_spill] sm:$0xff] %v5192_v59  ;;  %v5200_v14 = vsel %vm685_vm0, 0.0, %v704_v8  ;;  %v589_v17 = vrot.slane %v581_v13, %v4867_v35  ;;  %v621_v40 = vrot.slane %v613_v12, %v4867_v35 }
  0xc4   :  { %v707_v42 = vrot.slane %v5192_v59, 7  ;;  %v5210_v5 = vcombine.low %v453_v44, %v485_v4  ;;  %v959_v13 = vrot.slane %v5184_v16, 2 }
  0xc5   :  { %1122 = vrot.lane.b32.xlu1 %v952_v31, %s4726_s26  ;;  %1120 = vrot.lane.b32.xlu0 %v950_v37, %s4726_s26  ;;  %v954_v31 = vrot.slane %v5132_v25, 2  ;;  %v874_v37 = vsel %vm846_vm1, %v872_v52, %v873_v32  ;;  %v878_v52 = vrot.slane %v5184_v16, 1 }
  0xc6   :  { %6980 = vst [vmem:[#allocation19_spill] sm:$0xff] %v5210_v5 }
  0xc7   :  { %v957_v32 = vsel %vm927_vm2, %v954_v31, %v956_v26  ;;  %v877_v26 = vrot.slane %v5200_v14, 1  ;;  %v881_v8 = vsel %vm846_vm1, %v878_v52, %v880_v60 }
  0xc9   :  { %1030 = vrot.lane.b32.xlu1 %v876_v41, %s4728_s30  ;;  %1028 = vrot.lane.b32.xlu0 %v874_v37, %s4728_s30  ;;  %v953_v41 = vrot.slane %v5107_v62, 2  ;;  %v961_v37 = vrot.slane %v804_v43, 2  ;;  %v879_v12 = vsel %vm846_vm1, %v877_v26, %v878_v52 }
  0xcb   :  { %v955_v3 = vsel %vm927_vm2, %v953_v41, %v954_v31  ;;  %v5217_v31 = vsel %vm685_vm0, %v707_v42, %v708_v28  ;;  %v805_v41 = vsel %vm685_vm0, %v708_v28, 0.0  ;;  %v962_v60 = vsel %vm927_vm2, %v959_v13, %v961_v37 }
  0xcc   :  { %v883_v59 = vrot.slane %v5217_v31, 1  ;;  %v885_v43 = vrot.slane %v805_v41, 1  ;;  %v710_v28 = vrot.slane %v5210_v5, 7  ;;  %v446_v37 = vcombine.high %v5141_v20, %v5138_v23 }
  0xcd   :  { %1126 = vrot.lane.b32.xlu1 %v957_v32, %s4726_s26  ;;  %1124 = vrot.lane.b32.xlu0 %v955_v3, %s4726_s26  ;;  %v5220_v32 = vcombine.low %v589_v17, %v621_v40  ;;  %v958_v3 = vrot.slane %v5200_v14, 2  ;;  %v5245_v5 = vcombine.high %v453_v44, %v485_v4  ;;  %v966_v20 = vrot.slane %v805_v41, 2 }
  0xce   :  { %v460_v44 = vrot.slane %v446_v37, %v4867_v35  ;;  %v5271_v4 = vsel %vm685_vm0, 0.0, %v710_v28 }
  0xcf   :  { %v960_v52 = vsel %vm927_vm2, %v958_v3, %v959_v13  ;;  %v711_v26 = vrot.slane %v5220_v32, 7  ;;  %v614_v13 = vcombine.high %v5161_v30, %v5157_v33  ;;  %v1267_v33 = vld [vmem:[%s6922_s1 + $0x8] sm:$0xff]  ;;  %v713_v37 = vrot.slane %v5245_v5, 7 }
  0xd1   :  { %1034 = vrot.lane.b32.xlu1 %v881_v8, %s4728_s30  ;;  %1032 = vrot.lane.b32.xlu0 %v879_v12, %s4728_s30  ;;  %v5227_v8 = vsel %vm685_vm0, 0.0, %v707_v42  ;;  %v398_v12 = vcombine.high %v4881_v45, %v4890_v54  ;;  %v478_v42 = vcombine.high %v5147_v7, %v5144_v55  ;;  %v886_v45 = vsel %vm846_vm1, %v883_v59, %v885_v43 }
  0xd2   :  { %v882_v3 = vrot.slane %v5227_v8, 1  ;;  %v964_v54 = vrot.slane %v5217_v31, 2  ;;  %v5252_v55 = vsel %vm685_vm0, %v710_v28, %v711_v26  ;;  %v806_v7 = vsel %vm685_vm0, %v711_v26, 0.0 }
  0xd3   :  { %v5264_v30 = vrot.slane %v398_v12, %v4845_v18  ;;  %v5278_v41 = vrot.slane %v614_v13, %v4867_v35  ;;  %v963_v43 = vrot.slane %v5227_v8, 2  ;;  %v887_v12 = vrot.slane %v5271_v4, 1 }
  0xd4   :  { %v884_v23 = vsel %vm846_vm1, %v882_v3, %v883_v59  ;;  %v382_v59 = vcombine.high %v4789_v1, %v4892_v56  ;;  %v888_v1 = vrot.slane %v5252_v55, 1  ;;  %v890_v56 = vrot.slane %v806_v7, 1 }
  0xd5   :  { %1130 = vrot.lane.b32.xlu1 %v962_v60, %s4726_s26  ;;  %1128 = vrot.lane.b32.xlu0 %v960_v52, %s4726_s26  ;;  %v582_v60 = vcombine.high %v5154_v53, %v5151_v39  ;;  %v5255_v39 = vcombine.high %v589_v17, %v621_v40  ;;  %v1266_v53 = vld [vmem:[%s6922_s1] sm:$0xff]  ;;  %v492_v17 = vrot.slane %v478_v42, %v4867_v35 }
  0xd6   :  { %v967_v52 = vsel %vm927_vm2, %v964_v54, %v966_v20  ;;  %v4407_v26 = vpack.c.bf16 %v1267_v33, %v1266_v53  ;;  %v965_v28 = vsel %vm927_vm2, %v963_v43, %v964_v54  ;;  %v430_v13 = vcombine.high %v4910_v15, %v4945_v49 }
  0xd7   :  { %v5275_v40 = vrot.slane %v582_v60, %v4867_v35  ;;  %v714_v42 = vrot.slane %v5255_v39, 7  ;;  %v1268_v60 = vld [vmem:[%s6922_s1 + $0x10] sm:$0xff]  ;;  %v414_v3 = vcombine.high %v4916_v24, %v4951_v6  ;;  %v5298_v54 = vcombine.low %v460_v44, %v492_v17 }
  0xd8   :  { %4408 = vmatprep.subr.bf16.mxu0 %v4407_v26  ;;  %v518_v20 = vcombine.high %v5004_v21, %v5030_v50  ;;  %v550_v15 = vcombine.high %v5069_v22, %v5101_v34  ;;  %v891_v24 = vsel %vm846_vm1, %v888_v1, %v890_v56  ;;  %v969_v49 = vrot.slane %v5252_v55, 2 }
  0xd9   :  { %1038 = vrot.lane.b32.xlu1 %v886_v45, %s4728_s30  ;;  %1036 = vrot.lane.b32.xlu0 %v884_v23, %s4728_s30  ;;  %v534_v45 = vcombine.high %v4996_v19, %v5025_v0  ;;  %v566_v23 = vcombine.high %v5063_v29, %v5093_v51  ;;  %v971_v6 = vrot.slane %v806_v7, 2  ;;  %v968_v19 = vrot.slane %v5271_v4, 2 }
  0xda   :  { %4410 = vmatpush3.bf16.msra.mxu0 %v4407_v26  ;;  %v889_v0 = vsel %vm846_vm1, %v887_v12, %v888_v1  ;;  %v5312_v21 = vsel %vm685_vm0, %v713_v37, %v714_v42  ;;  %v807_v50 = vsel %vm685_vm0, %v714_v42, 0.0  ;;  %v5317_v29 = vcombine.low %v5275_v40, %v5278_v41 }
  0xdb   :  { %4303 = vmatprep.subr.mxu0 %v1268_v60  ;;  %v5320_v22 = vrot.slane %v382_v59, %v4845_v18  ;;  %v5323_v51 = vrot.slane %v430_v13, %v4845_v18  ;;  %v5326_v34 = vrot.slane %v414_v3, %v4845_v18  ;;  %v5330_v7 = vsel %vm685_vm0, 0.0, %v713_v37 }
  0xdc   :  { %v5333_v53 = vrot.slane %v534_v45, %v4845_v18  ;;  %v5336_v33 = vrot.slane %v518_v20, %v4845_v18  ;;  %v5339_v59 = vrot.slane %v566_v23, %v4845_v18  ;;  %v5342_v43 = vrot.slane %v550_v15, %v4845_v18 }
  0xdd   :  { %1134 = vrot.lane.b32.xlu1 %v967_v52, %s4726_s26  ;;  %1132 = vrot.lane.b32.xlu0 %v965_v28, %s4726_s26  ;;  %v972_v52 = vsel %vm927_vm2, %v969_v49, %v971_v6  ;;  %v893_v1 = vrot.slane %v5312_v21, 1  ;;  %v895_v56 = vrot.slane %v807_v50, 1  ;;  %v970_v26 = vsel %vm927_vm2, %v968_v19, %v969_v49 }
  0xde   :  { %4304 = vmatpush3.msra.mxu0 %v1268_v60  ;;  %v892_v28 = vrot.slane %v5330_v7, 1  ;;  %v716_v12 = vrot.slane %v5298_v54, 7  ;;  %v717_v37 = vrot.slane %v5317_v29, 7  ;;  %v461_v42 = vcombine.low %v5320_v22, %v5264_v30 }
  0xdf   :  { %v493_v60 = vcombine.low %v5326_v34, %v5323_v51  ;;  %v5356_v13 = vcombine.high %v460_v44, %v492_v17  ;;  %v597_v3 = vcombine.low %v5336_v33, %v5333_v53  ;;  %v629_v45 = vcombine.low %v5342_v43, %v5339_v59 }
  0xe0   :  { %v896_v20 = vsel %vm846_vm1, %v893_v1, %v895_v56  ;;  %v974_v23 = vrot.slane %v5312_v21, 2  ;;  %v976_v15 = vrot.slane %v807_v50, 2  ;;  %v894_v49 = vsel %vm846_vm1, %v892_v28, %v893_v1 }
  0xe1   :  { %1042 = vrot.lane.b32.xlu1 %v891_v24, %s4728_s30  ;;  %1040 = vrot.lane.b32.xlu0 %v889_v0, %s4728_s30  ;;  %v973_v24 = vrot.slane %v5330_v7, 2  ;;  %v5368_v44 = vsel %vm685_vm0, %v716_v12, %v717_v37  ;;  %v808_v17 = vsel %vm685_vm0, %v717_v37, 0.0  ;;  %v5373_v6 = vcombine.high %v5275_v40, %v5278_v41 }
  0xe2   :  { %v5377_v19 = vsel %vm685_vm0, 0.0, %v716_v12  ;;  %v469_v0 = vrot.slane %v461_v42, %v4867_v35  ;;  %v501_v50 = vrot.slane %v493_v60, %v4867_v35  ;;  %v637_v1 = vrot.slane %v629_v45, %v4867_v35 }
  0xe3   :  { %v977_v56 = vsel %vm927_vm2, %v974_v23, %v976_v15  ;;  %v900_v28 = vrot.slane %v808_v17, 1  ;;  %v975_v40 = vsel %vm927_vm2, %v973_v24, %v974_v23  ;;  %v897_v41 = vrot.slane %v5377_v19, 1 }
  0xe4   :  { %v719_v12 = vrot.slane %v5356_v13, 7  ;;  %v720_v37 = vrot.slane %v5373_v6, 7  ;;  %v5391_v42 = vcombine.low %v469_v0, %v501_v50  ;;  %v981_v45 = vrot.slane %v808_v17, 2 }
  0xe5   :  { %1138 = vrot.lane.b32.xlu1 %v972_v52, %s4726_s26  ;;  %1136 = vrot.lane.b32.xlu0 %v970_v26, %s4726_s26  ;;  %v605_v52 = vrot.slane %v597_v3, %v4867_v35  ;;  %v898_v26 = vrot.slane %v5368_v44, 1  ;;  %v979_v3 = vrot.slane %v5368_v44, 2 }
  0xe6   :  { %6981 = vst [vmem:[#allocation20_spill] sm:$0xff] %v5391_v42  ;;  %v5399_v15 = vsel %vm685_vm0, %v719_v12, %v720_v37  ;;  %v809_v24 = vsel %vm685_vm0, %v720_v37, 0.0  ;;  %v722_v37 = vrot.slane %v5391_v42, 7 }
  0xe7   :  { %v901_v60 = vsel %vm846_vm1, %v898_v26, %v900_v28  ;;  %v899_v23 = vsel %vm846_vm1, %v897_v41, %v898_v26  ;;  %v982_v17 = vsel %vm927_vm2, %v979_v3, %v981_v45  ;;  %v903_v28 = vrot.slane %v5399_v15, 1 }
  0xe8   :  { %v5420_v45 = vcombine.high %v469_v0, %v501_v50  ;;  %v984_v18 = vrot.slane %v5399_v15, 2  ;;  %v986_v42 = vrot.slane %v809_v24, 2 }
  0xe9   :  { %1046 = vrot.lane.b32.xlu1 %v896_v20, %s4728_s30  ;;  %1044 = vrot.lane.b32.xlu0 %v894_v49, %s4728_s30  ;;  %v978_v20 = vrot.slane %v5377_v19, 2  ;;  %v5402_v49 = vcombine.low %v605_v52, %v637_v1 }
  0xea   :  { %v987_v50 = vsel %vm927_vm2, %v984_v18, %v986_v42 }
  0xeb   :  { %6982 = vst [vmem:[#allocation21_spill] sm:$0xff] %v5402_v49  ;;  %v980_v26 = vsel %vm927_vm2, %v978_v20, %v979_v3  ;;  %v630_v3 = vcombine.high %v5342_v43, %v5339_v59 }
  0xed   :  { %1142 = vrot.lane.b32.xlu1 %v977_v56, %s4726_s26  ;;  %1140 = vrot.lane.b32.xlu0 %v975_v40, %s4726_s26  ;;  %v5406_v56 = vsel %vm685_vm0, 0.0, %v719_v12  ;;  %v905_v40 = vrot.slane %v809_v24, 1  ;;  %v494_v12 = vcombine.high %v5326_v34, %v5323_v51  ;;  %v644_v0 = vrot.slane %v630_v3, %v4867_v35 }
  0xee   :  { %v902_v41 = vrot.slane %v5406_v56, 1 }
  0xef   :  { %v906_v20 = vsel %vm846_vm1, %v903_v28, %v905_v40  ;;  %v508_v59 = vrot.slane %v494_v12, %v4867_v35  ;;  %v725_v40 = vrot.slane %v5420_v45, 7 }
  0xf1   :  { %1050 = vrot.lane.b32.xlu1 %v901_v60, %s4728_s30  ;;  %1048 = vrot.lane.b32.xlu0 %v899_v23, %s4728_s30  ;;  %v723_v60 = vrot.slane %v5402_v49, 7  ;;  %v462_v23 = vcombine.high %v5320_v22, %v5264_v30  ;;  %v5428_v49 = vcombine.high %v605_v52, %v637_v1  ;;  %v904_v30 = vsel %vm846_vm1, %v902_v41, %v903_v28 }
  0xf2   :  { %v983_v22 = vrot.slane %v5406_v56, 2 }
  0xf3   :  { %v5434_v51 = vsel %vm685_vm0, %v722_v37, %v723_v60  ;;  %v810_v34 = vsel %vm685_vm0, %v723_v60, 0.0 }
  0xf4   :  { %v908_v52 = vrot.slane %v5434_v51, 1  ;;  %v910_v1 = vrot.slane %v810_v34, 1  ;;  %v985_v24 = vsel %vm927_vm2, %v983_v22, %v984_v18  ;;  %v989_v42 = vrot.slane %v5434_v51, 2 }
  0xf5   :  { %1146 = vrot.lane.b32.xlu1 %v982_v17, %s4726_s26  ;;  %1144 = vrot.lane.b32.xlu0 %v980_v26, %s4726_s26  ;;  %v598_v17 = vcombine.high %v5336_v33, %v5333_v53  ;;  %v5439_v53 = vsel %vm685_vm0, 0.0, %v722_v37  ;;  %v476_v33 = vrot.slane %v462_v23, %v4867_v35  ;;  %v726_v26 = vrot.slane %v5428_v49, 7 }
  0xf6   :  { %v907_v28 = vrot.slane %v5439_v53, 1  ;;  %v911_v37 = vsel %vm846_vm1, %v908_v52, %v910_v1  ;;  %v991_v60 = vrot.slane %v810_v34, 2  ;;  %v988_v12 = vrot.slane %v5439_v53, 2 }
  0xf7   :  { %v612_v43 = vrot.slane %v598_v17, %v4867_v35  ;;  %v5453_v41 = vcombine.low %v476_v33, %v508_v59  ;;  %v5463_v17 = vsel %vm685_vm0, %v725_v40, %v726_v26  ;;  %v811_v3 = vsel %vm685_vm0, %v726_v26, 0.0 }
  0xf8   :  { %v909_v18 = vsel %vm846_vm1, %v907_v28, %v908_v52  ;;  %v913_v22 = vrot.slane %v5463_v17, 1  ;;  %v915_v34 = vrot.slane %v811_v3, 1  ;;  %v5478_v28 = vcombine.high %v476_v33, %v508_v59 }
  0xf9   :  { %1054 = vrot.lane.b32.xlu1 %v906_v20, %s4728_s30  ;;  %1052 = vrot.lane.b32.xlu0 %v904_v30, %s4728_s30  ;;  %v5457_v23 = vcombine.low %v612_v43, %v644_v0  ;;  %v5468_v20 = vsel %vm685_vm0, 0.0, %v725_v40  ;;  %v992_v30 = vsel %vm927_vm2, %v989_v42, %v991_v60  ;;  %v728_v1 = vrot.slane %v5453_v41, 7 }
  0xfa   :  { %v912_v52 = vrot.slane %v5468_v20, 1  ;;  %6983 = vst [vmem:[#allocation22_spill] sm:$0xff] %v5478_v28  ;;  %v916_v40 = vsel %vm846_vm1, %v913_v22, %v915_v34  ;;  %v994_v26 = vrot.slane %v5463_v17, 2  ;;  %v993_v60 = vrot.slane %v5468_v20, 2 }
  0xfb   :  { %v5493_v33 = vsel %vm685_vm0, 0.0, %v728_v1 }
  0xfd   :  { %1150 = vrot.lane.b32.xlu1 %v987_v50, %s4726_s26  ;;  %1148 = vrot.lane.b32.xlu0 %v985_v24, %s4726_s26  ;;  %v990_v50 = vsel %vm927_vm2, %v988_v12, %v989_v42  ;;  %v729_v24 = vrot.slane %v5457_v23, 7  ;;  %v914_v42 = vsel %vm846_vm1, %v912_v52, %v913_v22  ;;  %v995_v22 = vsel %vm927_vm2, %v993_v60, %v994_v26 }
  0xfe   :  { %v731_v52 = vrot.slane %v5478_v28, 7 }
  0xff   :  { %v812_v12 = vsel %vm685_vm0, %v729_v24, 0.0 }
 0x100   :  { %v920_v34 = vrot.slane %v812_v12, 1 }
 0x101   :  { %1058 = vrot.lane.b32.xlu1 %v911_v37, %s4728_s30  ;;  %1056 = vrot.lane.b32.xlu0 %v909_v18, %s4728_s30  ;;  %v996_v37 = vrot.slane %v811_v3, 2  ;;  %v5486_v18 = vsel %vm685_vm0, %v728_v1, %v729_v24  ;;  %v1001_v24 = vrot.slane %v812_v12, 2 }
 0x102   :  { %v918_v3 = vrot.slane %v5486_v18, 1  ;;  %v999_v1 = vrot.slane %v5486_v18, 2 }
 0x103   :  { %v997_v59 = vsel %vm927_vm2, %v994_v26, %v996_v37  ;;  %v998_v37 = vrot.slane %v5493_v33, 2 }
 0x104   :  { %v1002_v12 = vsel %vm927_vm2, %v999_v1, %v1001_v24 }
 0x105   :  { %1154 = vrot.lane.b32.xlu1 %v992_v30, %s4726_s26  ;;  %1152 = vrot.lane.b32.xlu0 %v990_v50, %s4726_s26  ;;  %v5489_v30 = vcombine.high %v612_v43, %v644_v0  ;;  %v917_v50 = vrot.slane %v5493_v33, 1  ;;  %v921_v0 = vsel %vm846_vm1, %v918_v3, %v920_v34 }
 0x107   :  { %v732_v43 = vrot.slane %v5489_v30, 7 }
 0x109   :  { %1062 = vrot.lane.b32.xlu1 %v916_v40, %s4728_s30  ;;  %1060 = vrot.lane.b32.xlu0 %v914_v42, %s4728_s30  ;;  %v919_v40 = vsel %vm846_vm1, %v917_v50, %v918_v3  ;;  %v5509_v26 = vsel %vm685_vm0, %v731_v52, %v732_v43  ;;  %v813_v60 = vsel %vm685_vm0, %v732_v43, 0.0  ;;  %v5514_v42 = vsel %vm685_vm0, 0.0, %v731_v52 }
 0x10a   :  { %v925_v3 = vrot.slane %v813_v60, 1  ;;  %v1000_v50 = vsel %vm927_vm2, %v998_v37, %v999_v1  ;;  %v922_v43 = vrot.slane %v5514_v42, 1  ;;  %v1006_v37 = vrot.slane %v813_v60, 2 }
 0x10d   :  { %1158 = vrot.lane.b32.xlu1 %v997_v59, %s4726_s26  ;;  %1156 = vrot.lane.b32.xlu0 %v995_v22, %s4726_s26  ;;  %v923_v22 = vrot.slane %v5509_v26, 1 }
 0x10f   :  { %v926_v1 = vsel %vm846_vm1, %v923_v22, %v925_v3 }
 0x111   :  { %1066 = vrot.lane.b32.xlu1 %v921_v0, %s4728_s30  ;;  %1064 = vrot.lane.b32.xlu0 %v919_v40, %s4728_s30  ;;  %v1004_v40 = vrot.slane %v5509_v26, 2 }
 0x113   :  { %v1011_v59 = vpop.permute.xlu1 %1010  ;;  %v1009_v34 = vpop.permute.xlu0 %1008 }
 0x114   :  { %v1202_v52 = vsel %vm1200_vm3, %v4906_v10, %v1011_v59  ;;  %v1201_v24 = vsel %vm1200_vm3, %v4902_v63, %v1009_v34  ;;  %v1003_v10 = vrot.slane %v5514_v42, 2  ;;  %v1007_v34 = vsel %vm927_vm2, %v1004_v40, %v1006_v37 }
 0x115   :  { %1162 = vrot.lane.b32.xlu1 %v1002_v12, %s4726_s26  ;;  %1160 = vrot.lane.b32.xlu0 %v1000_v50, %s4726_s26  ;;  %v924_v50 = vsel %vm846_vm1, %v922_v43, %v923_v22 }
 0x116   :  { %v1005_v60 = vsel %vm927_vm2, %v1003_v10, %v1004_v40 }
 0x117   :  { %v1107_v0 = vpop.permute.xlu1 %1106  ;;  %v1105_v12 = vpop.permute.xlu0 %1104 }
 0x118   :  { %v1235_v35 = vsel %vm1233_vm4, %v1202_v52, %v1107_v0  ;;  %v1234_v28 = vsel %vm1233_vm4, %v1201_v24, %v1105_v12 }
 0x119   :  { %1070 = vrot.lane.b32.xlu1 %v926_v1, %s4728_s30  ;;  %1068 = vrot.lane.b32.xlu0 %v924_v50, %s4728_s30 }
 0x11a   :  { %4305 = vmatprep.mubr.msk.f32.mxu0 %vm1276_vm5, %v1234_v28 }
 0x11b   :  { %4306 = vmatmul.mubr.msk.f32.vlgmr.msra.gmra.mrb[0].mxu0 %vm1276_vm5, %v1235_v35  ;;  %v1015_v63 = vpop.permute.xlu1 %1014  ;;  %v1013_v59 = vpop.permute.xlu0 %1012 }
 0x11c   :  { %v1204_v22 = vsel %vm1200_vm3, %v4926_v36, %v1015_v63  ;;  %v1203_v43 = vsel %vm1200_vm3, %v4941_v47, %v1013_v59 }
 0x11d   :  { %1166 = vrot.lane.b32.xlu1 %v1007_v34, %s4726_s26  ;;  %1164 = vrot.lane.b32.xlu0 %v1005_v60, %s4726_s26 }
 0x11f   :  { %v1111_v3 = vpop.permute.xlu1 %1110  ;;  %v1109_v35 = vpop.permute.xlu0 %1108 }
 0x120   :  { %v1237_v28 = vsel %vm1233_vm4, %v1204_v22, %v1111_v3  ;;  %v1236_v52 = vsel %vm1233_vm4, %v1203_v43, %v1109_v35 }
 0x121   :  { %4308 = vmatprep.mubr.msk.f32.mxu0 %vm1276_vm5, %v1236_v52 }
 0x122   :  { %4309 = vmatmul.mubr.msk.f32.gmra.mrb[2].mxu0 %vm1276_vm5, %v1237_v28 }
 0x123   :  { %v1019_v0 = vpop.permute.xlu1 %1018  ;;  %v1017_v40 = vpop.permute.xlu0 %1016 }
 0x124   :  { %v1206_v24 = vsel %vm1200_vm3, %v4982_v61, %v1019_v0  ;;  %v1205_v36 = vsel %vm1200_vm3, %v5008_v27, %v1017_v40 }
 0x127   :  { %v1115_v12 = vpop.permute.xlu1 %1114  ;;  %v1113_v1 = vpop.permute.xlu0 %1112 }
 0x128   :  { %v1239_v47 = vsel %vm1233_vm4, %v1206_v24, %v1115_v12  ;;  %v1238_v37 = vsel %vm1233_vm4, %v1205_v36, %v1113_v1 }
 0x129   :  { %4311 = vmatprep.mubr.msk.f32.mxu0 %vm1276_vm5, %v1238_v37 }
 0x12a   :  { %4312 = vmatmul.mubr.msk.f32.gmra.mrb[4].mxu0 %vm1276_vm5, %v1239_v47 }
 0x12b   :  { %v1023_v50 = vpop.permute.xlu1 %1022  ;;  %v1021_v10 = vpop.permute.xlu0 %1020 }
 0x12c   :  { %v1208_v63 = vsel %vm1200_vm3, %v5035_v2, %v1023_v50  ;;  %v1207_v61 = vsel %vm1200_vm3, %v5049_v11, %v1021_v10 }
 0x12f   :  { %v1119_v59 = vpop.permute.xlu1 %1118  ;;  %v1117_v34 = vpop.permute.xlu0 %1116 }
 0x130   :  { %v1241_v27 = vsel %vm1233_vm4, %v1208_v63, %v1119_v59  ;;  %v1240_v60 = vsel %vm1233_vm4, %v1207_v61, %v1117_v34 }
 0x131   :  { %4314 = vmatprep.mubr.msk.f32.mxu0 %vm1276_vm5, %v1240_v60 }
 0x132   :  { %4315 = vmatmul.mubr.msk.f32.gmra.mrb[6].mxu0 %vm1276_vm5, %v1241_v27 }
 0x133   :  { %v1027_v22 = vpop.permute.xlu1 %1026  ;;  %v1025_v3 = vpop.permute.xlu0 %1024 }
 0x134   :  { %v1210_v43 = vsel %vm1200_vm3, %v5081_v9, %v1027_v22  ;;  %v1209_v2 = vsel %vm1200_vm3, %v5098_v48, %v1025_v3 }
 0x137   :  { %v1123_v28 = vpop.permute.xlu1 %1122  ;;  %v1121_v35 = vpop.permute.xlu0 %1120 }
 0x138   :  { %v1243_v11 = vsel %vm1233_vm4, %v1210_v43, %v1123_v28  ;;  %v1242_v52 = vsel %vm1233_vm4, %v1209_v2, %v1121_v35 }
 0x139   :  { %4317 = vmatprep.mubr.msk.f32.mxu0 %vm1276_vm5, %v1242_v52 }
 0x13a   :  { %4318 = vmatmul.mubr.msk.f32.gmra.mrb[8].mxu0 %vm1276_vm5, %v1243_v11 }
 0x13b   :  { %v1031_v0 = vpop.permute.xlu1 %1030  ;;  %v1029_v40 = vpop.permute.xlu0 %1028 }
 0x13c   :  { %v1212_v24 = vsel %vm1200_vm3, %v5132_v25, %v1031_v0  ;;  %v1211_v9 = vsel %vm1200_vm3, %v5107_v62, %v1029_v40 }
 0x13f   :  { %v1127_v12 = vpop.permute.xlu1 %1126  ;;  %v1125_v36 = vpop.permute.xlu0 %1124 }
 0x140   :  { %v1245_v48 = vsel %vm1233_vm4, %v1212_v24, %v1127_v12  ;;  %v1244_v47 = vsel %vm1233_vm4, %v1211_v9, %v1125_v36 }
 0x141   :  { %4320 = vmatprep.mubr.msk.f32.mxu0 %vm1276_vm5, %v1244_v47 }
 0x142   :  { %4321 = vmatmul.mubr.msk.f32.gmra.mrb[10].mxu0 %vm1276_vm5, %v1245_v48 }
 0x143   :  { %v1035_v1 = vpop.permute.xlu1 %1034  ;;  %v1033_v37 = vpop.permute.xlu0 %1032 }
 0x144   :  { %v1214_v50 = vsel %vm1200_vm3, %v5184_v16, %v1035_v1  ;;  %v1213_v25 = vsel %vm1200_vm3, %v5200_v14, %v1033_v37 }
 0x147   :  { %v1131_v10 = vpop.permute.xlu1 %1130  ;;  %v1129_v63 = vpop.permute.xlu0 %1128 }
 0x148   :  { %v1247_v62 = vsel %vm1233_vm4, %v1214_v50, %v1131_v10  ;;  %v1246_v59 = vsel %vm1233_vm4, %v1213_v25, %v1129_v63 }
 0x149   :  { %4323 = vmatprep.mubr.msk.f32.mxu0 %vm1276_vm5, %v1246_v59 }
 0x14a   :  { %4324 = vmatmul.mubr.msk.f32.gmra.mrb[12].mxu0 %vm1276_vm5, %v1247_v62 }
 0x14b   :  { %v1039_v61 = vpop.permute.xlu1 %1038  ;;  %v1037_v27 = vpop.permute.xlu0 %1036 }
 0x14c   :  { %v1216_v34 = vsel %vm1200_vm3, %v5217_v31, %v1039_v61  ;;  %v1215_v16 = vsel %vm1200_vm3, %v5227_v8, %v1037_v27 }
 0x14f   :  { %v1135_v60 = vpop.permute.xlu1 %1134  ;;  %v1133_v22 = vpop.permute.xlu0 %1132 }
 0x150   :  { %v1249_v14 = vsel %vm1233_vm4, %v1216_v34, %v1135_v60  ;;  %v1248_v3 = vsel %vm1233_vm4, %v1215_v16, %v1133_v22 }
 0x151   :  { %4326 = vmatprep.mubr.msk.f32.mxu0 %vm1276_vm5, %v1248_v3 }
 0x152   :  { %4327 = vmatmul.mubr.msk.f32.gmra.mrb[14].mxu0 %vm1276_vm5, %v1249_v14 }
 0x153   :  { %v1043_v43 = vpop.permute.xlu1 %1042  ;;  %v1041_v28 = vpop.permute.xlu0 %1040 }
 0x154   :  { %v1218_v2 = vsel %vm1200_vm3, %v5252_v55, %v1043_v43  ;;  %v1217_v31 = vsel %vm1200_vm3, %v5271_v4, %v1041_v28 }
 0x157   :  { %v1139_v11 = vpop.permute.xlu1 %1138  ;;  %v1137_v35 = vpop.permute.xlu0 %1136 }
 0x158   :  { %v1251_v8 = vsel %vm1233_vm4, %v1218_v2, %v1139_v11  ;;  %v1250_v52 = vsel %vm1233_vm4, %v1217_v31, %v1137_v35 }
 0x159   :  { %4329 = vmatprep.mubr.msk.f32.mxu0 %vm1276_vm5, %v1250_v52 }
 0x15a   :  { %4330 = vmatmul.mubr.msk.f32.gmra.mrb[16].mxu0 %vm1276_vm5, %v1251_v8 }
 0x15b   :  { %v1047_v0 = vpop.permute.xlu1 %1046  ;;  %v1045_v40 = vpop.permute.xlu0 %1044 }
 0x15c   :  { %v1220_v24 = vsel %vm1200_vm3, %v5312_v21, %v1047_v0  ;;  %v1219_v55 = vsel %vm1200_vm3, %v5330_v7, %v1045_v40 }
 0x15f   :  { %v1143_v12 = vpop.permute.xlu1 %1142  ;;  %v1141_v9 = vpop.permute.xlu0 %1140 }
 0x160   :  { %v1253_v4 = vsel %vm1233_vm4, %v1220_v24, %v1143_v12  ;;  %v1252_v48 = vsel %vm1233_vm4, %v1219_v55, %v1141_v9 }
 0x161   :  { %4332 = vmatprep.mubr.msk.f32.mxu0 %vm1276_vm5, %v1252_v48 }
 0x162   :  { %4333 = vmatmul.mubr.msk.f32.gmra.mrb[18].mxu0 %vm1276_vm5, %v1253_v4 }
 0x163   :  { %v1051_v36 = vpop.permute.xlu1 %1050  ;;  %v1049_v47 = vpop.permute.xlu0 %1048 }
 0x164   :  { %v1222_v1 = vsel %vm1200_vm3, %v5368_v44, %v1051_v36  ;;  %v1221_v21 = vsel %vm1200_vm3, %v5377_v19, %v1049_v47 }
 0x167   :  { %v1147_v37 = vpop.permute.xlu1 %1146  ;;  %v1145_v50 = vpop.permute.xlu0 %1144 }
 0x168   :  { %v1255_v7 = vsel %vm1233_vm4, %v1222_v1, %v1147_v37  ;;  %v1254_v10 = vsel %vm1233_vm4, %v1221_v21, %v1145_v50  ;;  %v5663_v1 = vld [vmem:[%s6923_s2] ss:$0 sm:$0xff] }
 0x169   :  { %4335 = vmatprep.mubr.msk.f32.mxu0 %vm1276_vm5, %v1254_v10 }
 0x16a   :  { %4336 = vmatmul.mubr.msk.f32.gmra.mrb[20].mxu0 %vm1276_vm5, %v1255_v7 }
 0x16b   :  { %v1055_v25 = vpop.permute.xlu1 %1054  ;;  %v1053_v62 = vpop.permute.xlu0 %1052 }
 0x16c   :  { %v1224_v63 = vsel %vm1200_vm3, %v5399_v15, %v1055_v25  ;;  %v1223_v44 = vsel %vm1200_vm3, %v5406_v56, %v1053_v62 }
 0x16f   :  { %v1151_v59 = vpop.permute.xlu1 %1150  ;;  %v1149_v61 = vpop.permute.xlu0 %1148 }
 0x170   :  { %v1257_v19 = vsel %vm1233_vm4, %v1224_v63, %v1151_v59  ;;  %v1256_v27 = vsel %vm1233_vm4, %v1223_v44, %v1149_v61 }
 0x171   :  { %4338 = vmatprep.mubr.msk.f32.mxu0 %vm1276_vm5, %v1256_v27 }
 0x172   :  { %4339 = vmatmul.mubr.msk.f32.gmra.mrb[22].mxu0 %vm1276_vm5, %v1257_v19 }
 0x173   :  { %v1059_v34 = vpop.permute.xlu1 %1058  ;;  %v1057_v60 = vpop.permute.xlu0 %1056 }
 0x174   :  { %v1226_v16 = vsel %vm1200_vm3, %v5434_v51, %v1059_v34  ;;  %v1225_v15 = vsel %vm1200_vm3, %v5439_v53, %v1057_v60 }
 0x177   :  { %v1155_v14 = vpop.permute.xlu1 %1154  ;;  %v1153_v22 = vpop.permute.xlu0 %1152 }
 0x178   :  { %v1259_v56 = vsel %vm1233_vm4, %v1226_v16, %v1155_v14  ;;  %v1258_v3 = vsel %vm1233_vm4, %v1225_v15, %v1153_v22 }
 0x179   :  { %4341 = vmatprep.mubr.msk.f32.mxu0 %vm1276_vm5, %v1258_v3 }
 0x17a   :  { %4342 = vmatmul.mubr.msk.f32.gmra.mrb[24].mxu0 %vm1276_vm5, %v1259_v56 }
 0x17b   :  { %v1063_v43 = vpop.permute.xlu1 %1062  ;;  %v1061_v28 = vpop.permute.xlu0 %1060 }
 0x17c   :  { %v1228_v2 = vsel %vm1200_vm3, %v5463_v17, %v1063_v43  ;;  %v1227_v51 = vsel %vm1200_vm3, %v5468_v20, %v1061_v28 }
 0x17f   :  { %v1159_v11 = vpop.permute.xlu1 %1158  ;;  %v1157_v31 = vpop.permute.xlu0 %1156 }
 0x180   :  { %v1261_v53 = vsel %vm1233_vm4, %v1228_v2, %v1159_v11  ;;  %v1260_v8 = vsel %vm1233_vm4, %v1227_v51, %v1157_v31 }
 0x181   :  { %4344 = vmatprep.mubr.msk.f32.mxu0 %vm1276_vm5, %v1260_v8 }
 0x182   :  { %4345 = vmatmul.mubr.msk.f32.gmra.mrb[26].mxu0 %vm1276_vm5, %v1261_v53 }
 0x183   :  { %v1067_v35 = vpop.permute.xlu1 %1066  ;;  %v1065_v52 = vpop.permute.xlu0 %1064 }
 0x184   :  { %v1230_v0 = vsel %vm1200_vm3, %v5486_v18, %v1067_v35  ;;  %v1229_v17 = vsel %vm1200_vm3, %v5493_v33, %v1065_v52 }
 0x187   :  { %v1163_v40 = vpop.permute.xlu1 %1162  ;;  %v1161_v24 = vpop.permute.xlu0 %1160 }
 0x188   :  { %v1263_v20 = vsel %vm1233_vm4, %v1230_v0, %v1163_v40  ;;  %v1262_v12 = vsel %vm1233_vm4, %v1229_v17, %v1161_v24 }
 0x189   :  { %4347 = vmatprep.mubr.msk.f32.mxu0 %vm1276_vm5, %v1262_v12 }
 0x18a   :  { %4348 = vmatmul.mubr.msk.f32.gmra.mrb[28].mxu0 %vm1276_vm5, %v1263_v20 }
 0x18b   :  { %v1071_v55 = vpop.permute.xlu1 %1070  ;;  %v1069_v4 = vpop.permute.xlu0 %1068 }
 0x18c   :  { %v1232_v9 = vsel %vm1200_vm3, %v5509_v26, %v1071_v55  ;;  %v1231_v18 = vsel %vm1200_vm3, %v5514_v42, %v1069_v4 }
 0x18f   :  { %v1167_v48 = vpop.permute.xlu1 %1166  ;;  %v1165_v36 = vpop.permute.xlu0 %1164 }
 0x190   :  { %v1265_v33 = vsel %vm1233_vm4, %v1232_v9, %v1167_v48  ;;  %v1264_v47 = vsel %vm1233_vm4, %v1231_v18, %v1165_v36 }
 0x191   :  { %4350 = vmatprep.mubr.msk.f32.mxu0 %vm1276_vm5, %v1264_v47 }
 0x192   :  { %4351 = vmatmul.mubr.msk.f32.gmra.mrb[30].mxu0 %vm1276_vm5, %v1265_v33 }
 0x1ee   :  { %v4307_v37 = vpop.f32.mrb[0].mxu0 }
 0x1ef   :  { %v5666_v26 = vadd.f32 %v4307_v37, %v5663_v1  ;;  %v1439_v21 = vpop.f32.mrb[1].mxu0 }
 0x1f0   :  { %v5669_v42 = vadd.f32 %v5663_v1, %v1439_v21 }
 0x1f1   :  { %v4129_v7 = vmul.f32 -1.442695, %v5666_v26 }
 0x1f2   :  { %v4128_v50 = vmul.f32 -1.442695, %v5669_v42 }
 0x1f3   :  { %4434 = vpow2.f32 %v4129_v7 }
 0x1f4   :  { %4436 = vpow2.f32 %v4128_v50 }
 0x1f5   :  { %v4310_v10 = vpop.f32.mrb[2].mxu0 }
 0x1f6   :  { %v5674_v25 = vadd.f32 %v4310_v10, %v5663_v1  ;;  %v1449_v62 = vpop.f32.mrb[3].mxu0 }
 0x1f7   :  { %v5677_v63 = vadd.f32 %v5663_v1, %v1449_v62 }
 0x1f8   :  { %v4131_v59 = vmul.f32 -1.442695, %v5674_v25 }
 0x1f9   :  { %v4130_v44 = vmul.f32 -1.442695, %v5677_v63 }
 0x1fa   :  { %4438 = vpow2.f32 %v4131_v59 }
 0x1fb   :  { %4440 = vpow2.f32 %v4130_v44 }
 0x1fd   :  { %v4435_v19 = vpop.eup %4434  ;;  %v4313_v34 = vpop.f32.mrb[4].mxu0 }
 0x1fe   :  { %v4437_v61 = vpop.eup %4436  ;;  %v1695_v27 = vadd.f32 1.0, %v4435_v19  ;;  %v5682_v16 = vadd.f32 %v4313_v34, %v5663_v1  ;;  %v1459_v14 = vpop.f32.mrb[5].mxu0 }
 0x1ff   :  { %v1694_v60 = vadd.f32 1.0, %v4437_v61  ;;  %v5685_v15 = vadd.f32 %v5663_v1, %v1459_v14 }
 0x200   :  { %4442 = vrcp.f32 %v1695_v27  ;;  %v4133_v56 = vmul.f32 -1.442695, %v5682_v16 }
 0x201   :  { %4444 = vrcp.f32 %v1694_v60  ;;  %v4132_v22 = vmul.f32 -1.442695, %v5685_v15 }
 0x202   :  { %4446 = vpow2.f32 %v4133_v56 }
 0x203   :  { %4448 = vpow2.f32 %v4132_v22 }
 0x204   :  { %v4439_v3 = vpop.eup %4438 }
 0x205   :  { %v4441_v43 = vpop.eup %4440  ;;  %v1697_v28 = vadd.f32 1.0, %v4439_v3  ;;  %v4316_v2 = vpop.f32.mrb[6].mxu0 }
 0x206   :  { %v1696_v11 = vadd.f32 1.0, %v4441_v43  ;;  %v5690_v51 = vadd.f32 %v4316_v2, %v5663_v1  ;;  %v1469_v53 = vpop.f32.mrb[7].mxu0 }
 0x207   :  { %4450 = vrcp.f32 %v1697_v28  ;;  %v5693_v31 = vadd.f32 %v5663_v1, %v1469_v53 }
 0x208   :  { %4452 = vrcp.f32 %v1696_v11  ;;  %v4135_v8 = vmul.f32 -1.442695, %v5690_v51 }
 0x209   :  { %v4134_v52 = vmul.f32 -1.442695, %v5693_v31 }
 0x20a   :  { %v4443_v35 = vpop.eup %4442  ;;  %4454 = vpow2.f32 %v4135_v8 }
 0x20b   :  { %v4445_v0 = vpop.eup %4444  ;;  %1824 = vrot.lane.b32.xlu1 %v4443_v35, %s4715_s15  ;;  %4456 = vpow2.f32 %v4134_v52 }
 0x20c   :  { %1822 = vrot.lane.b32.xlu0 %v4445_v0, %s4715_s15  ;;  %v4447_v40 = vpop.eup %4446 }
 0x20d   :  { %v4449_v17 = vpop.eup %4448  ;;  %v1699_v20 = vadd.f32 1.0, %v4447_v40  ;;  %v4319_v24 = vpop.f32.mrb[8].mxu0 }
 0x20e   :  { %v1698_v12 = vadd.f32 1.0, %v4449_v17  ;;  %v5700_v55 = vadd.f32 %v4319_v24, %v5663_v1  ;;  %v1479_v4 = vpop.f32.mrb[9].mxu0 }
 0x20f   :  { %4458 = vrcp.f32 %v1699_v20  ;;  %v5703_v9 = vadd.f32 %v5663_v1, %v1479_v4 }
 0x210   :  { %4460 = vrcp.f32 %v1698_v12  ;;  %v4137_v48 = vmul.f32 -1.442695, %v5700_v55 }
 0x211   :  { %v4451_v18 = vpop.eup %4450  ;;  %v4136_v33 = vmul.f32 -1.442695, %v5703_v9 }
 0x212   :  { %v4453_v36 = vpop.eup %4452  ;;  %4462 = vpow2.f32 %v4137_v48  ;;  %1828 = vrot.lane.b32.xlu1 %v4451_v18, %s4715_s15 }
 0x213   :  { %4464 = vpow2.f32 %v4136_v33  ;;  %1826 = vrot.lane.b32.xlu0 %v4453_v36, %s4715_s15 }
 0x214   :  { %v4455_v47 = vpop.eup %4454 }
 0x215   :  { %v4457_v37 = vpop.eup %4456  ;;  %v1701_v21 = vadd.f32 1.0, %v4455_v47  ;;  %v4322_v7 = vpop.f32.mrb[10].mxu0 }
 0x216   :  { %v1700_v50 = vadd.f32 1.0, %v4457_v37  ;;  %v5710_v10 = vadd.f32 %v4322_v7, %v5663_v1  ;;  %v1489_v62 = vpop.f32.mrb[11].mxu0 }
 0x217   :  { %4466 = vrcp.f32 %v1701_v21  ;;  %v5713_v59 = vadd.f32 %v5663_v1, %v1489_v62 }
 0x218   :  { %4468 = vrcp.f32 %v1700_v50  ;;  %v4139_v44 = vmul.f32 -1.442695, %v5710_v10 }
 0x219   :  { %v4459_v19 = vpop.eup %4458  ;;  %v4138_v61 = vmul.f32 -1.442695, %v5713_v59 }
 0x21a   :  { %v4461_v27 = vpop.eup %4460  ;;  %4470 = vpow2.f32 %v4139_v44  ;;  %1832 = vrot.lane.b32.xlu1 %v4459_v19, %s4715_s15 }
 0x21b   :  { %4472 = vpow2.f32 %v4138_v61  ;;  %1830 = vrot.lane.b32.xlu0 %v4461_v27, %s4715_s15 }
 0x21c   :  { %v4463_v34 = vpop.eup %4462 }
 0x21d   :  { %v4465_v60 = vpop.eup %4464  ;;  %v1703_v14 = vadd.f32 1.0, %v4463_v34  ;;  %v4325_v56 = vpop.f32.mrb[12].mxu0 }
 0x21e   :  { %v1702_v22 = vadd.f32 1.0, %v4465_v60  ;;  %v5720_v3 = vadd.f32 %v4325_v56, %v5663_v1  ;;  %v1499_v43 = vpop.f32.mrb[13].mxu0 }
 0x21f   :  { %4474 = vrcp.f32 %v1703_v14  ;;  %v5723_v28 = vadd.f32 %v5663_v1, %v1499_v43 }
 0x220   :  { %4476 = vrcp.f32 %v1702_v22  ;;  %v4141_v2 = vmul.f32 -1.442695, %v5720_v3 }
 0x221   :  { %v4467_v11 = vpop.eup %4466  ;;  %v4140_v53 = vmul.f32 -1.442695, %v5723_v28 }
 0x222   :  { %v4469_v8 = vpop.eup %4468  ;;  %4478 = vpow2.f32 %v4141_v2  ;;  %1836 = vrot.lane.b32.xlu1 %v4467_v11, %s4715_s15 }
 0x223   :  { %4480 = vpow2.f32 %v4140_v53  ;;  %1834 = vrot.lane.b32.xlu0 %v4469_v8, %s4715_s15 }
 0x224   :  { %v4471_v35 = vpop.eup %4470 }
 0x225   :  { %v4473_v52 = vpop.eup %4472  ;;  %v1705_v0 = vadd.f32 1.0, %v4471_v35  ;;  %v4328_v40 = vpop.f32.mrb[14].mxu0 }
 0x226   :  { %v1704_v17 = vadd.f32 1.0, %v4473_v52  ;;  %v5730_v20 = vadd.f32 %v4328_v40, %v5663_v1  ;;  %v1509_v24 = vpop.f32.mrb[15].mxu0 }
 0x227   :  { %4482 = vrcp.f32 %v1705_v0  ;;  %v5733_v12 = vadd.f32 %v5663_v1, %v1509_v24 }
 0x228   :  { %4484 = vrcp.f32 %v1704_v17  ;;  %v4143_v4 = vmul.f32 -1.442695, %v5730_v20 }
 0x229   :  { %v4475_v48 = vpop.eup %4474  ;;  %v4142_v18 = vmul.f32 -1.442695, %v5733_v12 }
 0x22a   :  { %v4477_v33 = vpop.eup %4476  ;;  %4486 = vpow2.f32 %v4143_v4  ;;  %1840 = vrot.lane.b32.xlu1 %v4475_v48, %s4715_s15 }
 0x22b   :  { %4488 = vpow2.f32 %v4142_v18  ;;  %1838 = vrot.lane.b32.xlu0 %v4477_v33, %s4715_s15 }
 0x22c   :  { %v4479_v36 = vpop.eup %4478 }
 0x22d   :  { %v4481_v47 = vpop.eup %4480  ;;  %v1707_v37 = vadd.f32 1.0, %v4479_v36  ;;  %v4331_v21 = vpop.f32.mrb[16].mxu0 }
 0x22e   :  { %v1706_v7 = vadd.f32 1.0, %v4481_v47  ;;  %v5740_v50 = vadd.f32 %v4331_v21, %v5663_v1  ;;  %v1519_v62 = vpop.f32.mrb[17].mxu0 }
 0x22f   :  { %4490 = vrcp.f32 %v1707_v37  ;;  %v5743_v44 = vadd.f32 %v5663_v1, %v1519_v62 }
 0x230   :  { %4492 = vrcp.f32 %v1706_v7  ;;  %v4145_v19 = vmul.f32 -1.442695, %v5740_v50 }
 0x231   :  { %v4483_v61 = vpop.eup %4482  ;;  %v4144_v27 = vmul.f32 -1.442695, %v5743_v44 }
 0x232   :  { %v4485_v34 = vpop.eup %4484  ;;  %4494 = vpow2.f32 %v4145_v19  ;;  %1844 = vrot.lane.b32.xlu1 %v4483_v61, %s4715_s15 }
 0x233   :  { %4496 = vpow2.f32 %v4144_v27  ;;  %1842 = vrot.lane.b32.xlu0 %v4485_v34, %s4715_s15 }
 0x234   :  { %v4487_v60 = vpop.eup %4486 }
 0x235   :  { %v4489_v14 = vpop.eup %4488  ;;  %v1709_v56 = vadd.f32 1.0, %v4487_v60  ;;  %v4334_v22 = vpop.f32.mrb[18].mxu0 }
 0x236   :  { %v1708_v43 = vadd.f32 1.0, %v4489_v14  ;;  %v5750_v2 = vadd.f32 %v4334_v22, %v5663_v1  ;;  %v1529_v11 = vpop.f32.mrb[19].mxu0 }
 0x237   :  { %4498 = vrcp.f32 %v1709_v56  ;;  %v5753_v53 = vadd.f32 %v5663_v1, %v1529_v11 }
 0x238   :  { %4500 = vrcp.f32 %v1708_v43  ;;  %v4147_v8 = vmul.f32 -1.442695, %v5750_v2 }
 0x239   :  { %v4491_v35 = vpop.eup %4490  ;;  %v4146_v52 = vmul.f32 -1.442695, %v5753_v53 }
 0x23a   :  { %v4493_v0 = vpop.eup %4492  ;;  %4502 = vpow2.f32 %v4147_v8  ;;  %1848 = vrot.lane.b32.xlu1 %v4491_v35, %s4715_s15 }
 0x23b   :  { %4504 = vpow2.f32 %v4146_v52  ;;  %1846 = vrot.lane.b32.xlu0 %v4493_v0, %s4715_s15 }
 0x23c   :  { %v4495_v40 = vpop.eup %4494 }
 0x23d   :  { %v4497_v17 = vpop.eup %4496  ;;  %v1711_v24 = vadd.f32 1.0, %v4495_v40  ;;  %v4337_v4 = vpop.f32.mrb[20].mxu0 }
 0x23e   :  { %v1710_v48 = vadd.f32 1.0, %v4497_v17  ;;  %v5760_v18 = vadd.f32 %v4337_v4, %v5663_v1  ;;  %v1539_v33 = vpop.f32.mrb[21].mxu0 }
 0x23f   :  { %4506 = vrcp.f32 %v1711_v24  ;;  %v5763_v36 = vadd.f32 %v5663_v1, %v1539_v33 }
 0x240   :  { %4508 = vrcp.f32 %v1710_v48  ;;  %v4149_v47 = vmul.f32 -1.442695, %v5760_v18 }
 0x241   :  { %v4499_v37 = vpop.eup %4498  ;;  %v4148_v21 = vmul.f32 -1.442695, %v5763_v36 }
 0x242   :  { %v4501_v7 = vpop.eup %4500  ;;  %4510 = vpow2.f32 %v4149_v47  ;;  %1852 = vrot.lane.b32.xlu1 %v4499_v37, %s4715_s15 }
 0x243   :  { %4512 = vpow2.f32 %v4148_v21  ;;  %1850 = vrot.lane.b32.xlu0 %v4501_v7, %s4715_s15 }
 0x244   :  { %v4503_v62 = vpop.eup %4502 }
 0x245   :  { %v4505_v19 = vpop.eup %4504  ;;  %v1713_v61 = vadd.f32 1.0, %v4503_v62  ;;  %v4340_v27 = vpop.f32.mrb[22].mxu0 }
 0x246   :  { %v1712_v34 = vadd.f32 1.0, %v4505_v19  ;;  %v5770_v60 = vadd.f32 %v4340_v27, %v5663_v1  ;;  %v1549_v14 = vpop.f32.mrb[23].mxu0 }
 0x247   :  { %4514 = vrcp.f32 %v1713_v61  ;;  %v5773_v56 = vadd.f32 %v5663_v1, %v1549_v14 }
 0x248   :  { %4516 = vrcp.f32 %v1712_v34  ;;  %v4151_v22 = vmul.f32 -1.442695, %v5770_v60 }
 0x249   :  { %v4507_v43 = vpop.eup %4506  ;;  %v4150_v11 = vmul.f32 -1.442695, %v5773_v56 }
 0x24a   :  { %v4509_v8 = vpop.eup %4508  ;;  %4518 = vpow2.f32 %v4151_v22  ;;  %1856 = vrot.lane.b32.xlu1 %v4507_v43, %s4715_s15 }
 0x24b   :  { %4520 = vpow2.f32 %v4150_v11  ;;  %1854 = vrot.lane.b32.xlu0 %v4509_v8, %s4715_s15 }
 0x24c   :  { %v4511_v35 = vpop.eup %4510 }
 0x24d   :  { %v4513_v52 = vpop.eup %4512  ;;  %v1715_v0 = vadd.f32 1.0, %v4511_v35  ;;  %v4343_v40 = vpop.f32.mrb[24].mxu0 }
 0x24e   :  { %v1714_v17 = vadd.f32 1.0, %v4513_v52  ;;  %v5780_v24 = vadd.f32 %v4343_v40, %v5663_v1  ;;  %v1559_v4 = vpop.f32.mrb[25].mxu0 }
 0x24f   :  { %4522 = vrcp.f32 %v1715_v0  ;;  %v5783_v48 = vadd.f32 %v5663_v1, %v1559_v4 }
 0x250   :  { %4524 = vrcp.f32 %v1714_v17  ;;  %v4153_v33 = vmul.f32 -1.442695, %v5780_v24 }
 0x251   :  { %v4515_v47 = vpop.eup %4514  ;;  %v4152_v37 = vmul.f32 -1.442695, %v5783_v48 }
 0x252   :  { %v4517_v21 = vpop.eup %4516  ;;  %4526 = vpow2.f32 %v4153_v33  ;;  %1860 = vrot.lane.b32.xlu1 %v4515_v47, %s4715_s15 }
 0x253   :  { %4528 = vpow2.f32 %v4152_v37  ;;  %1858 = vrot.lane.b32.xlu0 %v4517_v21, %s4715_s15 }
 0x254   :  { %v4519_v7 = vpop.eup %4518 }
 0x255   :  { %v4521_v62 = vpop.eup %4520  ;;  %v1717_v19 = vadd.f32 1.0, %v4519_v7  ;;  %v4346_v61 = vpop.f32.mrb[26].mxu0 }
 0x256   :  { %v1716_v27 = vadd.f32 1.0, %v4521_v62  ;;  %v5790_v34 = vadd.f32 %v4346_v61, %v5663_v1  ;;  %v1569_v14 = vpop.f32.mrb[27].mxu0 }
 0x257   :  { %4530 = vrcp.f32 %v1717_v19  ;;  %v5793_v22 = vadd.f32 %v5663_v1, %v1569_v14 }
 0x258   :  { %4532 = vrcp.f32 %v1716_v27  ;;  %v4155_v43 = vmul.f32 -1.442695, %v5790_v34 }
 0x259   :  { %v4523_v11 = vpop.eup %4522  ;;  %v4154_v8 = vmul.f32 -1.442695, %v5793_v22 }
 0x25a   :  { %v4525_v35 = vpop.eup %4524  ;;  %4534 = vpow2.f32 %v4155_v43  ;;  %1864 = vrot.lane.b32.xlu1 %v4523_v11, %s4715_s15 }
 0x25b   :  { %4536 = vpow2.f32 %v4154_v8  ;;  %1862 = vrot.lane.b32.xlu0 %v4525_v35, %s4715_s15 }
 0x25c   :  { %v4527_v52 = vpop.eup %4526 }
 0x25d   :  { %v4529_v0 = vpop.eup %4528  ;;  %v1719_v40 = vadd.f32 1.0, %v4527_v52  ;;  %v4349_v17 = vpop.f32.mrb[28].mxu0 }
 0x25e   :  { %v1718_v4 = vadd.f32 1.0, %v4529_v0  ;;  %v5800_v33 = vadd.f32 %v4349_v17, %v5663_v1  ;;  %v1579_v47 = vpop.f32.mrb[29].mxu0 }
 0x25f   :  { %4538 = vrcp.f32 %v1719_v40  ;;  %v5803_v37 = vadd.f32 %v5663_v1, %v1579_v47 }
 0x260   :  { %4540 = vrcp.f32 %v1718_v4  ;;  %v4157_v21 = vmul.f32 -1.442695, %v5800_v33 }
 0x261   :  { %v4531_v7 = vpop.eup %4530  ;;  %v4156_v62 = vmul.f32 -1.442695, %v5803_v37 }
 0x262   :  { %v4533_v19 = vpop.eup %4532  ;;  %4542 = vpow2.f32 %v4157_v21  ;;  %1868 = vrot.lane.b32.xlu1 %v4531_v7, %s4715_s15 }
 0x263   :  { %4544 = vpow2.f32 %v4156_v62  ;;  %1866 = vrot.lane.b32.xlu0 %v4533_v19, %s4715_s15 }
 0x264   :  { %v4535_v61 = vpop.eup %4534 }
 0x265   :  { %v4537_v27 = vpop.eup %4536  ;;  %v1721_v14 = vadd.f32 1.0, %v4535_v61  ;;  %v4352_v43 = vpop.f32.mrb[30].mxu0 }
 0x266   :  { %v1720_v11 = vadd.f32 1.0, %v4537_v27  ;;  %v5810_v8 = vadd.f32 %v4352_v43, %v5663_v1  ;;  %v1589_v35 = vpop.f32.mrb[31].mxu0 }
 0x267   :  { %4546 = vrcp.f32 %v1721_v14  ;;  %v5813_v52 = vadd.f32 %v5663_v1, %v1589_v35 }
 0x268   :  { %4548 = vrcp.f32 %v1720_v11  ;;  %v4159_v0 = vmul.f32 -1.442695, %v5810_v8 }
 0x269   :  { %v4539_v40 = vpop.eup %4538  ;;  %v4158_v17 = vmul.f32 -1.442695, %v5813_v52 }
 0x26a   :  { %v4541_v4 = vpop.eup %4540  ;;  %4550 = vpow2.f32 %v4159_v0  ;;  %1872 = vrot.lane.b32.xlu1 %v4539_v40, %s4715_s15 }
 0x26b   :  { %4552 = vpow2.f32 %v4158_v17  ;;  %1870 = vrot.lane.b32.xlu0 %v4541_v4, %s4715_s15 }
 0x26c   :  { %v4543_v47 = vpop.eup %4542 }
 0x26d   :  { %v4545_v21 = vpop.eup %4544  ;;  %v1723_v7 = vadd.f32 1.0, %v4543_v47  ;;  %v4160_v47 = vld [vmem:[%s6922_s1 + $0x18] sm:$0xff] }
 0x26e   :  { %v1722_v62 = vadd.f32 1.0, %v4545_v21  ;;  %v4161_v21 = vld [vmem:[%s6922_s1 + $0x20] sm:$0xff] }
 0x26f   :  { %4554 = vrcp.f32 %v1723_v7 }
 0x270   :  { %4556 = vrcp.f32 %v1722_v62  ;;  %v4411_v62 = vpack.c.bf16 %v4161_v21, %v4160_v47 }
 0x271   :  { %v4547_v1 = vpop.eup %4546 }
 0x272   :  { %v4549_v19 = vpop.eup %4548  ;;  %1876 = vrot.lane.b32.xlu1 %v4547_v1, %s4715_s15  ;;  %4412 = vmatprep.subr.bf16.mxu1 %v4411_v62 }
 0x273   :  { %1874 = vrot.lane.b32.xlu0 %v4549_v19, %s4715_s15  ;;  %4414 = vmatpush3.bf16.msra.mxu1 %v4411_v62  ;;  %v6986_v62 = vld [vmem:[#allocation7_spill] sm:$0xff] }
 0x274   :  { %v4551_v61 = vpop.eup %4550 }
 0x275   :  { %v4553_v27 = vpop.eup %4552  ;;  %v1725_v14 = vadd.f32 1.0, %v4551_v61 }
 0x276   :  { %v1724_v43 = vadd.f32 1.0, %v4553_v27 }
 0x277   :  { %4558 = vrcp.f32 %v1725_v14 }
 0x278   :  { %4560 = vrcp.f32 %v1724_v43 }
 0x279   :  { %v4555_v11 = vpop.eup %4554 }
 0x27a   :  { %v4557_v35 = vpop.eup %4556  ;;  %1880 = vrot.lane.b32.xlu1 %v4555_v11, %s4715_s15 }
 0x27b   :  { %1878 = vrot.lane.b32.xlu0 %v4557_v35, %s4715_s15 }
 0x27d   :  { %v1825_v0 = vpop.permute.xlu1 %1824 }
 0x27e   :  { %v1919_v40 = vmul.f32 %v1825_v0, %v5666_v26  ;;  %v1823_v17 = vpop.permute.xlu0 %1822  ;;  %v4162_v26 = vld [vmem:[%s6922_s1 + $0x28] sm:$0xff] }
 0x27f   :  { %v1918_v4 = vmul.f32 %v1823_v17, %v5669_v42  ;;  %4357 = vmatprep.subr.mxu1 %v4162_v26 }
 0x280   :  { %v1951_v7 = vadd.f32 %v1919_v40, %v4894_v57  ;;  %4358 = vmatpush3.msra.mxu1 %v4162_v26 }
 0x281   :  { %v1950_v1 = vadd.f32 %v1918_v4, %v4883_v46  ;;  %v4559_v19 = vpop.eup %4558 }
 0x282   :  { %v5833_v61 = vmul.f32 0.70710677, %v1951_v7  ;;  %v4561_v42 = vpop.eup %4560  ;;  %1884 = vrot.lane.b32.xlu1 %v4559_v19, %s4715_s15 }
 0x283   :  { %v5838_v27 = vmul.f32 0.70710677, %v1950_v1  ;;  %1882 = vrot.lane.b32.xlu0 %v4561_v42, %s4715_s15 }
 0x284   :  { %6984 = vst [vmem:[#allocation23_spill] sm:$0xff] %v5833_v61  ;;  %v2047_v14 = vrot.slane %v5833_v61, 7  ;;  %v1829_v57 = vpop.permute.xlu1 %1828 }
 0x285   :  { %6985 = vst [vmem:[#allocation24_spill] sm:$0xff] %v5838_v27  ;;  %v2046_v46 = vrot.slane %v5838_v27, 7  ;;  %v1921_v11 = vmul.f32 %v1829_v57, %v5674_v25  ;;  %v1827_v35 = vpop.permute.xlu0 %1826 }
 0x286   :  { %v2158_v43 = vsel %vm685_vm0, %v2047_v14, 0.0  ;;  %v1920_v40 = vmul.f32 %v1827_v35, %v5677_v63 }
 0x287   :  { %v5847_v0 = vsel %vm685_vm0, 0.0, %v2046_v46  ;;  %v5851_v17 = vsel %vm685_vm0, %v2046_v46, %v2047_v14  ;;  %v2209_v4 = vrot.slane %v2158_v43, 1  ;;  %v1953_v47 = vadd.f32 %v1921_v11, %v4896_v58 }
 0x288   :  { %v2207_v21 = vrot.slane %v5851_v17, 1  ;;  %v2206_v7 = vrot.slane %v5847_v0, 1  ;;  %v1952_v1 = vadd.f32 %v1920_v40, %v6986_v62  ;;  %v2287_v25 = vrot.slane %v5851_v17, 2 }
 0x289   :  { %v2289_v19 = vrot.slane %v2158_v43, 2  ;;  %v5858_v42 = vmul.f32 0.70710677, %v1953_v47  ;;  %v2286_v46 = vrot.slane %v5847_v0, 2 }
 0x28a   :  { %v2210_v63 = vsel %vm846_vm1, %v2207_v21, %v2209_v4  ;;  %v2208_v14 = vsel %vm846_vm1, %v2206_v7, %v2207_v21  ;;  %v5863_v26 = vmul.f32 0.70710677, %v1952_v1 }
 0x28b   :  { %2368 = vrot.lane.b32.xlu1 %v2210_v63, %s4728_s30  ;;  %2366 = vrot.lane.b32.xlu0 %v2208_v14, %s4728_s30  ;;  %v2050_v58 = vrot.slane %v5858_v42, 7  ;;  %v2290_v4 = vsel %vm927_vm2, %v2287_v25, %v2289_v19  ;;  %v2288_v47 = vsel %vm927_vm2, %v2286_v46, %v2287_v25  ;;  %v6988_v63 = vld [vmem:[#allocation8_spill] sm:$0xff]  ;;  %v6989_v25 = vld [vmem:[#allocation9_spill] sm:$0xff] }
 0x28c   :  { %6987 = vst [vmem:[#allocation7_spill] sm:$0xff] %v5863_v26  ;;  %v2049_v57 = vrot.slane %v5863_v26, 7  ;;  %v1833_v11 = vpop.permute.xlu1 %1832 }
 0x28d   :  { %v2159_v43 = vsel %vm685_vm0, %v2050_v58, 0.0  ;;  %v1923_v35 = vmul.f32 %v1833_v11, %v5682_v16  ;;  %v1831_v40 = vpop.permute.xlu0 %1830 }
 0x28e   :  { %v5874_v21 = vsel %vm685_vm0, 0.0, %v2049_v57  ;;  %v1922_v7 = vmul.f32 %v1831_v40, %v5685_v15  ;;  %v5880_v62 = vsel %vm685_vm0, %v2049_v57, %v2050_v58  ;;  %v2214_v1 = vrot.slane %v2159_v43, 1 }
 0x28f   :  { %2464 = vrot.lane.b32.xlu1 %v2290_v4, %s4726_s26  ;;  %2462 = vrot.lane.b32.xlu0 %v2288_v47, %s4726_s26  ;;  %v1955_v16 = vadd.f32 %v1923_v35, %v6988_v63  ;;  %v2212_v14 = vrot.slane %v5880_v62, 1  ;;  %v2211_v19 = vrot.slane %v5874_v21, 1  ;;  %v2292_v11 = vrot.slane %v5880_v62, 2 }
 0x290   :  { %v1954_v46 = vadd.f32 %v1922_v7, %v6989_v25  ;;  %v2294_v27 = vrot.slane %v2159_v43, 2  ;;  %v2291_v58 = vrot.slane %v5874_v21, 2 }
 0x291   :  { %v5887_v15 = vmul.f32 0.70710677, %v1955_v16  ;;  %v2215_v40 = vsel %vm846_vm1, %v2212_v14, %v2214_v1  ;;  %v2213_v4 = vsel %vm846_vm1, %v2211_v19, %v2212_v14 }
 0x292   :  { %v5892_v57 = vmul.f32 0.70710677, %v1954_v46  ;;  %v2295_v16 = vsel %vm927_vm2, %v2292_v11, %v2294_v27  ;;  %v2293_v14 = vsel %vm927_vm2, %v2291_v58, %v2292_v11  ;;  %v6992_v11 = vld [vmem:[#allocation11_spill] sm:$0xff] }
 0x293   :  { %2372 = vrot.lane.b32.xlu1 %v2215_v40, %s4728_s30  ;;  %2370 = vrot.lane.b32.xlu0 %v2213_v4, %s4728_s30  ;;  %v2053_v35 = vrot.slane %v5887_v15, 7  ;;  %v6991_v4 = vld [vmem:[#allocation10_spill] sm:$0xff] }
 0x294   :  { %6990 = vst [vmem:[#allocation8_spill] sm:$0xff] %v5892_v57  ;;  %v2052_v47 = vrot.slane %v5892_v57, 7  ;;  %v1837_v7 = vpop.permute.xlu1 %1836 }
 0x295   :  { %v2160_v43 = vsel %vm685_vm0, %v2053_v35, 0.0  ;;  %v1925_v63 = vmul.f32 %v1837_v7, %v5690_v51  ;;  %v1835_v1 = vpop.permute.xlu0 %1834 }
 0x296   :  { %v5903_v19 = vsel %vm685_vm0, 0.0, %v2052_v47  ;;  %v1924_v25 = vmul.f32 %v1835_v1, %v5693_v31  ;;  %v5909_v46 = vsel %vm685_vm0, %v2052_v47, %v2053_v35  ;;  %v2219_v40 = vrot.slane %v2160_v43, 1 }
 0x297   :  { %2468 = vrot.lane.b32.xlu1 %v2295_v16, %s4726_s26  ;;  %2466 = vrot.lane.b32.xlu0 %v2293_v14, %s4726_s26  ;;  %v1957_v51 = vadd.f32 %v1925_v63, %v6991_v4  ;;  %v2217_v7 = vrot.slane %v5909_v46, 1  ;;  %v2216_v27 = vrot.slane %v5903_v19, 1  ;;  %v2297_v57 = vrot.slane %v5909_v46, 2 }
 0x298   :  { %v1956_v58 = vadd.f32 %v1924_v25, %v6992_v11  ;;  %v2299_v26 = vrot.slane %v2160_v43, 2  ;;  %v2296_v35 = vrot.slane %v5903_v19, 2 }
 0x299   :  { %v5916_v31 = vmul.f32 0.70710677, %v1957_v51  ;;  %v2220_v1 = vsel %vm846_vm1, %v2217_v7, %v2219_v40  ;;  %v2218_v16 = vsel %vm846_vm1, %v2216_v27, %v2217_v7 }
 0x29a   :  { %v5921_v47 = vmul.f32 0.70710677, %v1956_v58  ;;  %v2300_v51 = vsel %vm927_vm2, %v2297_v57, %v2299_v26  ;;  %v2298_v7 = vsel %vm927_vm2, %v2296_v35, %v2297_v57  ;;  %v6995_v57 = vld [vmem:[#allocation12_spill] sm:$0xff] }
 0x29b   :  { %2376 = vrot.lane.b32.xlu1 %v2220_v1, %s4728_s30  ;;  %2374 = vrot.lane.b32.xlu0 %v2218_v16, %s4728_s30  ;;  %v2056_v63 = vrot.slane %v5916_v31, 7  ;;  %v6994_v16 = vld [vmem:[#allocation14_spill] sm:$0xff] }
 0x29c   :  { %6993 = vst [vmem:[#allocation9_spill] sm:$0xff] %v5921_v47  ;;  %v2055_v14 = vrot.slane %v5921_v47, 7  ;;  %v1841_v25 = vpop.permute.xlu1 %1840 }
 0x29d   :  { %v2161_v43 = vsel %vm685_vm0, %v2056_v63, 0.0  ;;  %v1927_v4 = vmul.f32 %v1841_v25, %v5700_v55  ;;  %v1839_v40 = vpop.permute.xlu0 %1838 }
 0x29e   :  { %v5932_v27 = vsel %vm685_vm0, 0.0, %v2055_v14  ;;  %v1926_v11 = vmul.f32 %v1839_v40, %v5703_v9  ;;  %v5938_v58 = vsel %vm685_vm0, %v2055_v14, %v2056_v63  ;;  %v2224_v1 = vrot.slane %v2161_v43, 1 }
 0x29f   :  { %2472 = vrot.lane.b32.xlu1 %v2300_v51, %s4726_s26  ;;  %2470 = vrot.lane.b32.xlu0 %v2298_v7, %s4726_s26  ;;  %v1959_v55 = vadd.f32 %v1927_v4, %v6994_v16  ;;  %v2222_v25 = vrot.slane %v5938_v58, 1  ;;  %v2221_v26 = vrot.slane %v5932_v27, 1  ;;  %v2302_v47 = vrot.slane %v5938_v58, 2 }
 0x2a0   :  { %v1958_v35 = vadd.f32 %v1926_v11, %v6995_v57  ;;  %v2304_v61 = vrot.slane %v2161_v43, 2  ;;  %v2301_v63 = vrot.slane %v5932_v27, 2 }
 0x2a1   :  { %v5945_v9 = vmul.f32 0.70710677, %v1959_v55  ;;  %v2225_v40 = vsel %vm846_vm1, %v2222_v25, %v2224_v1  ;;  %v2223_v51 = vsel %vm846_vm1, %v2221_v26, %v2222_v25 }
 0x2a2   :  { %v5950_v14 = vmul.f32 0.70710677, %v1958_v35  ;;  %v2305_v55 = vsel %vm927_vm2, %v2302_v47, %v2304_v61  ;;  %v2303_v25 = vsel %vm927_vm2, %v2301_v63, %v2302_v47  ;;  %v6999_v47 = vld [vmem:[#allocation13_spill] sm:$0xff] }
 0x2a3   :  { %6996 = vst [vmem:[#allocation10_spill] sm:$0xff] %v5945_v9  ;;  %2380 = vrot.lane.b32.xlu1 %v2225_v40, %s4728_s30  ;;  %2378 = vrot.lane.b32.xlu0 %v2223_v51, %s4728_s30  ;;  %v2059_v4 = vrot.slane %v5945_v9, 7  ;;  %v6998_v51 = vld [vmem:[#allocation15_spill] sm:$0xff] }
 0x2a4   :  { %6997 = vst [vmem:[#allocation11_spill] sm:$0xff] %v5950_v14  ;;  %v2058_v7 = vrot.slane %v5950_v14, 7  ;;  %v1845_v11 = vpop.permute.xlu1 %1844 }
 0x2a5   :  { %v2162_v43 = vsel %vm685_vm0, %v2059_v4, 0.0  ;;  %v1929_v16 = vmul.f32 %v1845_v11, %v5710_v10  ;;  %v1843_v1 = vpop.permute.xlu0 %1842 }
 0x2a6   :  { %v5961_v26 = vsel %vm685_vm0, 0.0, %v2058_v7  ;;  %v1928_v57 = vmul.f32 %v1843_v1, %v5713_v59  ;;  %v5967_v35 = vsel %vm685_vm0, %v2058_v7, %v2059_v4  ;;  %v2229_v40 = vrot.slane %v2162_v43, 1 }
 0x2a7   :  { %2476 = vrot.lane.b32.xlu1 %v2305_v55, %s4726_s26  ;;  %2474 = vrot.lane.b32.xlu0 %v2303_v25, %s4726_s26  ;;  %v1961_v10 = vadd.f32 %v1929_v16, %v6998_v51  ;;  %v2227_v11 = vrot.slane %v5967_v35, 1  ;;  %v2226_v61 = vrot.slane %v5961_v26, 1  ;;  %v2307_v14 = vrot.slane %v5967_v35, 2 }
 0x2a8   :  { %v1960_v63 = vadd.f32 %v1928_v57, %v6999_v47  ;;  %v2309_v9 = vrot.slane %v2162_v43, 2  ;;  %v2306_v4 = vrot.slane %v5961_v26, 2 }
 0x2a9   :  { %v5974_v59 = vmul.f32 0.70710677, %v1961_v10  ;;  %v2230_v1 = vsel %vm846_vm1, %v2227_v11, %v2229_v40  ;;  %v2228_v55 = vsel %vm846_vm1, %v2226_v61, %v2227_v11 }
 0x2aa   :  { %v5979_v7 = vmul.f32 0.70710677, %v1960_v63  ;;  %v2310_v10 = vsel %vm927_vm2, %v2307_v14, %v2309_v9  ;;  %v2308_v11 = vsel %vm927_vm2, %v2306_v4, %v2307_v14  ;;  %v7003_v14 = vld [vmem:[#allocation16_spill] sm:$0xff] }
 0x2ab   :  { %7000 = vst [vmem:[#allocation14_spill] sm:$0xff] %v5974_v59  ;;  %2384 = vrot.lane.b32.xlu1 %v2230_v1, %s4728_s30  ;;  %2382 = vrot.lane.b32.xlu0 %v2228_v55, %s4728_s30  ;;  %v2062_v16 = vrot.slane %v5974_v59, 7  ;;  %v7002_v55 = vld [vmem:[#allocation17_spill] sm:$0xff] }
 0x2ac   :  { %7001 = vst [vmem:[#allocation12_spill] sm:$0xff] %v5979_v7  ;;  %v2061_v25 = vrot.slane %v5979_v7, 7  ;;  %v1849_v57 = vpop.permute.xlu1 %1848 }
 0x2ad   :  { %v2163_v43 = vsel %vm685_vm0, %v2062_v16, 0.0  ;;  %v1931_v51 = vmul.f32 %v1849_v57, %v5720_v3  ;;  %v1847_v40 = vpop.permute.xlu0 %1846 }
 0x2ae   :  { %v5990_v61 = vsel %vm685_vm0, 0.0, %v2061_v25  ;;  %v1930_v47 = vmul.f32 %v1847_v40, %v5723_v28  ;;  %v5996_v63 = vsel %vm685_vm0, %v2061_v25, %v2062_v16  ;;  %v2234_v1 = vrot.slane %v2163_v43, 1 }
 0x2af   :  { %2480 = vrot.lane.b32.xlu1 %v2310_v10, %s4726_s26  ;;  %2478 = vrot.lane.b32.xlu0 %v2308_v11, %s4726_s26  ;;  %v1963_v3 = vadd.f32 %v1931_v51, %v7002_v55  ;;  %v2232_v57 = vrot.slane %v5996_v63, 1  ;;  %v2231_v9 = vrot.slane %v5990_v61, 1  ;;  %v2312_v7 = vrot.slane %v5996_v63, 2 }
 0x2b0   :  { %v1962_v4 = vadd.f32 %v1930_v47, %v7003_v14  ;;  %v2314_v59 = vrot.slane %v2163_v43, 2  ;;  %v2311_v16 = vrot.slane %v5990_v61, 2 }
 0x2b1   :  { %v6003_v28 = vmul.f32 0.70710677, %v1963_v3  ;;  %v2235_v40 = vsel %vm846_vm1, %v2232_v57, %v2234_v1  ;;  %v2233_v10 = vsel %vm846_vm1, %v2231_v9, %v2232_v57 }
 0x2b2   :  { %v6008_v25 = vmul.f32 0.70710677, %v1962_v4  ;;  %v2315_v3 = vsel %vm927_vm2, %v2312_v7, %v2314_v59  ;;  %v2313_v57 = vsel %vm927_vm2, %v2311_v16, %v2312_v7  ;;  %v7005_v7 = vld [vmem:[#allocation18_spill] sm:$0xff] }
 0x2b3   :  { %2388 = vrot.lane.b32.xlu1 %v2235_v40, %s4728_s30  ;;  %2386 = vrot.lane.b32.xlu0 %v2233_v10, %s4728_s30  ;;  %v2065_v51 = vrot.slane %v6003_v28, 7 }
 0x2b4   :  { %7004 = vst [vmem:[#allocation15_spill] sm:$0xff] %v6008_v25  ;;  %v2064_v11 = vrot.slane %v6008_v25, 7  ;;  %v1853_v47 = vpop.permute.xlu1 %1852 }
 0x2b5   :  { %v2164_v43 = vsel %vm685_vm0, %v2065_v51, 0.0  ;;  %v1933_v55 = vmul.f32 %v1853_v47, %v5730_v20  ;;  %v1851_v1 = vpop.permute.xlu0 %1850 }
 0x2b6   :  { %v6019_v9 = vsel %vm685_vm0, 0.0, %v2064_v11  ;;  %v1932_v14 = vmul.f32 %v1851_v1, %v5733_v12  ;;  %v6025_v4 = vsel %vm685_vm0, %v2064_v11, %v2065_v51  ;;  %v2239_v40 = vrot.slane %v2164_v43, 1 }
 0x2b7   :  { %2484 = vrot.lane.b32.xlu1 %v2315_v3, %s4726_s26  ;;  %2482 = vrot.lane.b32.xlu0 %v2313_v57, %s4726_s26  ;;  %v1965_v20 = vadd.f32 %v1933_v55, %v5187_v38  ;;  %v2237_v10 = vrot.slane %v6025_v4, 1  ;;  %v2236_v59 = vrot.slane %v6019_v9, 1  ;;  %v2317_v47 = vrot.slane %v6025_v4, 2 }
 0x2b8   :  { %v1964_v16 = vadd.f32 %v1932_v14, %v7005_v7  ;;  %v2319_v25 = vrot.slane %v2164_v43, 2  ;;  %v2316_v51 = vrot.slane %v6019_v9, 2 }
 0x2b9   :  { %v6032_v12 = vmul.f32 0.70710677, %v1965_v20  ;;  %v2240_v1 = vsel %vm846_vm1, %v2237_v10, %v2239_v40  ;;  %v2238_v3 = vsel %vm846_vm1, %v2236_v59, %v2237_v10 }
 0x2ba   :  { %v6037_v11 = vmul.f32 0.70710677, %v1964_v16  ;;  %v2320_v20 = vsel %vm927_vm2, %v2317_v47, %v2319_v25  ;;  %v2318_v10 = vsel %vm927_vm2, %v2316_v51, %v2317_v47  ;;  %v7007_v47 = vld [vmem:[#allocation19_spill] sm:$0xff] }
 0x2bb   :  { %2392 = vrot.lane.b32.xlu1 %v2240_v1, %s4728_s30  ;;  %2390 = vrot.lane.b32.xlu0 %v2238_v3, %s4728_s30  ;;  %v2068_v38 = vrot.slane %v6032_v12, 7 }
 0x2bc   :  { %7006 = vst [vmem:[#allocation13_spill] sm:$0xff] %v6037_v11  ;;  %v2067_v55 = vrot.slane %v6037_v11, 7  ;;  %v1857_v57 = vpop.permute.xlu1 %1856 }
 0x2bd   :  { %v2165_v43 = vsel %vm685_vm0, %v2068_v38, 0.0  ;;  %v1935_v14 = vmul.f32 %v1857_v57, %v5740_v50  ;;  %v1855_v40 = vpop.permute.xlu0 %1854 }
 0x2be   :  { %v6048_v59 = vsel %vm685_vm0, 0.0, %v2067_v55  ;;  %v1934_v7 = vmul.f32 %v1855_v40, %v5743_v44  ;;  %v6054_v16 = vsel %vm685_vm0, %v2067_v55, %v2068_v38  ;;  %v2244_v1 = vrot.slane %v2165_v43, 1 }
 0x2bf   :  { %2488 = vrot.lane.b32.xlu1 %v2320_v20, %s4726_s26  ;;  %2486 = vrot.lane.b32.xlu0 %v2318_v10, %s4726_s26  ;;  %v1967_v50 = vadd.f32 %v1935_v14, %v5220_v32  ;;  %v2242_v3 = vrot.slane %v6054_v16, 1  ;;  %v2241_v25 = vrot.slane %v6048_v59, 1  ;;  %v2322_v57 = vrot.slane %v6054_v16, 2 }
 0x2c0   :  { %v1966_v51 = vadd.f32 %v1934_v7, %v7007_v47  ;;  %v2324_v11 = vrot.slane %v2165_v43, 2  ;;  %v2321_v38 = vrot.slane %v6048_v59, 2 }
 0x2c1   :  { %v6061_v44 = vmul.f32 0.70710677, %v1967_v50  ;;  %v2245_v40 = vsel %vm846_vm1, %v2242_v3, %v2244_v1  ;;  %v2243_v20 = vsel %vm846_vm1, %v2241_v25, %v2242_v3 }
 0x2c2   :  { %v6066_v55 = vmul.f32 0.70710677, %v1966_v51  ;;  %v2325_v50 = vsel %vm927_vm2, %v2322_v57, %v2324_v11  ;;  %v2323_v3 = vsel %vm927_vm2, %v2321_v38, %v2322_v57 }
 0x2c3   :  { %7008 = vst [vmem:[#allocation17_spill] sm:$0xff] %v6061_v44  ;;  %2396 = vrot.lane.b32.xlu1 %v2245_v40, %s4728_s30  ;;  %2394 = vrot.lane.b32.xlu0 %v2243_v20, %s4728_s30  ;;  %v2071_v32 = vrot.slane %v6061_v44, 7 }
 0x2c4   :  { %v2070_v14 = vrot.slane %v6066_v55, 7  ;;  %v1861_v10 = vpop.permute.xlu1 %1860 }
 0x2c5   :  { %v2166_v43 = vsel %vm685_vm0, %v2071_v32, 0.0  ;;  %v1937_v7 = vmul.f32 %v1861_v10, %v5750_v2  ;;  %v1859_v1 = vpop.permute.xlu0 %1858 }
 0x2c6   :  { %v6077_v25 = vsel %vm685_vm0, 0.0, %v2070_v14  ;;  %v1936_v47 = vmul.f32 %v1859_v1, %v5753_v53  ;;  %v6083_v51 = vsel %vm685_vm0, %v2070_v14, %v2071_v32  ;;  %v2249_v40 = vrot.slane %v2166_v43, 1 }
 0x2c7   :  { %2492 = vrot.lane.b32.xlu1 %v2325_v50, %s4726_s26  ;;  %2490 = vrot.lane.b32.xlu0 %v2323_v3, %s4726_s26  ;;  %v1969_v2 = vadd.f32 %v1937_v7, %v5255_v39  ;;  %v2247_v20 = vrot.slane %v6083_v51, 1  ;;  %v2246_v11 = vrot.slane %v6077_v25, 1  ;;  %v2327_v38 = vrot.slane %v6083_v51, 2 }
 0x2c8   :  { %v1968_v57 = vadd.f32 %v1936_v47, %v5245_v5  ;;  %v2329_v10 = vrot.slane %v2166_v43, 2  ;;  %v2326_v32 = vrot.slane %v6077_v25, 2 }
 0x2c9   :  { %v6090_v53 = vmul.f32 0.70710677, %v1969_v2  ;;  %v2250_v1 = vsel %vm846_vm1, %v2247_v20, %v2249_v40  ;;  %v2248_v50 = vsel %vm846_vm1, %v2246_v11, %v2247_v20 }
 0x2ca   :  { %v6095_v14 = vmul.f32 0.70710677, %v1968_v57  ;;  %v2330_v40 = vsel %vm927_vm2, %v2327_v38, %v2329_v10  ;;  %v2328_v2 = vsel %vm927_vm2, %v2326_v32, %v2327_v38 }
 0x2cb   :  { %7009 = vst [vmem:[#allocation16_spill] sm:$0xff] %v6090_v53  ;;  %2400 = vrot.lane.b32.xlu1 %v2250_v1, %s4728_s30  ;;  %2398 = vrot.lane.b32.xlu0 %v2248_v50, %s4728_s30  ;;  %v2074_v39 = vrot.slane %v6090_v53, 7 }
 0x2cc   :  { %v2073_v5 = vrot.slane %v6095_v14, 7  ;;  %v1865_v7 = vpop.permute.xlu1 %1864 }
 0x2cd   :  { %v2167_v43 = vsel %vm685_vm0, %v2074_v39, 0.0  ;;  %v1939_v3 = vmul.f32 %v1865_v7, %v5760_v18  ;;  %v1863_v47 = vpop.permute.xlu0 %1862 }
 0x2ce   :  { %v6106_v20 = vsel %vm685_vm0, 0.0, %v2073_v5  ;;  %v1938_v11 = vmul.f32 %v1863_v47, %v5763_v36  ;;  %v6112_v57 = vsel %vm685_vm0, %v2073_v5, %v2074_v39  ;;  %v2254_v1 = vrot.slane %v2167_v43, 1 }
 0x2cf   :  { %2496 = vrot.lane.b32.xlu1 %v2330_v40, %s4726_s26  ;;  %2494 = vrot.lane.b32.xlu0 %v2328_v2, %s4726_s26  ;;  %v1971_v18 = vadd.f32 %v1939_v3, %v5317_v29  ;;  %v2252_v50 = vrot.slane %v6112_v57, 1  ;;  %v2251_v10 = vrot.slane %v6106_v20, 1  ;;  %v2332_v32 = vrot.slane %v6112_v57, 2 }
 0x2d0   :  { %v1970_v38 = vadd.f32 %v1938_v11, %v5298_v54  ;;  %v2334_v7 = vrot.slane %v2167_v43, 2  ;;  %v2331_v39 = vrot.slane %v6106_v20, 2 }
 0x2d1   :  { %v6119_v36 = vmul.f32 0.70710677, %v1971_v18  ;;  %v2255_v47 = vsel %vm846_vm1, %v2252_v50, %v2254_v1  ;;  %v2253_v40 = vsel %vm846_vm1, %v2251_v10, %v2252_v50 }
 0x2d2   :  { %v6124_v5 = vmul.f32 0.70710677, %v1970_v38  ;;  %v2335_v1 = vsel %vm927_vm2, %v2332_v32, %v2334_v7  ;;  %v2333_v18 = vsel %vm927_vm2, %v2331_v39, %v2332_v32 }
 0x2d3   :  { %7010 = vst [vmem:[#allocation18_spill] sm:$0xff] %v6119_v36  ;;  %2404 = vrot.lane.b32.xlu1 %v2255_v47, %s4728_s30  ;;  %2402 = vrot.lane.b32.xlu0 %v2253_v40, %s4728_s30  ;;  %v2077_v29 = vrot.slane %v6119_v36, 7 }
 0x2d4   :  { %v2076_v54 = vrot.slane %v6124_v5, 7  ;;  %v1869_v3 = vpop.permute.xlu1 %1868 }
 0x2d5   :  { %v2168_v43 = vsel %vm685_vm0, %v2077_v29, 0.0  ;;  %v1941_v2 = vmul.f32 %v1869_v3, %v5770_v60  ;;  %v1867_v11 = vpop.permute.xlu0 %1866 }
 0x2d6   :  { %v6135_v50 = vsel %vm685_vm0, 0.0, %v2076_v54  ;;  %v1940_v10 = vmul.f32 %v1867_v11, %v5773_v56  ;;  %v6141_v38 = vsel %vm685_vm0, %v2076_v54, %v2077_v29  ;;  %v2259_v47 = vrot.slane %v2168_v43, 1 }
 0x2d7   :  { %2500 = vrot.lane.b32.xlu1 %v2335_v1, %s4726_s26  ;;  %2498 = vrot.lane.b32.xlu0 %v2333_v18, %s4726_s26  ;;  %v1973_v60 = vadd.f32 %v1941_v2, %v5373_v6  ;;  %v2257_v40 = vrot.slane %v6141_v38, 1  ;;  %v2256_v7 = vrot.slane %v6135_v50, 1  ;;  %v2337_v39 = vrot.slane %v6141_v38, 2 }
 0x2d8   :  { %v1972_v32 = vadd.f32 %v1940_v10, %v5356_v13  ;;  %v2339_v3 = vrot.slane %v2168_v43, 2  ;;  %v2336_v29 = vrot.slane %v6135_v50, 2 }
 0x2d9   :  { %v6148_v56 = vmul.f32 0.70710677, %v1973_v60  ;;  %v2260_v11 = vsel %vm846_vm1, %v2257_v40, %v2259_v47  ;;  %v2258_v1 = vsel %vm846_vm1, %v2256_v7, %v2257_v40 }
 0x2da   :  { %v6153_v54 = vmul.f32 0.70710677, %v1972_v32  ;;  %v2340_v47 = vsel %vm927_vm2, %v2337_v39, %v2339_v3  ;;  %v2338_v60 = vsel %vm927_vm2, %v2336_v29, %v2337_v39  ;;  %v7012_v39 = vld [vmem:[#allocation20_spill] sm:$0xff] }
 0x2db   :  { %2408 = vrot.lane.b32.xlu1 %v2260_v11, %s4728_s30  ;;  %2406 = vrot.lane.b32.xlu0 %v2258_v1, %s4728_s30  ;;  %v2080_v6 = vrot.slane %v6148_v56, 7  ;;  %v7011_v1 = vld [vmem:[#allocation21_spill] sm:$0xff] }
 0x2dc   :  { %v2079_v13 = vrot.slane %v6153_v54, 7  ;;  %v1873_v2 = vpop.permute.xlu1 %1872 }
 0x2dd   :  { %v2169_v43 = vsel %vm685_vm0, %v2080_v6, 0.0  ;;  %v1943_v18 = vmul.f32 %v1873_v2, %v5780_v24  ;;  %v1871_v10 = vpop.permute.xlu0 %1870 }
 0x2de   :  { %v6164_v40 = vsel %vm685_vm0, 0.0, %v2079_v13  ;;  %v1942_v7 = vmul.f32 %v1871_v10, %v5783_v48  ;;  %v6170_v32 = vsel %vm685_vm0, %v2079_v13, %v2080_v6  ;;  %v2264_v11 = vrot.slane %v2169_v43, 1 }
 0x2df   :  { %2504 = vrot.lane.b32.xlu1 %v2340_v47, %s4726_s26  ;;  %2502 = vrot.lane.b32.xlu0 %v2338_v60, %s4726_s26  ;;  %v1975_v24 = vadd.f32 %v1943_v18, %v7011_v1  ;;  %v2262_v2 = vrot.slane %v6170_v32, 1  ;;  %v2261_v3 = vrot.slane %v6164_v40, 1  ;;  %v2342_v36 = vrot.slane %v6170_v32, 2 }
 0x2e0   :  { %v1974_v29 = vadd.f32 %v1942_v7, %v7012_v39  ;;  %v2344_v53 = vrot.slane %v2169_v43, 2  ;;  %v2341_v6 = vrot.slane %v6164_v40, 2 }
 0x2e1   :  { %v6177_v48 = vmul.f32 0.70710677, %v1975_v24  ;;  %v2265_v10 = vsel %vm846_vm1, %v2262_v2, %v2264_v11  ;;  %v2263_v47 = vsel %vm846_vm1, %v2261_v3, %v2262_v2 }
 0x2e2   :  { %v6182_v13 = vmul.f32 0.70710677, %v1974_v29  ;;  %v2345_v24 = vsel %vm927_vm2, %v2342_v36, %v2344_v53  ;;  %v2343_v2 = vsel %vm927_vm2, %v2341_v6, %v2342_v36 }
 0x2e3   :  { %7013 = vst [vmem:[#allocation19_spill] sm:$0xff] %v6177_v48  ;;  %2412 = vrot.lane.b32.xlu1 %v2265_v10, %s4728_s30  ;;  %2410 = vrot.lane.b32.xlu0 %v2263_v47, %s4728_s30  ;;  %v2083_v18 = vrot.slane %v6177_v48, 7 }
 0x2e4   :  { %v2082_v60 = vrot.slane %v6182_v13, 7  ;;  %v1877_v7 = vpop.permute.xlu1 %1876 }
 0x2e5   :  { %v2170_v43 = vsel %vm685_vm0, %v2083_v18, 0.0  ;;  %v1945_v1 = vmul.f32 %v1877_v7, %v5790_v34  ;;  %v1875_v11 = vpop.permute.xlu0 %1874 }
 0x2e6   :  { %v6193_v3 = vsel %vm685_vm0, 0.0, %v2082_v60  ;;  %v1944_v39 = vmul.f32 %v1875_v11, %v5793_v22  ;;  %v6199_v29 = vsel %vm685_vm0, %v2082_v60, %v2083_v18  ;;  %v2269_v10 = vrot.slane %v2170_v43, 1 }
 0x2e7   :  { %2508 = vrot.lane.b32.xlu1 %v2345_v24, %s4726_s26  ;;  %2506 = vrot.lane.b32.xlu0 %v2343_v2, %s4726_s26  ;;  %v1977_v34 = vadd.f32 %v1945_v1, %v5428_v49  ;;  %v2267_v47 = vrot.slane %v6199_v29, 1  ;;  %v2266_v53 = vrot.slane %v6193_v3, 1  ;;  %v2347_v6 = vrot.slane %v6199_v29, 2 }
 0x2e8   :  { %v1976_v36 = vadd.f32 %v1944_v39, %v5420_v45  ;;  %v2349_v7 = vrot.slane %v2170_v43, 2  ;;  %v2346_v18 = vrot.slane %v6193_v3, 2 }
 0x2e9   :  { %v6206_v22 = vmul.f32 0.70710677, %v1977_v34  ;;  %v2270_v11 = vsel %vm846_vm1, %v2267_v47, %v2269_v10  ;;  %v2268_v24 = vsel %vm846_vm1, %v2266_v53, %v2267_v47 }
 0x2ea   :  { %v6211_v60 = vmul.f32 0.70710677, %v1976_v36  ;;  %v2350_v10 = vsel %vm927_vm2, %v2347_v6, %v2349_v7  ;;  %v2348_v34 = vsel %vm927_vm2, %v2346_v18, %v2347_v6 }
 0x2eb   :  { %7014 = vst [vmem:[#allocation21_spill] sm:$0xff] %v6206_v22  ;;  %2416 = vrot.lane.b32.xlu1 %v2270_v11, %s4728_s30  ;;  %2414 = vrot.lane.b32.xlu0 %v2268_v24, %s4728_s30  ;;  %v2086_v49 = vrot.slane %v6206_v22, 7 }
 0x2ec   :  { %v2085_v45 = vrot.slane %v6211_v60, 7  ;;  %v1881_v1 = vpop.permute.xlu1 %1880 }
 0x2ed   :  { %v2171_v43 = vsel %vm685_vm0, %v2086_v49, 0.0  ;;  %v1947_v2 = vmul.f32 %v1881_v1, %v5800_v33  ;;  %v1879_v39 = vpop.permute.xlu0 %1878 }
 0x2ee   :  { %v6222_v47 = vsel %vm685_vm0, 0.0, %v2085_v45  ;;  %v1946_v53 = vmul.f32 %v1879_v39, %v5803_v37  ;;  %v6228_v36 = vsel %vm685_vm0, %v2085_v45, %v2086_v49  ;;  %v2274_v11 = vrot.slane %v2171_v43, 1 }
 0x2ef   :  { %2512 = vrot.lane.b32.xlu1 %v2350_v10, %s4726_s26  ;;  %2510 = vrot.lane.b32.xlu0 %v2348_v34, %s4726_s26  ;;  %v1979_v33 = vadd.f32 %v1947_v2, %v5457_v23  ;;  %v2272_v24 = vrot.slane %v6228_v36, 1  ;;  %v2271_v7 = vrot.slane %v6222_v47, 1  ;;  %v2352_v18 = vrot.slane %v6228_v36, 2 }
 0x2f0   :  { %v1978_v6 = vadd.f32 %v1946_v53, %v5453_v41  ;;  %v2354_v1 = vrot.slane %v2171_v43, 2  ;;  %v2351_v49 = vrot.slane %v6222_v47, 2 }
 0x2f1   :  { %v6235_v37 = vmul.f32 0.70710677, %v1979_v33  ;;  %v2275_v39 = vsel %vm846_vm1, %v2272_v24, %v2274_v11  ;;  %v2273_v10 = vsel %vm846_vm1, %v2271_v7, %v2272_v24 }
 0x2f2   :  { %v6240_v45 = vmul.f32 0.70710677, %v1978_v6  ;;  %v2355_v11 = vsel %vm927_vm2, %v2352_v18, %v2354_v1  ;;  %v2353_v33 = vsel %vm927_vm2, %v2351_v49, %v2352_v18  ;;  %v7016_v18 = vld [vmem:[#allocation22_spill] sm:$0xff] }
 0x2f3   :  { %7015 = vst [vmem:[#allocation20_spill] sm:$0xff] %v6235_v37  ;;  %2420 = vrot.lane.b32.xlu1 %v2275_v39, %s4728_s30  ;;  %2418 = vrot.lane.b32.xlu0 %v2273_v10, %s4728_s30  ;;  %v2089_v23 = vrot.slane %v6235_v37, 7 }
 0x2f4   :  { %v2088_v41 = vrot.slane %v6240_v45, 7  ;;  %v1885_v2 = vpop.permute.xlu1 %1884 }
 0x2f5   :  { %v2172_v43 = vsel %vm685_vm0, %v2089_v23, 0.0  ;;  %v1949_v34 = vmul.f32 %v1885_v2, %v5810_v8  ;;  %v1883_v53 = vpop.permute.xlu0 %1882 }
 0x2f6   :  { %v6251_v24 = vsel %vm685_vm0, 0.0, %v2088_v41  ;;  %v1948_v7 = vmul.f32 %v1883_v53, %v5813_v52  ;;  %v6257_v6 = vsel %vm685_vm0, %v2088_v41, %v2089_v23  ;;  %v2279_v39 = vrot.slane %v2172_v43, 1 }
 0x2f7   :  { %2516 = vrot.lane.b32.xlu1 %v2355_v11, %s4726_s26  ;;  %2514 = vrot.lane.b32.xlu0 %v2353_v33, %s4726_s26  ;;  %v1981_v8 = vadd.f32 %v1949_v34, %v5489_v30  ;;  %v2277_v10 = vrot.slane %v6257_v6, 1  ;;  %v2276_v1 = vrot.slane %v6251_v24, 1  ;;  %v2357_v2 = vrot.slane %v6257_v6, 2 }
 0x2f8   :  { %v1980_v49 = vadd.f32 %v1948_v7, %v7016_v18  ;;  %v2359_v22 = vrot.slane %v2172_v43, 2  ;;  %v2356_v23 = vrot.slane %v6251_v24, 2 }
 0x2f9   :  { %v6264_v52 = vmul.f32 0.70710677, %v1981_v8  ;;  %v2280_v53 = vsel %vm846_vm1, %v2277_v10, %v2279_v39  ;;  %v2278_v11 = vsel %vm846_vm1, %v2276_v1, %v2277_v10 }
 0x2fa   :  { %v6269_v41 = vmul.f32 0.70710677, %v1980_v49  ;;  %v2360_v39 = vsel %vm927_vm2, %v2357_v2, %v2359_v22  ;;  %v2358_v8 = vsel %vm927_vm2, %v2356_v23, %v2357_v2 }
 0x2fb   :  { %7017 = vst [vmem:[#allocation22_spill] sm:$0xff] %v6264_v52  ;;  %2424 = vrot.lane.b32.xlu1 %v2280_v53, %s4728_s30  ;;  %2422 = vrot.lane.b32.xlu0 %v2278_v11, %s4728_s30  ;;  %v2092_v30 = vrot.slane %v6264_v52, 7 }
 0x2fc   :  { %v2091_v34 = vrot.slane %v6269_v41, 7 }
 0x2fd   :  { %v2369_v33 = vpop.permute.xlu1 %2368  ;;  %v2367_v43 = vpop.permute.xlu0 %2366  ;;  %v2173_v7 = vsel %vm685_vm0, %v2092_v30, 0.0 }
 0x2fe   :  { %v6279_v10 = vsel %vm685_vm0, 0.0, %v2091_v34  ;;  %v6284_v1 = vsel %vm685_vm0, %v2091_v34, %v2092_v30  ;;  %v2284_v18 = vrot.slane %v2173_v7, 1  ;;  %v2559_v49 = vsel %vm1200_vm3, %v5851_v17, %v2369_v33 }
 0x2ff   :  { %2520 = vrot.lane.b32.xlu1 %v2360_v39, %s4726_s26  ;;  %2518 = vrot.lane.b32.xlu0 %v2358_v8, %s4726_s26  ;;  %v2282_v53 = vrot.slane %v6284_v1, 1  ;;  %v2281_v22 = vrot.slane %v6279_v10, 1  ;;  %v2558_v2 = vsel %vm1200_vm3, %v5847_v0, %v2367_v43  ;;  %v2362_v39 = vrot.slane %v6284_v1, 2 }
 0x300   :  { %v2364_v52 = vrot.slane %v2173_v7, 2  ;;  %v2361_v8 = vrot.slane %v6279_v10, 2  ;;  %vm4071_vm0 = vcmask 916480  }
 0x301   :  { %v2465_v11 = vpop.permute.xlu1 %2464  ;;  %v2463_v23 = vpop.permute.xlu0 %2462  ;;  %v2285_v34 = vsel %vm846_vm1, %v2282_v53, %v2284_v18  ;;  %v2283_v17 = vsel %vm846_vm1, %v2281_v22, %v2282_v53  ;;  %vm4074_vm1 = vcmask 982016  }
 0x302   :  { %v2591_v30 = vsel %vm1233_vm4, %v2559_v49, %v2465_v11  ;;  %v2590_v33 = vsel %vm1233_vm4, %v2558_v2, %v2463_v23  ;;  %v2365_v7 = vsel %vm927_vm2, %v2362_v39, %v2364_v52  ;;  %v2363_v49 = vsel %vm927_vm2, %v2361_v8, %v2362_v39 }
 0x303   :  { %2428 = vrot.lane.b32.xlu1 %v2285_v34, %s4728_s30  ;;  %2426 = vrot.lane.b32.xlu0 %v2283_v17, %s4728_s30 }
 0x304   :  { %4359 = vmatprep.mubr.msk.f32.mxu1 %vm1276_vm5, %v2590_v33 }
 0x305   :  { %4360 = vmatmul.mubr.msk.f32.vlgmr.msra.gmra.mrb[0].mxu1 %vm1276_vm5, %v2591_v30  ;;  %v2373_v0 = vpop.permute.xlu1 %2372  ;;  %v2371_v43 = vpop.permute.xlu0 %2370 }
 0x306   :  { %v2561_v18 = vsel %vm1200_vm3, %v5880_v62, %v2373_v0  ;;  %v2560_v53 = vsel %vm1200_vm3, %v5874_v21, %v2371_v43 }
 0x307   :  { %2524 = vrot.lane.b32.xlu1 %v2365_v7, %s4726_s26  ;;  %2522 = vrot.lane.b32.xlu0 %v2363_v49, %s4726_s26 }
 0x309   :  { %v2469_v22 = vpop.permute.xlu1 %2468  ;;  %v2467_v2 = vpop.permute.xlu0 %2466 }
 0x30a   :  { %v2593_v11 = vsel %vm1233_vm4, %v2561_v18, %v2469_v22  ;;  %v2592_v23 = vsel %vm1233_vm4, %v2560_v53, %v2467_v2 }
 0x30b   :  { %4362 = vmatprep.mubr.msk.f32.mxu1 %vm1276_vm5, %v2592_v23 }
 0x30c   :  { %4363 = vmatmul.mubr.msk.f32.gmra.mrb[2].mxu1 %vm1276_vm5, %v2593_v11 }
 0x30d   :  { %v2377_v52 = vpop.permute.xlu1 %2376  ;;  %v2375_v39 = vpop.permute.xlu0 %2374 }
 0x30e   :  { %v2563_v8 = vsel %vm1200_vm3, %v5909_v46, %v2377_v52  ;;  %v2562_v62 = vsel %vm1200_vm3, %v5903_v19, %v2375_v39 }
 0x311   :  { %v2473_v30 = vpop.permute.xlu1 %2472  ;;  %v2471_v21 = vpop.permute.xlu0 %2470 }
 0x312   :  { %v2595_v34 = vsel %vm1233_vm4, %v2563_v8, %v2473_v30  ;;  %v2594_v17 = vsel %vm1233_vm4, %v2562_v62, %v2471_v21 }
 0x313   :  { %4365 = vmatprep.mubr.msk.f32.mxu1 %vm1276_vm5, %v2594_v17 }
 0x314   :  { %4366 = vmatmul.mubr.msk.f32.gmra.mrb[4].mxu1 %vm1276_vm5, %v2595_v34 }
 0x315   :  { %v2381_v33 = vpop.permute.xlu1 %2380  ;;  %v2379_v0 = vpop.permute.xlu0 %2378 }
 0x316   :  { %v2565_v43 = vsel %vm1200_vm3, %v5938_v58, %v2381_v33  ;;  %v2564_v46 = vsel %vm1200_vm3, %v5932_v27, %v2379_v0 }
 0x319   :  { %v2477_v7 = vpop.permute.xlu1 %2476  ;;  %v2475_v19 = vpop.permute.xlu0 %2474 }
 0x31a   :  { %v2597_v49 = vsel %vm1233_vm4, %v2565_v43, %v2477_v7  ;;  %v2596_v18 = vsel %vm1233_vm4, %v2564_v46, %v2475_v19 }
 0x31b   :  { %4368 = vmatprep.mubr.msk.f32.mxu1 %vm1276_vm5, %v2596_v18 }
 0x31c   :  { %4369 = vmatmul.mubr.msk.f32.gmra.mrb[6].mxu1 %vm1276_vm5, %v2597_v49 }
 0x31d   :  { %v2385_v53 = vpop.permute.xlu1 %2384  ;;  %v2383_v22 = vpop.permute.xlu0 %2382 }
 0x31e   :  { %v2567_v2 = vsel %vm1200_vm3, %v5967_v35, %v2385_v53  ;;  %v2566_v58 = vsel %vm1200_vm3, %v5961_v26, %v2383_v22 }
 0x321   :  { %v2481_v11 = vpop.permute.xlu1 %2480  ;;  %v2479_v27 = vpop.permute.xlu0 %2478 }
 0x322   :  { %v2599_v23 = vsel %vm1233_vm4, %v2567_v2, %v2481_v11  ;;  %v2598_v52 = vsel %vm1233_vm4, %v2566_v58, %v2479_v27 }
 0x323   :  { %4371 = vmatprep.mubr.msk.f32.mxu1 %vm1276_vm5, %v2598_v52 }
 0x324   :  { %4372 = vmatmul.mubr.msk.f32.gmra.mrb[8].mxu1 %vm1276_vm5, %v2599_v23 }
 0x325   :  { %v2389_v39 = vpop.permute.xlu1 %2388  ;;  %v2387_v8 = vpop.permute.xlu0 %2386 }
 0x326   :  { %v2569_v62 = vsel %vm1200_vm3, %v5996_v63, %v2389_v39  ;;  %v2568_v35 = vsel %vm1200_vm3, %v5990_v61, %v2387_v8 }
 0x329   :  { %v2485_v30 = vpop.permute.xlu1 %2484  ;;  %v2483_v26 = vpop.permute.xlu0 %2482 }
 0x32a   :  { %v2601_v21 = vsel %vm1233_vm4, %v2569_v62, %v2485_v30  ;;  %v2600_v34 = vsel %vm1233_vm4, %v2568_v35, %v2483_v26 }
 0x32b   :  { %4374 = vmatprep.mubr.msk.f32.mxu1 %vm1276_vm5, %v2600_v34 }
 0x32c   :  { %4375 = vmatmul.mubr.msk.f32.gmra.mrb[10].mxu1 %vm1276_vm5, %v2601_v21 }
 0x32d   :  { %v2393_v17 = vpop.permute.xlu1 %2392  ;;  %v2391_v33 = vpop.permute.xlu0 %2390 }
 0x32e   :  { %v2571_v0 = vsel %vm1200_vm3, %v6025_v4, %v2393_v17  ;;  %v2570_v63 = vsel %vm1200_vm3, %v6019_v9, %v2391_v33 }
 0x331   :  { %v2489_v43 = vpop.permute.xlu1 %2488  ;;  %v2487_v61 = vpop.permute.xlu0 %2486 }
 0x332   :  { %v2603_v46 = vsel %vm1233_vm4, %v2571_v0, %v2489_v43  ;;  %v2602_v7 = vsel %vm1233_vm4, %v2570_v63, %v2487_v61 }
 0x333   :  { %4377 = vmatprep.mubr.msk.f32.mxu1 %vm1276_vm5, %v2602_v7 }
 0x334   :  { %4378 = vmatmul.mubr.msk.f32.gmra.mrb[12].mxu1 %vm1276_vm5, %v2603_v46 }
 0x335   :  { %v2397_v19 = vpop.permute.xlu1 %2396  ;;  %v2395_v49 = vpop.permute.xlu0 %2394 }
 0x336   :  { %v2573_v18 = vsel %vm1200_vm3, %v6054_v16, %v2397_v19  ;;  %v2572_v4 = vsel %vm1200_vm3, %v6048_v59, %v2395_v49 }
 0x339   :  { %v2493_v53 = vpop.permute.xlu1 %2492  ;;  %v2491_v9 = vpop.permute.xlu0 %2490 }
 0x33a   :  { %v2605_v22 = vsel %vm1233_vm4, %v2573_v18, %v2493_v53  ;;  %v2604_v2 = vsel %vm1233_vm4, %v2572_v4, %v2491_v9 }
 0x33b   :  { %4380 = vmatprep.mubr.msk.f32.mxu1 %vm1276_vm5, %v2604_v2 }
 0x33c   :  { %4381 = vmatmul.mubr.msk.f32.gmra.mrb[14].mxu1 %vm1276_vm5, %v2605_v22 }
 0x33d   :  { %v2401_v58 = vpop.permute.xlu1 %2400  ;;  %v2399_v11 = vpop.permute.xlu0 %2398 }
 0x33e   :  { %v2575_v27 = vsel %vm1200_vm3, %v6083_v51, %v2401_v58  ;;  %v2574_v16 = vsel %vm1200_vm3, %v6077_v25, %v2399_v11 }
 0x341   :  { %v2497_v23 = vpop.permute.xlu1 %2496  ;;  %v2495_v59 = vpop.permute.xlu0 %2494 }
 0x342   :  { %v2607_v52 = vsel %vm1233_vm4, %v2575_v27, %v2497_v23  ;;  %v2606_v39 = vsel %vm1233_vm4, %v2574_v16, %v2495_v59 }
 0x343   :  { %4383 = vmatprep.mubr.msk.f32.mxu1 %vm1276_vm5, %v2606_v39 }
 0x344   :  { %4384 = vmatmul.mubr.msk.f32.gmra.mrb[16].mxu1 %vm1276_vm5, %v2607_v52 }
 0x345   :  { %v2405_v8 = vpop.permute.xlu1 %2404  ;;  %v2403_v62 = vpop.permute.xlu0 %2402 }
 0x346   :  { %v2577_v35 = vsel %vm1200_vm3, %v6112_v57, %v2405_v8  ;;  %v2576_v51 = vsel %vm1200_vm3, %v6106_v20, %v2403_v62 }
 0x349   :  { %v2501_v30 = vpop.permute.xlu1 %2500  ;;  %v2499_v25 = vpop.permute.xlu0 %2498 }
 0x34a   :  { %v2609_v26 = vsel %vm1233_vm4, %v2577_v35, %v2501_v30  ;;  %v2608_v21 = vsel %vm1233_vm4, %v2576_v51, %v2499_v25 }
 0x34b   :  { %4386 = vmatprep.mubr.msk.f32.mxu1 %vm1276_vm5, %v2608_v21 }
 0x34c   :  { %4387 = vmatmul.mubr.msk.f32.gmra.mrb[18].mxu1 %vm1276_vm5, %v2609_v26 }
 0x34d   :  { %v2409_v34 = vpop.permute.xlu1 %2408  ;;  %v2407_v17 = vpop.permute.xlu0 %2406 }
 0x34e   :  { %v2579_v33 = vsel %vm1200_vm3, %v6141_v38, %v2409_v34  ;;  %v2578_v57 = vsel %vm1200_vm3, %v6135_v50, %v2407_v17 }
 0x351   :  { %v2505_v0 = vpop.permute.xlu1 %2504  ;;  %v2503_v20 = vpop.permute.xlu0 %2502 }
 0x352   :  { %v2611_v63 = vsel %vm1233_vm4, %v2579_v33, %v2505_v0  ;;  %v2610_v43 = vsel %vm1233_vm4, %v2578_v57, %v2503_v20  ;;  %v6429_v57 = vld [vmem:[%s6923_s2 + $0x1] ss:$0 sm:$0xff]  ;;  %s4731_s2 = smov [#allocation2]  }
 0x353   :  { %4389 = vmatprep.mubr.msk.f32.mxu1 %vm1276_vm5, %v2610_v43 }
 0x354   :  { %4390 = vmatmul.mubr.msk.f32.gmra.mrb[20].mxu1 %vm1276_vm5, %v2611_v63 }
 0x355   :  { %v2413_v61 = vpop.permute.xlu1 %2412  ;;  %v2411_v46 = vpop.permute.xlu0 %2410 }
 0x356   :  { %v2581_v7 = vsel %vm1200_vm3, %v6170_v32, %v2413_v61  ;;  %v2580_v38 = vsel %vm1200_vm3, %v6164_v40, %v2411_v46 }
 0x359   :  { %v2509_v19 = vpop.permute.xlu1 %2508  ;;  %v2507_v50 = vpop.permute.xlu0 %2506 }
 0x35a   :  { %v2613_v49 = vsel %vm1233_vm4, %v2581_v7, %v2509_v19  ;;  %v2612_v18 = vsel %vm1233_vm4, %v2580_v38, %v2507_v50 }
 0x35b   :  { %4392 = vmatprep.mubr.msk.f32.mxu1 %vm1276_vm5, %v2612_v18 }
 0x35c   :  { %4393 = vmatmul.mubr.msk.f32.gmra.mrb[22].mxu1 %vm1276_vm5, %v2613_v49 }
 0x35d   :  { %v2417_v4 = vpop.permute.xlu1 %2416  ;;  %v2415_v53 = vpop.permute.xlu0 %2414 }
 0x35e   :  { %v2583_v9 = vsel %vm1200_vm3, %v6199_v29, %v2417_v4  ;;  %v2582_v32 = vsel %vm1200_vm3, %v6193_v3, %v2415_v53 }
 0x361   :  { %v2513_v22 = vpop.permute.xlu1 %2512  ;;  %v2511_v40 = vpop.permute.xlu0 %2510 }
 0x362   :  { %v2615_v2 = vsel %vm1233_vm4, %v2583_v9, %v2513_v22  ;;  %v2614_v58 = vsel %vm1233_vm4, %v2582_v32, %v2511_v40 }
 0x363   :  { %4395 = vmatprep.mubr.msk.f32.mxu1 %vm1276_vm5, %v2614_v58 }
 0x364   :  { %4396 = vmatmul.mubr.msk.f32.gmra.mrb[24].mxu1 %vm1276_vm5, %v2615_v2 }
 0x365   :  { %v2421_v11 = vpop.permute.xlu1 %2420  ;;  %v2419_v27 = vpop.permute.xlu0 %2418 }
 0x366   :  { %v2585_v16 = vsel %vm1200_vm3, %v6228_v36, %v2421_v11  ;;  %v2584_v29 = vsel %vm1200_vm3, %v6222_v47, %v2419_v27 }
 0x369   :  { %v2517_v23 = vpop.permute.xlu1 %2516  ;;  %v2515_v3 = vpop.permute.xlu0 %2514 }
 0x36a   :  { %v2617_v59 = vsel %vm1233_vm4, %v2585_v16, %v2517_v23  ;;  %v2616_v52 = vsel %vm1233_vm4, %v2584_v29, %v2515_v3 }
 0x36b   :  { %4398 = vmatprep.mubr.msk.f32.mxu1 %vm1276_vm5, %v2616_v52 }
 0x36c   :  { %4399 = vmatmul.mubr.msk.f32.gmra.mrb[26].mxu1 %vm1276_vm5, %v2617_v59 }
 0x36d   :  { %v2425_v39 = vpop.permute.xlu1 %2424  ;;  %v2423_v8 = vpop.permute.xlu0 %2422 }
 0x36e   :  { %v2587_v62 = vsel %vm1200_vm3, %v6257_v6, %v2425_v39  ;;  %v2586_v36 = vsel %vm1200_vm3, %v6251_v24, %v2423_v8 }
 0x371   :  { %v2521_v35 = vpop.permute.xlu1 %2520  ;;  %v2519_v47 = vpop.permute.xlu0 %2518 }
 0x372   :  { %v2619_v51 = vsel %vm1233_vm4, %v2587_v62, %v2521_v35  ;;  %v2618_v30 = vsel %vm1233_vm4, %v2586_v36, %v2519_v47 }
 0x373   :  { %4401 = vmatprep.mubr.msk.f32.mxu1 %vm1276_vm5, %v2618_v30 }
 0x374   :  { %4402 = vmatmul.mubr.msk.f32.gmra.mrb[28].mxu1 %vm1276_vm5, %v2619_v51 }
 0x375   :  { %v2429_v25 = vpop.permute.xlu1 %2428  ;;  %v2427_v26 = vpop.permute.xlu0 %2426 }
 0x376   :  { %v2589_v21 = vsel %vm1200_vm3, %v6284_v1, %v2429_v25  ;;  %v2588_v6 = vsel %vm1200_vm3, %v6279_v10, %v2427_v26 }
 0x379   :  { %v2525_v34 = vpop.permute.xlu1 %2524  ;;  %v2523_v24 = vpop.permute.xlu0 %2522 }
 0x37a   :  { %v2621_v17 = vsel %vm1233_vm4, %v2589_v21, %v2525_v34  ;;  %v2620_v33 = vsel %vm1233_vm4, %v2588_v6, %v2523_v24 }
 0x37b   :  { %4404 = vmatprep.mubr.msk.f32.mxu1 %vm1276_vm5, %v2620_v33 }
 0x37c   :  { %4405 = vmatmul.mubr.msk.f32.gmra.mrb[30].mxu1 %vm1276_vm5, %v2621_v17 }
 0x3d8   :  { %v4361_v0 = vpop.f32.mrb[0].mxu1 }
 0x3d9   :  { %v6432_v1 = vadd.f32 %v4361_v0, %v6429_v57  ;;  %v2796_v10 = vpop.f32.mrb[1].mxu1 }
 0x3da   :  { %v6435_v20 = vadd.f32 %v6429_v57, %v2796_v10 }
 0x3db   :  { %v4198_v63 = vmul.f32 -1.442695, %v6432_v1 }
 0x3dc   :  { %v4197_v43 = vmul.f32 -1.442695, %v6435_v20 }
 0x3dd   :  { %4562 = vpow2.f32 %v4198_v63 }
 0x3de   :  { %4564 = vpow2.f32 %v4197_v43 }
 0x3df   :  { %v4364_v61 = vpop.f32.mrb[2].mxu1 }
 0x3e0   :  { %v6440_v46 = vadd.f32 %v4364_v61, %v6429_v57  ;;  %v2806_v7 = vpop.f32.mrb[3].mxu1 }
 0x3e1   :  { %v6443_v38 = vadd.f32 %v6429_v57, %v2806_v7 }
 0x3e2   :  { %v4200_v19 = vmul.f32 -1.442695, %v6440_v46 }
 0x3e3   :  { %v4199_v50 = vmul.f32 -1.442695, %v6443_v38 }
 0x3e4   :  { %4566 = vpow2.f32 %v4200_v19 }
 0x3e5   :  { %4568 = vpow2.f32 %v4199_v50 }
 0x3e7   :  { %v4563_v49 = vpop.eup %4562  ;;  %v4367_v18 = vpop.f32.mrb[4].mxu1 }
 0x3e8   :  { %v4565_v4 = vpop.eup %4564  ;;  %v3052_v53 = vadd.f32 1.0, %v4563_v49  ;;  %v6448_v9 = vadd.f32 %v4367_v18, %v6429_v57  ;;  %v2816_v32 = vpop.f32.mrb[5].mxu1 }
 0x3e9   :  { %v6451_v22 = vadd.f32 %v6429_v57, %v2816_v32  ;;  %v3051_v40 = vadd.f32 1.0, %v4565_v4 }
 0x3ea   :  { %4570 = vrcp.f32 %v3052_v53  ;;  %v4202_v2 = vmul.f32 -1.442695, %v6448_v9 }
 0x3eb   :  { %v4201_v58 = vmul.f32 -1.442695, %v6451_v22 }
 0x3ec   :  { %4572 = vpow2.f32 %v4202_v2 }
 0x3ed   :  { %4574 = vpow2.f32 %v4201_v58 }
 0x3ee   :  { %v4567_v11 = vpop.eup %4566  ;;  %4576 = vrcp.f32 %v3051_v40 }
 0x3ef   :  { %v4569_v27 = vpop.eup %4568  ;;  %v3054_v16 = vadd.f32 1.0, %v4567_v11  ;;  %v4370_v29 = vpop.f32.mrb[6].mxu1 }
 0x3f0   :  { %v3053_v23 = vadd.f32 1.0, %v4569_v27  ;;  %v6456_v3 = vadd.f32 %v4370_v29, %v6429_v57  ;;  %v2826_v59 = vpop.f32.mrb[7].mxu1 }
 0x3f1   :  { %4578 = vrcp.f32 %v3054_v16  ;;  %v6459_v52 = vadd.f32 %v6429_v57, %v2826_v59 }
 0x3f2   :  { %v4204_v39 = vmul.f32 -1.442695, %v6456_v3  ;;  %4580 = vrcp.f32 %v3053_v23 }
 0x3f3   :  { %v4203_v8 = vmul.f32 -1.442695, %v6459_v52 }
 0x3f4   :  { %v4571_v62 = vpop.eup %4570  ;;  %4582 = vpow2.f32 %v4204_v39 }
 0x3f5   :  { %4584 = vpow2.f32 %v4203_v8  ;;  %3181 = vrot.lane.b32.xlu0 %v4571_v62, %s4715_s15 }
 0x3f6   :  { %v4573_v36 = vpop.eup %4572 }
 0x3f7   :  { %v4575_v35 = vpop.eup %4574  ;;  %v3056_v47 = vadd.f32 1.0, %v4573_v36  ;;  %v4373_v51 = vpop.f32.mrb[8].mxu1 }
 0x3f8   :  { %v4577_v30 = vpop.eup %4576  ;;  %v3055_v25 = vadd.f32 1.0, %v4575_v35  ;;  %v6465_v26 = vadd.f32 %v4373_v51, %v6429_v57  ;;  %v2836_v21 = vpop.f32.mrb[9].mxu1 }
 0x3f9   :  { %4586 = vrcp.f32 %v3056_v47  ;;  %3179 = vrot.lane.b32.xlu0 %v4577_v30, %s4715_s15  ;;  %v6469_v6 = vadd.f32 %v6429_v57, %v2836_v21 }
 0x3fa   :  { %v4206_v34 = vmul.f32 -1.442695, %v6465_v26  ;;  %4588 = vrcp.f32 %v3055_v25 }
 0x3fb   :  { %v4579_v24 = vpop.eup %4578  ;;  %v4205_v17 = vmul.f32 -1.442695, %v6469_v6 }
 0x3fc   :  { %4590 = vpow2.f32 %v4206_v34  ;;  %3185 = vrot.lane.b32.xlu1 %v4579_v24, %s4715_s15  ;;  %v4581_v33 = vpop.eup %4580 }
 0x3fd   :  { %4592 = vpow2.f32 %v4205_v17 }
 0x3fe   :  { %v4583_v0 = vpop.eup %4582 }
 0x3ff   :  { %v4585_v10 = vpop.eup %4584  ;;  %v3058_v63 = vadd.f32 1.0, %v4583_v0  ;;  %v4376_v43 = vpop.f32.mrb[10].mxu1 }
 0x400   :  { %v3057_v61 = vadd.f32 1.0, %v4585_v10  ;;  %v6475_v7 = vadd.f32 %v4376_v43, %v6429_v57  ;;  %3183 = vrot.lane.b32.xlu1 %v4581_v33, %s4715_s15  ;;  %v2846_v19 = vpop.f32.mrb[11].mxu1 }
 0x401   :  { %4594 = vrcp.f32 %v3058_v63  ;;  %v6479_v50 = vadd.f32 %v6429_v57, %v2846_v19 }
 0x402   :  { %v4208_v49 = vmul.f32 -1.442695, %v6475_v7  ;;  %4596 = vrcp.f32 %v3057_v61 }
 0x403   :  { %v4587_v18 = vpop.eup %4586  ;;  %v4207_v4 = vmul.f32 -1.442695, %v6479_v50 }
 0x404   :  { %4598 = vpow2.f32 %v4208_v49  ;;  %3189 = vrot.lane.b32.xlu0 %v4587_v18, %s4715_s15  ;;  %v4589_v53 = vpop.eup %4588 }
 0x405   :  { %4600 = vpow2.f32 %v4207_v4 }
 0x406   :  { %v4591_v32 = vpop.eup %4590 }
 0x407   :  { %v4593_v40 = vpop.eup %4592  ;;  %v3060_v2 = vadd.f32 1.0, %v4591_v32  ;;  %v4379_v58 = vpop.f32.mrb[12].mxu1 }
 0x408   :  { %v3059_v11 = vadd.f32 1.0, %v4593_v40  ;;  %v6485_v27 = vadd.f32 %v4379_v58, %v6429_v57  ;;  %3187 = vrot.lane.b32.xlu0 %v4589_v53, %s4715_s15  ;;  %v2856_v16 = vpop.f32.mrb[13].mxu1 }
 0x409   :  { %4602 = vrcp.f32 %v3060_v2  ;;  %v6489_v29 = vadd.f32 %v6429_v57, %v2856_v16 }
 0x40a   :  { %v4210_v23 = vmul.f32 -1.442695, %v6485_v27  ;;  %4604 = vrcp.f32 %v3059_v11 }
 0x40b   :  { %v4595_v59 = vpop.eup %4594  ;;  %v4209_v39 = vmul.f32 -1.442695, %v6489_v29 }
 0x40c   :  { %4606 = vpow2.f32 %v4210_v23  ;;  %3193 = vrot.lane.b32.xlu1 %v4595_v59, %s4715_s15  ;;  %v4597_v8 = vpop.eup %4596 }
 0x40d   :  { %4608 = vpow2.f32 %v4209_v39 }
 0x40e   :  { %v4599_v62 = vpop.eup %4598 }
 0x40f   :  { %v4601_v36 = vpop.eup %4600  ;;  %v3062_v35 = vadd.f32 1.0, %v4599_v62  ;;  %v4382_v47 = vpop.f32.mrb[14].mxu1 }
 0x410   :  { %v3061_v51 = vadd.f32 1.0, %v4601_v36  ;;  %v6495_v30 = vadd.f32 %v4382_v47, %v6429_v57  ;;  %3191 = vrot.lane.b32.xlu1 %v4597_v8, %s4715_s15  ;;  %v2866_v25 = vpop.f32.mrb[15].mxu1 }
 0x411   :  { %4610 = vrcp.f32 %v3062_v35  ;;  %v6499_v21 = vadd.f32 %v6429_v57, %v2866_v25 }
 0x412   :  { %v4212_v34 = vmul.f32 -1.442695, %v6495_v30  ;;  %4612 = vrcp.f32 %v3061_v51 }
 0x413   :  { %v4603_v24 = vpop.eup %4602  ;;  %v4211_v17 = vmul.f32 -1.442695, %v6499_v21 }
 0x414   :  { %4614 = vpow2.f32 %v4212_v34  ;;  %3197 = vrot.lane.b32.xlu0 %v4603_v24, %s4715_s15  ;;  %v4605_v33 = vpop.eup %4604 }
 0x415   :  { %4616 = vpow2.f32 %v4211_v17 }
 0x416   :  { %v4607_v0 = vpop.eup %4606 }
 0x417   :  { %v4609_v10 = vpop.eup %4608  ;;  %v3064_v63 = vadd.f32 1.0, %v4607_v0  ;;  %v4385_v43 = vpop.f32.mrb[16].mxu1 }
 0x418   :  { %v3063_v61 = vadd.f32 1.0, %v4609_v10  ;;  %v6505_v19 = vadd.f32 %v4385_v43, %v6429_v57  ;;  %3195 = vrot.lane.b32.xlu0 %v4605_v33, %s4715_s15  ;;  %v2876_v49 = vpop.f32.mrb[17].mxu1 }
 0x419   :  { %4618 = vrcp.f32 %v3064_v63  ;;  %v6509_v18 = vadd.f32 %v6429_v57, %v2876_v49 }
 0x41a   :  { %v4214_v4 = vmul.f32 -1.442695, %v6505_v19  ;;  %4620 = vrcp.f32 %v3063_v61 }
 0x41b   :  { %v4611_v53 = vpop.eup %4610  ;;  %v4213_v32 = vmul.f32 -1.442695, %v6509_v18 }
 0x41c   :  { %4622 = vpow2.f32 %v4214_v4  ;;  %3201 = vrot.lane.b32.xlu1 %v4611_v53, %s4715_s15  ;;  %v4613_v40 = vpop.eup %4612 }
 0x41d   :  { %4624 = vpow2.f32 %v4213_v32 }
 0x41e   :  { %v4615_v2 = vpop.eup %4614 }
 0x41f   :  { %v4617_v58 = vpop.eup %4616  ;;  %v3066_v11 = vadd.f32 1.0, %v4615_v2  ;;  %v4388_v16 = vpop.f32.mrb[18].mxu1 }
 0x420   :  { %v3065_v23 = vadd.f32 1.0, %v4617_v58  ;;  %v6515_v59 = vadd.f32 %v4388_v16, %v6429_v57  ;;  %3199 = vrot.lane.b32.xlu1 %v4613_v40, %s4715_s15  ;;  %v2886_v39 = vpop.f32.mrb[19].mxu1 }
 0x421   :  { %4626 = vrcp.f32 %v3066_v11  ;;  %v6519_v8 = vadd.f32 %v6429_v57, %v2886_v39 }
 0x422   :  { %v4216_v62 = vmul.f32 -1.442695, %v6515_v59  ;;  %4628 = vrcp.f32 %v3065_v23 }
 0x423   :  { %v4619_v36 = vpop.eup %4618  ;;  %v4215_v35 = vmul.f32 -1.442695, %v6519_v8 }
 0x424   :  { %4630 = vpow2.f32 %v4216_v62  ;;  %3205 = vrot.lane.b32.xlu0 %v4619_v36, %s4715_s15  ;;  %v4621_v47 = vpop.eup %4620 }
 0x425   :  { %4632 = vpow2.f32 %v4215_v35 }
 0x426   :  { %v4623_v51 = vpop.eup %4622 }
 0x427   :  { %v4625_v25 = vpop.eup %4624  ;;  %v3068_v34 = vadd.f32 1.0, %v4623_v51  ;;  %v4391_v24 = vpop.f32.mrb[20].mxu1 }
 0x428   :  { %v3067_v17 = vadd.f32 1.0, %v4625_v25  ;;  %v6525_v33 = vadd.f32 %v4391_v24, %v6429_v57  ;;  %3203 = vrot.lane.b32.xlu0 %v4621_v47, %s4715_s15  ;;  %v2896_v0 = vpop.f32.mrb[21].mxu1 }
 0x429   :  { %4634 = vrcp.f32 %v3068_v34  ;;  %v6529_v10 = vadd.f32 %v6429_v57, %v2896_v0 }
 0x42a   :  { %v4218_v63 = vmul.f32 -1.442695, %v6525_v33  ;;  %4636 = vrcp.f32 %v3067_v17 }
 0x42b   :  { %v4627_v43 = vpop.eup %4626  ;;  %v4217_v61 = vmul.f32 -1.442695, %v6529_v10 }
 0x42c   :  { %4638 = vpow2.f32 %v4218_v63  ;;  %3209 = vrot.lane.b32.xlu1 %v4627_v43, %s4715_s15  ;;  %v4629_v49 = vpop.eup %4628 }
 0x42d   :  { %4640 = vpow2.f32 %v4217_v61 }
 0x42e   :  { %v4631_v4 = vpop.eup %4630 }
 0x42f   :  { %v4633_v53 = vpop.eup %4632  ;;  %v3070_v32 = vadd.f32 1.0, %v4631_v4  ;;  %v4394_v40 = vpop.f32.mrb[22].mxu1 }
 0x430   :  { %v3069_v2 = vadd.f32 1.0, %v4633_v53  ;;  %v6535_v58 = vadd.f32 %v4394_v40, %v6429_v57  ;;  %3207 = vrot.lane.b32.xlu1 %v4629_v49, %s4715_s15  ;;  %v2906_v11 = vpop.f32.mrb[23].mxu1 }
 0x431   :  { %4642 = vrcp.f32 %v3070_v32  ;;  %v6539_v16 = vadd.f32 %v6429_v57, %v2906_v11 }
 0x432   :  { %v4220_v23 = vmul.f32 -1.442695, %v6535_v58  ;;  %4644 = vrcp.f32 %v3069_v2 }
 0x433   :  { %v4635_v39 = vpop.eup %4634  ;;  %v4219_v62 = vmul.f32 -1.442695, %v6539_v16 }
 0x434   :  { %4646 = vpow2.f32 %v4220_v23  ;;  %3213 = vrot.lane.b32.xlu0 %v4635_v39, %s4715_s15  ;;  %v4637_v36 = vpop.eup %4636 }
 0x435   :  { %4648 = vpow2.f32 %v4219_v62 }
 0x436   :  { %v4639_v35 = vpop.eup %4638 }
 0x437   :  { %v4641_v47 = vpop.eup %4640  ;;  %v3072_v51 = vadd.f32 1.0, %v4639_v35  ;;  %v4397_v25 = vpop.f32.mrb[24].mxu1 }
 0x438   :  { %v3071_v34 = vadd.f32 1.0, %v4641_v47  ;;  %3211 = vrot.lane.b32.xlu0 %v4637_v36, %s4715_s15  ;;  %v2916_v24 = vpop.f32.mrb[25].mxu1  ;;  %v6556_v39 = vadd.f32 %v4397_v25, %v6429_v57 }
 0x439   :  { %4650 = vrcp.f32 %v3072_v51  ;;  %v6546_v17 = vadd.f32 %v6429_v57, %v2916_v24 }
 0x43a   :  { %4652 = vrcp.f32 %v3071_v34  ;;  %7018 = vst [vmem:[#allocation25_spill] sm:$0xff] %v6556_v39  ;;  %v4222_v47 = vmul.f32 -1.442695, %v6556_v39 }
 0x43b   :  { %v4643_v0 = vpop.eup %4642  ;;  %v4221_v63 = vmul.f32 -1.442695, %v6546_v17 }
 0x43c   :  { %3217 = vrot.lane.b32.xlu1 %v4643_v0, %s4715_s15  ;;  %v4645_v43 = vpop.eup %4644 }
 0x43d   :  { %4654 = vpow2.f32 %v4221_v63 }
 0x43e   :  { %v4647_v61 = vpop.eup %4646 }
 0x43f   :  { %v4649_v49 = vpop.eup %4648  ;;  %v3074_v4 = vadd.f32 1.0, %v4647_v61  ;;  %v4400_v53 = vpop.f32.mrb[26].mxu1 }
 0x440   :  { %v3073_v32 = vadd.f32 1.0, %v4649_v49  ;;  %3215 = vrot.lane.b32.xlu1 %v4645_v43, %s4715_s15  ;;  %v2926_v40 = vpop.f32.mrb[27].mxu1  ;;  %v6569_v43 = vadd.f32 %v4400_v53, %v6429_v57 }
 0x441   :  { %4656 = vrcp.f32 %v3074_v4  ;;  %v6552_v2 = vadd.f32 %v6429_v57, %v2926_v40 }
 0x442   :  { %4658 = vrcp.f32 %v3073_v32  ;;  %7019 = vst [vmem:[#allocation26_spill] sm:$0xff] %v6569_v43  ;;  %v4224_v40 = vmul.f32 -1.442695, %v6569_v43 }
 0x443   :  { %v4651_v11 = vpop.eup %4650  ;;  %v4223_v23 = vmul.f32 -1.442695, %v6552_v2 }
 0x444   :  { %3221 = vrot.lane.b32.xlu0 %v4651_v11, %s4715_s15  ;;  %v4653_v62 = vpop.eup %4652 }
 0x445   :  { %4660 = vpow2.f32 %v4223_v23 }
 0x447   :  { %v4655_v36 = vpop.eup %4654  ;;  %v4403_v35 = vpop.f32.mrb[28].mxu1 }
 0x448   :  { %v3075_v51 = vadd.f32 1.0, %v4655_v36  ;;  %v6561_v34 = vadd.f32 %v4403_v35, %v6429_v57  ;;  %3219 = vrot.lane.b32.xlu0 %v4653_v62, %s4715_s15  ;;  %v2936_v24 = vpop.f32.mrb[29].mxu1 }
 0x449   :  { %v6565_v0 = vadd.f32 %v6429_v57, %v2936_v24 }
 0x44a   :  { %4662 = vrcp.f32 %v3075_v51  ;;  %v4226_v61 = vmul.f32 -1.442695, %v6561_v34 }
 0x44b   :  { %v4657_v25 = vpop.eup %4656  ;;  %v4225_v63 = vmul.f32 -1.442695, %v6565_v0  ;;  %4664 = vpow2.f32 %v4222_v47 }
 0x44c   :  { %3225 = vrot.lane.b32.xlu1 %v4657_v25, %s4715_s15  ;;  %v4659_v49 = vpop.eup %4658 }
 0x44d   :  { %4666 = vpow2.f32 %v4225_v63 }
 0x44e   :  { %4668 = vpow2.f32 %v4226_v61 }
 0x44f   :  { %v4661_v4 = vpop.eup %4660  ;;  %v4406_v32 = vpop.f32.mrb[30].mxu1 }
 0x450   :  { %v3077_v11 = vadd.f32 1.0, %v4661_v4  ;;  %3223 = vrot.lane.b32.xlu1 %v4659_v49, %s4715_s15  ;;  %v2946_v23 = vpop.f32.mrb[31].mxu1  ;;  %v6576_v62 = vadd.f32 %v4406_v32, %v6429_v57 }
 0x451   :  { %v6579_v53 = vadd.f32 %v6429_v57, %v2946_v23 }
 0x452   :  { %7020 = vst [vmem:[#allocation27_spill] sm:$0xff] %v6576_v62  ;;  %4670 = vrcp.f32 %v3077_v11  ;;  %v4228_v47 = vmul.f32 -1.442695, %v6576_v62 }
 0x453   :  { %v4227_v36 = vmul.f32 -1.442695, %v6579_v53  ;;  %4672 = vpow2.f32 %v4224_v40 }
 0x454   :  { %v4663_v35 = vpop.eup %4662 }
 0x455   :  { %4674 = vpow2.f32 %v4227_v36  ;;  %3227 = vrot.lane.b32.xlu0 %v4663_v35, %s4715_s15  ;;  %v4665_v51 = vpop.eup %4664 }
 0x456   :  { %4676 = vpow2.f32 %v4228_v47  ;;  %v3076_v61 = vadd.f32 1.0, %v4665_v51 }
 0x457   :  { %v4667_v24 = vpop.eup %4666 }
 0x458   :  { %v3079_v25 = vadd.f32 1.0, %v4667_v24  ;;  %v4669_v63 = vpop.eup %4668 }
 0x459   :  { %v3080_v57 = vadd.f32 1.0, %v4669_v63 }
 0x45a   :  { %4678 = vrcp.f32 %v3079_v25 }
 0x45b   :  { %4680 = vrcp.f32 %v3076_v61 }
 0x45c   :  { %v4671_v49 = vpop.eup %4670  ;;  %4682 = vrcp.f32 %v3080_v57 }
 0x45d   :  { %3231 = vrot.lane.b32.xlu1 %v4671_v49, %s4715_s15  ;;  %v4673_v4 = vpop.eup %4672 }
 0x45e   :  { %v3078_v11 = vadd.f32 1.0, %v4673_v4 }
 0x45f   :  { %v4675_v32 = vpop.eup %4674 }
 0x460   :  { %v3081_v40 = vadd.f32 1.0, %v4675_v32  ;;  %v4677_v23 = vpop.eup %4676 }
 0x461   :  { %v3082_v35 = vadd.f32 1.0, %v4677_v23 }
 0x462   :  { %4684 = vrcp.f32 %v3081_v40 }
 0x463   :  { %4686 = vrcp.f32 %v3078_v11 }
 0x464   :  { %v4679_v36 = vpop.eup %4678  ;;  %4688 = vrcp.f32 %v3082_v35 }
 0x465   :  { %3235 = vrot.lane.b32.xlu0 %v4679_v36, %s4715_s15  ;;  %v4681_v47 = vpop.eup %4680 }
 0x466   :  { %v4683_v51 = vpop.eup %4682 }
 0x467   :  { %v3182_v61 = vpop.permute.xlu0 %3181 }
 0x468   :  { %v3276_v48 = vmul.f32 %v3182_v61, %v6432_v1 }
 0x469   :  { %3229 = vrot.lane.b32.xlu0 %v4681_v47, %s4715_s15 }
 0x46b   :  { %v3180_v49 = vpop.permute.xlu0 %3179 }
 0x46c   :  { %v4685_v24 = vpop.eup %4684 }
 0x46d   :  { %3237 = vrot.lane.b32.xlu0 %v4683_v51, %s4715_s15  ;;  %3239 = vrot.lane.b32.xlu1 %v4685_v24, %s4715_s15  ;;  %v4687_v25 = vpop.eup %4686 }
 0x46e   :  { %v4689_v63 = vpop.eup %4688  ;;  %v3186_v57 = vpop.permute.xlu1 %3185 }
 0x46f   :  { %v3278_v51 = vmul.f32 %v3186_v57, %v6440_v46 }
 0x471   :  { %3233 = vrot.lane.b32.xlu1 %v4687_v25, %s4715_s15  ;;  %v3310_v37 = vadd.f32 %v3278_v51, %v5858_v42 }
 0x472   :  { %v3184_v32 = vpop.permute.xlu1 %3183 }
 0x473   :  { %v6606_v61 = vmul.f32 0.70710677, %v3310_v37  ;;  %v3277_v42 = vmul.f32 %v3184_v32, %v6443_v38  ;;  %v7024_v38 = vld [vmem:[#allocation14_spill] sm:$0xff] }
 0x475   :  { %3241 = vrot.lane.b32.xlu1 %v4689_v63, %s4715_s15 }
 0x476   :  { %v3190_v4 = vpop.permute.xlu0 %3189 }
 0x477   :  { %v3280_v25 = vmul.f32 %v3190_v4, %v6448_v9  ;;  %v7021_v9 = vld [vmem:[#allocation23_spill] sm:$0xff] }
 0x478   :  { %v3308_v4 = vadd.f32 %v3276_v48, %v7021_v9 }
 0x479   :  { %v3312_v39 = vadd.f32 %v3280_v25, %v5887_v15  ;;  %v7028_v25 = vld [vmem:[#allocation24_spill] sm:$0xff] }
 0x47a   :  { %v3188_v40 = vpop.permute.xlu0 %3187 }
 0x47b   :  { %v3279_v15 = vmul.f32 %v3188_v40, %v6451_v22 }
 0x47e   :  { %v3194_v11 = vpop.permute.xlu1 %3193 }
 0x47f   :  { %v3282_v35 = vmul.f32 %v3194_v11, %v6456_v3 }
 0x481   :  { %v3314_v62 = vadd.f32 %v3282_v35, %v5916_v31 }
 0x482   :  { %v3192_v36 = vpop.permute.xlu1 %3191 }
 0x483   :  { %v6600_v3 = vmul.f32 0.70710677, %v3314_v62  ;;  %v3281_v46 = vmul.f32 %v3192_v36, %v6459_v52  ;;  %v7022_v62 = vld [vmem:[#allocation10_spill] sm:$0xff] }
 0x485   :  { %v3659_v48 = vcombine.low %v6606_v61, %v6600_v3 }
 0x486   :  { %v3198_v23 = vpop.permute.xlu0 %3197 }
 0x487   :  { %v3284_v44 = vmul.f32 %v3198_v23, %v6465_v26  ;;  %v3275_v23 = vmul.f32 %v3180_v49, %v6435_v20  ;;  %v7027_v49 = vld [vmem:[#allocation15_spill] sm:$0xff] }
 0x489   :  { %v3316_v52 = vadd.f32 %v3284_v44, %v7022_v62  ;;  %v7026_v44 = vld [vmem:[#allocation8_spill] sm:$0xff] }
 0x48a   :  { %v3196_v47 = vpop.permute.xlu0 %3195  ;;  %v3311_v35 = vadd.f32 %v3279_v15, %v7026_v44  ;;  %v7031_v62 = vld [vmem:[#allocation12_spill] sm:$0xff] }
 0x48e   :  { %v3202_v24 = vpop.permute.xlu1 %3201 }
 0x48f   :  { %v3286_v31 = vmul.f32 %v3202_v24, %v6475_v7  ;;  %v7023_v7 = vld [vmem:[#allocation9_spill] sm:$0xff] }
 0x490   :  { %v3313_v36 = vadd.f32 %v3281_v46, %v7023_v7  ;;  %v7029_v46 = vld [vmem:[#allocation5_spill] sm:$0xff] }
 0x491   :  { %v3318_v22 = vadd.f32 %v3286_v31, %v7024_v38  ;;  %v7032_v7 = vld [vmem:[#allocation13_spill] sm:$0xff] }
 0x492   :  { %v3200_v57 = vpop.permute.xlu1 %3199  ;;  %v6632_v9 = vmul.f32 0.70710677, %v3313_v36 }
 0x493   :  { %v3285_v20 = vmul.f32 %v3200_v57, %v6479_v50 }
 0x496   :  { %v3206_v63 = vpop.permute.xlu0 %3205 }
 0x497   :  { %v3288_v43 = vmul.f32 %v3206_v63, %v6485_v27  ;;  %v6611_v27 = vmul.f32 0.70710677, %v3312_v39  ;;  %v7025_v39 = vld [vmem:[#allocation7_spill] sm:$0xff]  ;;  %v3307_v63 = vadd.f32 %v3275_v23, %v7028_v25 }
 0x498   :  { %v3309_v40 = vadd.f32 %v3277_v42, %v7025_v39 }
 0x499   :  { %v3320_v1 = vadd.f32 %v3288_v43, %v6003_v28  ;;  %v3283_v28 = vmul.f32 %v3196_v47, %v6469_v6  ;;  %v6619_v43 = vmul.f32 0.70710677, %v3308_v4  ;;  %v3348_v6 = vmul.f32 0.70710677, %v3316_v52 }
 0x49a   :  { %v3204_v11 = vpop.permute.xlu0 %3203  ;;  %v6636_v15 = vmul.f32 0.70710677, %v3309_v40 }
 0x49b   :  { %v3287_v26 = vmul.f32 %v3204_v11, %v6489_v29  ;;  %v3352_v32 = vmul.f32 0.70710677, %v3320_v1  ;;  %v3643_v24 = vcombine.low %v6619_v43, %v6611_v27  ;;  %v3667_v11 = vrot.slane %v3659_v48, %v7029_v46 }
 0x49c   :  { %v3350_v1 = vmul.f32 0.70710677, %v3318_v22 }
 0x49d   :  { %v3319_v51 = vadd.f32 %v3287_v26, %v7027_v49  ;;  %v3675_v42 = vcombine.low %v3348_v6, %v3352_v32  ;;  %v6638_v26 = vmul.f32 0.70710677, %v3311_v35  ;;  %v3651_v23 = vrot.slane %v3643_v24, %v7029_v46  ;;  %v7033_v24 = vld [vmem:[#allocation6_spill] sm:$0xff] }
 0x49e   :  { %v3210_v37 = vpop.permute.xlu1 %3209 }
 0x49f   :  { %v3290_v29 = vmul.f32 %v3210_v37, %v6495_v30  ;;  %v7030_v30 = vld [vmem:[#allocation11_spill] sm:$0xff]  ;;  %v6641_v52 = vmul.f32 0.70710677, %v3319_v51  ;;  %v3387_v37 = vcombine.low %v6636_v15, %v6632_v9  ;;  %v3683_v22 = vrot.slane %v3675_v42, %v7029_v46 }
 0x4a0   :  { %v3315_v4 = vadd.f32 %v3283_v28, %v7030_v30  ;;  %v6645_v28 = vmul.f32 0.70710677, %v3307_v63 }
 0x4a1   :  { %v3322_v47 = vadd.f32 %v3290_v29, %v6032_v12  ;;  %v3317_v12 = vadd.f32 %v3285_v20, %v7031_v62  ;;  %v3395_v49 = vrot.slane %v3387_v37, %v7029_v46 }
 0x4a2   :  { %v3208_v31 = vpop.permute.xlu1 %3207  ;;  %v6649_v38 = vmul.f32 0.70710677, %v3315_v4  ;;  %v3371_v40 = vcombine.low %v6645_v28, %v6638_v26 }
 0x4a3   :  { %v3354_v50 = vmul.f32 0.70710677, %v3322_v47  ;;  %v3289_v57 = vmul.f32 %v3208_v31, %v6499_v21  ;;  %v3707_v21 = vcombine.low %v3651_v23, %v3667_v11  ;;  %v3349_v44 = vmul.f32 0.70710677, %v3317_v12 }
 0x4a4   :  { %v3403_v35 = vcombine.low %v6649_v38, %v6641_v52  ;;  %v3379_v63 = vrot.slane %v3371_v40, %v7029_v46 }
 0x4a5   :  { %v3691_v48 = vcombine.low %v3350_v1, %v3354_v50  ;;  %v3321_v36 = vadd.f32 %v3289_v57, %v7032_v7  ;;  %v3715_v47 = vrot.slane %v3707_v21, %v7033_v24  ;;  %v3692_v31 = vcombine.high %v3350_v1, %v3354_v50 }
 0x4a6   :  { %v3411_v30 = vrot.slane %v3403_v35, %v7029_v46  ;;  %v3435_v62 = vcombine.low %v3379_v63, %v3395_v49  ;;  %v3708_v7 = vcombine.high %v3651_v23, %v3667_v11  ;;  %v3644_v21 = vcombine.high %v6619_v43, %v6611_v27 }
 0x4a7   :  { %v3699_v29 = vrot.slane %v3691_v48, %v7029_v46  ;;  %v3353_v39 = vmul.f32 0.70710677, %v3321_v36  ;;  %v3660_v48 = vcombine.high %v6606_v61, %v6600_v3  ;;  %v3676_v36 = vcombine.high %v3348_v6, %v3352_v32 }
 0x4a8   :  { %v6672_v40 = vrot.slane %v3692_v31, %v7029_v46  ;;  %v3722_v32 = vrot.slane %v3708_v7, %v7033_v24  ;;  %v6689_v43 = vrot.slane %v3644_v21, %v7029_v46  ;;  %v3372_v7 = vcombine.high %v6645_v28, %v6638_v26 }
 0x4a9   :  { %v3739_v20 = vcombine.low %v3683_v22, %v3699_v29  ;;  %v3419_v51 = vcombine.low %v3349_v44, %v3353_v39  ;;  %v3740_v42 = vcombine.high %v3683_v22, %v3699_v29  ;;  %v6676_v22 = vrot.slane %v3435_v62, %v7033_v24 }
 0x4aa   :  { %v6679_v3 = vrot.slane %v3660_v48, %v7029_v46  ;;  %v6682_v61 = vrot.slane %v3676_v36, %v7029_v46  ;;  %v3436_v62 = vcombine.high %v3379_v63, %v3395_v49 }
 0x4ab   :  { %v3747_v25 = vrot.slane %v3739_v20, %v7033_v24  ;;  %v3427_v4 = vrot.slane %v3419_v51, %v7029_v46  ;;  %v3754_v50 = vrot.slane %v3740_v42, %v7033_v24 }
 0x4ac   :  { %v3755_v6 = vcombine.low %v6682_v61, %v6672_v40  ;;  %v3723_v23 = vcombine.low %v6689_v43, %v6679_v3 }
 0x4ad   :  { %v3771_v57 = vcombine.low %v3715_v47, %v3747_v25  ;;  %v3467_v12 = vcombine.low %v3411_v30, %v3427_v4  ;;  %v3772_v1 = vcombine.high %v3715_v47, %v3747_v25  ;;  %v3773_v11 = vcombine.low %v3722_v32, %v3754_v50  ;;  %v6699_v47 = vpop.permute.xlu0 %3213 }
 0x4ae   :  { %v3774_v29 = vcombine.high %v3722_v32, %v3754_v50  ;;  %v3763_v35 = vrot.slane %v3755_v6, %v7033_v24  ;;  %v3731_v20 = vrot.slane %v3723_v23, %v7033_v24  ;;  %v3420_v25 = vcombine.high %v3349_v44, %v3353_v39  ;;  %v3218_v48 = vpop.permute.xlu1 %3217 }
 0x4af   :  { %3973 = vrot.lane.b32.xlu0 %v3771_v57, %s4720_s20  ;;  %v6667_v37 = vrot.slane %v3467_v12, %v7033_v24  ;;  %v3468_v31 = vcombine.high %v3411_v30, %v3427_v4  ;;  %v3388_v57 = vcombine.high %v6636_v15, %v6632_v9  ;;  %v3404_v12 = vcombine.high %v6649_v38, %v6641_v52 }
 0x4b0   :  { %v3775_v51 = vcombine.low %v3731_v20, %v3763_v35  ;;  %v3776_v42 = vcombine.high %v3731_v20, %v3763_v35  ;;  %v3434_v36 = vrot.slane %v3420_v25, %v7029_v46  ;;  %v3450_v52 = vrot.slane %v3436_v62, %v7033_v24 }
 0x4b1   :  { %v3499_v27 = vcombine.low %v6676_v22, %v6667_v37  ;;  %v3212_v21 = vpop.permute.xlu0 %3211  ;;  %v3500_v39 = vcombine.high %v6676_v22, %v6667_v37  ;;  %v3482_v44 = vrot.slane %v3468_v31, %v7033_v24  ;;  %v3402_v9 = vrot.slane %v3388_v57, %v7029_v46 }
 0x4b2   :  { %v3418_v15 = vrot.slane %v3404_v12, %v7029_v46  ;;  %v3386_v38 = vrot.slane %v3372_v7, %v7029_v46  ;;  %v3216_v26 = vpop.permute.xlu1 %3215 }
 0x4b3   :  { %3981 = vrot.lane.b32.xlu0 %v3772_v1, %s4721_s21  ;;  %v3501_v63 = vcombine.low %v3450_v52, %v3482_v44  ;;  %v3502_v1 = vcombine.high %v3450_v52, %v3482_v44 }
 0x4b4   :  { %v3483_v49 = vcombine.low %v3418_v15, %v3434_v36  ;;  %v3451_v30 = vcombine.low %v3386_v38, %v3402_v9 }
 0x4b6   :  { %v3222_v28 = vpop.permute.xlu0 %3221  ;;  %v3491_v50 = vrot.slane %v3483_v49, %v7033_v24  ;;  %v3459_v6 = vrot.slane %v3451_v30, %v7033_v24 }
 0x4b7   :  { %3989 = vrot.lane.b32.xlu0 %v3773_v11, %s4718_s18  ;;  %v3484_v11 = vcombine.high %v3418_v15, %v3434_v36  ;;  %v3756_v36 = vcombine.high %v6682_v61, %v6672_v40 }
 0x4b8   :  { %v3503_v23 = vcombine.low %v3459_v6, %v3491_v50 }
 0x4b9   :  { %v3498_v25 = vrot.slane %v3484_v11, %v7033_v24 }
 0x4ba   :  { %v3220_v32 = vpop.permute.xlu0 %3219 }
 0x4bb   :  { %3997 = vrot.lane.b32.xlu0 %v3774_v29, %s4719_s19  ;;  %v3452_v29 = vcombine.high %v3386_v38, %v3402_v9  ;;  %v3295_v12 = vmul.f32 %v3220_v32, %v6529_v10  ;;  %v3724_v9 = vcombine.high %v6689_v43, %v6679_v3  ;;  %v7036_v32 = vld [vmem:[#allocation18_spill] sm:$0xff] }
 0x4bd   :  { %v3466_v62 = vrot.slane %v3452_v29, %v7033_v24 }
 0x4be   :  { %v3226_v4 = vpop.permute.xlu1 %3225 }
 0x4bf   :  { %4005 = vrot.lane.b32.xlu0 %v3775_v51, %s4716_s16  ;;  %v3504_v51 = vcombine.high %v3459_v6, %v3491_v50  ;;  %v3505_v44 = vcombine.low %v3466_v62, %v3498_v25  ;;  %v3298_v38 = vmul.f32 %v3226_v4, %v6535_v58  ;;  %v3506_v3 = vcombine.high %v3466_v62, %v3498_v25  ;;  %v7034_v4 = vld [vmem:[#allocation17_spill] sm:$0xff]  ;;  %v7039_v25 = vld [vmem:[#allocation26_spill] sm:$0xff] }
 0x4c0   :  { %v7037_v6 = vld [vmem:[#allocation25_spill] sm:$0xff] }
 0x4c2   :  { %v3224_v35 = vpop.permute.xlu1 %3223 }
 0x4c3   :  { %4013 = vrot.lane.b32.xlu0 %v3776_v42, %s4714_s14  ;;  %v3297_v31 = vmul.f32 %v3224_v35, %v6539_v16  ;;  %v3293_v42 = vmul.f32 %v3216_v26, %v6519_v8  ;;  %v3291_v16 = vmul.f32 %v3212_v21, %v6509_v18  ;;  %v3770_v18 = vrot.slane %v3756_v36, %v7033_v24  ;;  %v7040_v36 = vld [vmem:[#allocation19_spill] sm:$0xff] }
 0x4c5   :  { %v3329_v8 = vadd.f32 %v3297_v31, %v6153_v54  ;;  %v3325_v52 = vadd.f32 %v3293_v42, %v6095_v14  ;;  %v3323_v54 = vadd.f32 %v3291_v16, %v6066_v55 }
 0x4c7   :  { %3917 = vrot.lane.b32.xlu0 %v3500_v39, %s4728_s30  ;;  %v3228_v20 = vpop.permute.xlu0 %3227  ;;  %v6745_v43 = vmul.f32 0.70710677, %v3329_v8  ;;  %v6752_v21 = vmul.f32 0.70710677, %v3325_v52 }
 0x4c8   :  { %v3299_v15 = vmul.f32 %v3228_v20, %v6546_v17  ;;  %v3738_v17 = vrot.slane %v3724_v9, %v7033_v24  ;;  %v7038_v20 = vld [vmem:[#allocation20_spill] sm:$0xff] }
 0x4ca   :  { %v3331_v14 = vadd.f32 %v3299_v15, %v6182_v13  ;;  %v3778_v42 = vcombine.high %v3738_v17, %v3770_v18  ;;  %v7041_v15 = vld [vmem:[#allocation27_spill] sm:$0xff] }
 0x4cb   :  { %3925 = vrot.lane.b32.xlu0 %v3501_v63, %s4726_s26 }
 0x4cf   :  { %3933 = vrot.lane.b32.xlu0 %v3502_v1, %s4727_s27  ;;  %v3232_v39 = vpop.permute.xlu1 %3231  ;;  %v7035_v1 = vld [vmem:[#allocation16_spill] sm:$0xff] }
 0x4d0   :  { %v3301_v40 = vmul.f32 %v3232_v39, %v6552_v2  ;;  %v3294_v2 = vmul.f32 %v3218_v48, %v6515_v59  ;;  %v6764_v48 = vmul.f32 0.70710677, %v3323_v54 }
 0x4d2   :  { %v3333_v26 = vadd.f32 %v3301_v40, %v6211_v60  ;;  %v3326_v50 = vadd.f32 %v3294_v2, %v7035_v1 }
 0x4d3   :  { %3941 = vrot.lane.b32.xlu0 %v3503_v23, %s4724_s24 }
 0x4d4   :  { %v6778_v23 = vmul.f32 0.70710677, %v3333_v26 }
 0x4d7   :  { %3949 = vrot.lane.b32.xlu0 %v3504_v51, %s4725_s25  ;;  %v3236_v57 = vpop.permute.xlu0 %3235 }
 0x4d8   :  { %v3303_v7 = vmul.f32 %v3236_v57, %v6565_v0  ;;  %v3327_v0 = vadd.f32 %v3295_v12, %v6124_v5  ;;  %v3292_v5 = vmul.f32 %v6699_v47, %v6505_v19  ;;  %v3330_v19 = vadd.f32 %v3298_v38, %v6148_v56 }
 0x4d9   :  { %v3777_v47 = vcombine.low %v3738_v17, %v3770_v18  ;;  %v3358_v12 = vmul.f32 0.70710677, %v3326_v50  ;;  %v7043_v17 = vld [vmem:[#allocation22_spill] sm:$0xff] }
 0x4da   :  { %v3335_v61 = vadd.f32 %v3303_v7, %v6240_v45  ;;  %v3296_v45 = vmul.f32 %v3222_v28, %v6525_v33  ;;  %v6756_v55 = vmul.f32 0.70710677, %v3327_v0  ;;  %v3523_v33 = vcombine.low %v6752_v21, %v6745_v43 }
 0x4db   :  { %3957 = vrot.lane.b32.xlu0 %v3505_v44, %s4722_s22  ;;  %v3230_v10 = vpop.permute.xlu0 %3229  ;;  %v6768_v28 = vmul.f32 0.70710677, %v3331_v14  ;;  %v3324_v60 = vadd.f32 %v3292_v5, %v7034_v4  ;;  %v3362_v35 = vmul.f32 0.70710677, %v3330_v19 }
 0x4dc   :  { %v6759_v13 = vmul.f32 0.70710677, %v3335_v61  ;;  %v3300_v56 = vmul.f32 %v3230_v10, %v7037_v6  ;;  %v6787_v57 = vrot.slane %v3523_v33, %v7029_v46  ;;  %v7042_v61 = vld [vmem:[#allocation21_spill] sm:$0xff] }
 0x4dd   :  { %v3356_v10 = vmul.f32 0.70710677, %v3324_v60  ;;  %v3795_v0 = vcombine.low %v3358_v12, %v3362_v35 }
 0x4de   :  { %v3539_v29 = vcombine.low %v6768_v28, %v6759_v13  ;;  %v3332_v39 = vadd.f32 %v3300_v56, %v7040_v36  ;;  %v3796_v56 = vcombine.high %v3358_v12, %v3362_v35 }
 0x4df   :  { %v3240_v58 = vpop.permute.xlu1 %3239  ;;  %3965 = vrot.lane.b32.xlu0 %v3506_v3, %s4723_s23  ;;  %v3238_v49 = vpop.permute.xlu0 %3237 }
 0x4e0   :  { %v3305_v63 = vmul.f32 %v3240_v58, %v6579_v53  ;;  %v3304_v59 = vmul.f32 %v3238_v49, %v6561_v34  ;;  %v3328_v53 = vadd.f32 %v3296_v45, %v7036_v32  ;;  %v3507_v34 = vcombine.low %v6764_v48, %v6756_v55 }
 0x4e1   :  { %v6797_v16 = vrot.slane %v3539_v29, %v7029_v46  ;;  %v3364_v14 = vmul.f32 0.70710677, %v3332_v39  ;;  %v3803_v45 = vrot.slane %v3795_v0, %v7029_v46 }
 0x4e2   :  { %v3337_v30 = vadd.f32 %v3305_v63, %v6269_v41  ;;  %v3336_v51 = vadd.f32 %v3304_v59, %v7038_v20  ;;  %v3360_v7 = vmul.f32 0.70710677, %v3328_v53  ;;  %v6794_v9 = vrot.slane %v3507_v34, %v7029_v46 }
 0x4e3   :  { %v3234_v11 = vpop.permute.xlu1 %3233  ;;  %4021 = vrot.lane.b32.xlu0 %v3777_v47, %s4717_s17 }
 0x4e4   :  { %v6782_v41 = vmul.f32 0.70710677, %v3337_v30  ;;  %v3302_v31 = vmul.f32 %v3234_v11, %v7039_v25  ;;  %v3368_v40 = vmul.f32 0.70710677, %v3336_v51  ;;  %v3571_v3 = vcombine.low %v6794_v9, %v6787_v57 }
 0x4e5   :  { %v3779_v54 = vcombine.low %v3356_v10, %v3360_v7  ;;  %v3780_v29 = vcombine.high %v3356_v10, %v3360_v7 }
 0x4e6   :  { %v3555_v62 = vcombine.low %v6778_v23, %v6782_v41  ;;  %v3334_v38 = vadd.f32 %v3302_v31, %v7042_v61  ;;  %v3811_v58 = vcombine.low %v3364_v14, %v3368_v40  ;;  %v6814_v63 = vrot.slane %v3571_v3, %v7033_v24 }
 0x4e7   :  { %v3242_v44 = vpop.permute.xlu1 %3241  ;;  %4029 = vrot.lane.b32.xlu0 %v3778_v42, %s4715_s15  ;;  %v3787_v19 = vrot.slane %v3779_v54, %v7029_v46  ;;  %v3812_v34 = vcombine.high %v3364_v14, %v3368_v40  ;;  %v3810_v31 = vrot.slane %v3796_v56, %v7029_v46  ;;  %v3794_v35 = vrot.slane %v3780_v29, %v7029_v46 }
 0x4e8   :  { %v6800_v8 = vrot.slane %v3555_v62, %v7029_v46  ;;  %v3306_v52 = vmul.f32 %v3242_v44, %v7041_v15  ;;  %v3366_v49 = vmul.f32 0.70710677, %v3334_v38  ;;  %v3819_v30 = vrot.slane %v3811_v58, %v7029_v46 }
 0x4e9   :  { %v3843_v33 = vcombine.low %v3787_v19, %v3803_v45  ;;  %v3844_v11 = vcombine.high %v3787_v19, %v3803_v45  ;;  %v3826_v42 = vrot.slane %v3812_v34, %v7029_v46  ;;  %v3859_v39 = vcombine.low %v3794_v35, %v3810_v31 }
 0x4ea   :  { %v3603_v18 = vcombine.low %v6797_v16, %v6800_v8  ;;  %v3338_v5 = vadd.f32 %v3306_v52, %v7043_v17  ;;  %v3556_v10 = vcombine.high %v6778_v23, %v6782_v41  ;;  %v3604_v0 = vcombine.high %v6797_v16, %v6800_v8 }
 0x4eb   :  { %v3851_v1 = vrot.slane %v3843_v33, %v7033_v24  ;;  %v3858_v62 = vrot.slane %v3844_v11, %v7033_v24  ;;  %v3867_v15 = vrot.slane %v3859_v39, %v7033_v24  ;;  %v3524_v61 = vcombine.high %v6752_v21, %v6745_v43 }
 0x4ec   :  { %v6810_v2 = vrot.slane %v3603_v18, %v7033_v24  ;;  %v3370_v26 = vmul.f32 0.70710677, %v3338_v5  ;;  %v3572_v38 = vcombine.high %v6794_v9, %v6787_v57  ;;  %v3540_v3 = vcombine.high %v6768_v28, %v6759_v13 }
 0x4ed   :  { %v3508_v18 = vcombine.high %v6764_v48, %v6756_v55  ;;  %v3570_v23 = vrot.slane %v3556_v10, %v7029_v46  ;;  %v3618_v16 = vrot.slane %v3604_v0, %v7033_v24  ;;  %v3538_v43 = vrot.slane %v3524_v61, %v7029_v46 }
 0x4ee   :  { %v3827_v59 = vcombine.low %v3366_v49, %v3370_v26  ;;  %v3635_v47 = vcombine.low %v6814_v63, %v6810_v2  ;;  %v3828_v32 = vcombine.high %v3366_v49, %v3370_v26  ;;  %v3636_v41 = vcombine.high %v6814_v63, %v6810_v2 }
 0x4ef   :  { %v3554_v21 = vrot.slane %v3540_v3, %v7029_v46  ;;  %v3586_v13 = vrot.slane %v3572_v38, %v7033_v24  ;;  %v3522_v28 = vrot.slane %v3508_v18, %v7029_v46 }
 0x4f0   :  { %v3835_v4 = vrot.slane %v3827_v59, %v7029_v46  ;;  %v3842_v20 = vrot.slane %v3828_v32, %v7029_v46  ;;  %v3860_v59 = vcombine.high %v3794_v35, %v3810_v31 }
 0x4f1   :  { %v3619_v57 = vcombine.low %v3554_v21, %v3570_v23  ;;  %v3637_v9 = vcombine.low %v3586_v13, %v3618_v16  ;;  %v3587_v55 = vcombine.low %v3522_v28, %v3538_v43  ;;  %v3638_v48 = vcombine.high %v3586_v13, %v3618_v16 }
 0x4f2   :  { %v3875_v60 = vcombine.low %v3819_v30, %v3835_v4  ;;  %v3876_v53 = vcombine.high %v3819_v30, %v3835_v4  ;;  %v3891_v12 = vcombine.low %v3826_v42, %v3842_v20  ;;  %v3620_v14 = vcombine.high %v3554_v21, %v3570_v23 }
 0x4f3   :  { %v3627_v8 = vrot.slane %v3619_v57, %v7033_v24  ;;  %v3595_v54 = vrot.slane %v3587_v55, %v7033_v24  ;;  %v3588_v5 = vcombine.high %v3522_v28, %v3538_v43  ;;  %v3892_v26 = vcombine.high %v3826_v42, %v3842_v20 }
 0x4f4   :  { %v3883_v50 = vrot.slane %v3875_v60, %v7033_v24  ;;  %v3890_v25 = vrot.slane %v3876_v53, %v7033_v24  ;;  %v3899_v44 = vrot.slane %v3891_v12, %v7033_v24  ;;  %v3634_v46 = vrot.slane %v3620_v14, %v7033_v24 }
 0x4f5   :  { %v3639_v17 = vcombine.low %v3595_v54, %v3627_v8  ;;  %v3640_v45 = vcombine.high %v3595_v54, %v3627_v8  ;;  %v3602_v49 = vrot.slane %v3588_v5, %v7033_v24  ;;  %v3906_v4 = vrot.slane %v3892_v26, %v7033_v24 }
 0x4f6   :  { %v3907_v6 = vcombine.low %v3851_v1, %v3883_v50  ;;  %v3908_v51 = vcombine.high %v3851_v1, %v3883_v50  ;;  %v3909_v36 = vcombine.low %v3858_v62, %v3890_v25  ;;  %v3910_v7 = vcombine.high %v3858_v62, %v3890_v25 }
 0x4f7   :  { %v3911_v52 = vcombine.low %v3867_v15, %v3899_v44  ;;  %v3912_v40 = vcombine.high %v3867_v15, %v3899_v44  ;;  %v3641_v19 = vcombine.low %v3602_v49, %v3634_v46  ;;  %v3642_v30 = vcombine.high %v3602_v49, %v3634_v46 }
 0x4f8   :  { %3975 = vrot.lane.b32.xlu1 %v3907_v6, %s4720_s20  ;;  %v3874_v1 = vrot.slane %v3860_v59, %v7033_v24 }
 0x4fa   :  { %v3913_v50 = vcombine.low %v3874_v1, %v3906_v4  ;;  %v3914_v53 = vcombine.high %v3874_v1, %v3906_v4 }
 0x4fc   :  { %3983 = vrot.lane.b32.xlu1 %v3908_v51, %s4721_s21 }
 0x500   :  { %3991 = vrot.lane.b32.xlu1 %v3909_v36, %s4718_s18 }
 0x504   :  { %3999 = vrot.lane.b32.xlu1 %v3910_v7, %s4719_s19 }
 0x508   :  { %4007 = vrot.lane.b32.xlu1 %v3911_v52, %s4716_s16 }
 0x50c   :  { %4015 = vrot.lane.b32.xlu1 %v3912_v40, %s4714_s14  ;;  %s4084_s14 = sshll.u32 %s4731_s2, 4  ;;  %s4085_s14 = int_to_ptr.vmem [resolvable:$true] %s4084_s14 }
 0x50d   :  { %p4695_p1 = scmp.lt.s32.totalorder %s4085_s14, %s4085_s14 }
 0x510   :  { %3919 = vrot.lane.b32.xlu1 %v3636_v41, %s4728_s30 }
 0x514   :  { %3927 = vrot.lane.b32.xlu1 %v3637_v9, %s4726_s26 }
 0x518   :  { %3935 = vrot.lane.b32.xlu1 %v3638_v48, %s4727_s27 }
 0x51c   :  { %3943 = vrot.lane.b32.xlu1 %v3639_v17, %s4724_s24 }
 0x520   :  { %3951 = vrot.lane.b32.xlu1 %v3640_v45, %s4725_s25 }
 0x521   :  { %v3974_v58 = vpop.permute.xlu0 %3973 }
 0x524   :  { %3959 = vrot.lane.b32.xlu1 %v3641_v19, %s4722_s22 }
 0x525   :  { %v3982_v33 = vpop.permute.xlu0 %3981 }
 0x528   :  { %3967 = vrot.lane.b32.xlu1 %v3642_v30, %s4723_s23 }
 0x529   :  { %v3990_v60 = vpop.permute.xlu0 %3989 }
 0x52c   :  { %4023 = vrot.lane.b32.xlu1 %v3913_v50, %s4717_s17 }
 0x52d   :  { %v3998_v32 = vpop.permute.xlu0 %3997 }
 0x530   :  { %4031 = vrot.lane.b32.xlu1 %v3914_v53, %s4715_s15  ;;  %s4690_s15 = scalar_lea.vmem %s4085_s14, 256 }
 0x531   :  { %v4006_v6 = vpop.permute.xlu0 %4005  ;;  %p4691_p0 = scmp.ne.s32.totalorder %s4085_s14, %s4690_s15  ;;  %p4696_p2 = scmp.lt.s32.totalorder %s4690_s15, %s4690_s15 }
 0x533   :  { %p4697_p3 = por %p4696_p2, %p4695_p1 }
 0x535   :  { %v4014_v56 = vpop.permute.xlu0 %4013  ;;  %p4698_p4 = pnand %p4697_p3, %p4691_p0 }
 0x539   :  { %v3918_v11 = vpop.permute.xlu0 %3917 }
 0x53a   :  { %v4035_v25 = vsel %vm1200_vm3, %v3499_v27, %v3918_v11 }
 0x53d   :  { %v3926_v34 = vpop.permute.xlu0 %3925 }
 0x53e   :  { %v4037_v24 = vsel %vm1233_vm4, %v4035_v25, %v3926_v34 }
 0x541   :  { %v3934_v29 = vpop.permute.xlu0 %3933 }
 0x542   :  { %v4039_v42 = vsel %vm1276_vm5, %v4037_v24, %v3934_v29 }
 0x545   :  { %v3942_v20 = vpop.permute.xlu0 %3941 }
 0x546   :  { %v4042_v62 = vsel %vm4041_vm6, %v4039_v42, %v3942_v20 }
 0x549   :  { %v3950_v51 = vpop.permute.xlu0 %3949 }
 0x54a   :  { %v4045_v35 = vsel %vm4044_vm7, %v4042_v62, %v3950_v51 }
 0x54d   :  { %v3958_v31 = vpop.permute.xlu0 %3957 }
 0x54e   :  { %v4048_v12 = vsel %vm4047_vm8, %v4045_v35, %v3958_v31 }
 0x551   :  { %v3966_v37 = vpop.permute.xlu0 %3965 }
 0x552   :  { %v4051_v22 = vsel %vm4050_vm9, %v4048_v12, %v3966_v37 }
 0x553   :  { %v4054_v27 = vsel %vm4053_vm10, %v4051_v22, %v3974_v58 }
 0x554   :  { %v4057_v36 = vsel %vm4056_vm11, %v4054_v27, %v3982_v33 }
 0x555   :  { %v4060_v39 = vsel %vm4059_vm12, %v4057_v36, %v3990_v60  ;;  %v4022_v7 = vpop.permute.xlu0 %4021 }
 0x556   :  { %v4063_v44 = vsel %vm4062_vm13, %v4060_v39, %v3998_v32 }
 0x557   :  { %v4066_v15 = vsel %vm4065_vm14, %v4063_v44, %v4006_v6 }
 0x558   :  { %v4069_v52 = vsel %vm4068_vm15, %v4066_v15, %v4014_v56 }
 0x559   :  { %v4072_v10 = vsel %vm4071_vm0, %v4069_v52, %v4022_v7  ;;  %v4030_v0 = vpop.permute.xlu0 %4029 }
 0x55a   :  { %v4075_v40 = vsel %vm4074_vm1, %v4072_v10, %v4030_v0 }
 0x55b   :  { %4077 = vst [vmem:[#allocation2] sm:$0xff] %v4075_v40 }
 0x56a   :  { %v3976_v61 = vpop.permute.xlu1 %3975 }
 0x56e   :  { %v3984_v38 = vpop.permute.xlu1 %3983 }
 0x572   :  { %v3992_v3 = vpop.permute.xlu1 %3991 }
 0x576   :  { %v4000_v18 = vpop.permute.xlu1 %3999 }
 0x57a   :  { %v4008_v23 = vpop.permute.xlu1 %4007 }
 0x57e   :  { %v4016_v41 = vpop.permute.xlu1 %4015 }
 0x582   :  { %v3920_v16 = vpop.permute.xlu1 %3919 }
 0x583   :  { %v4036_v57 = vsel %vm1200_vm3, %v3635_v47, %v3920_v16 }
 0x586   :  { %v3928_v43 = vpop.permute.xlu1 %3927 }
 0x587   :  { %v4038_v9 = vsel %vm1233_vm4, %v4036_v57, %v3928_v43 }
 0x58a   :  { %v3936_v21 = vpop.permute.xlu1 %3935 }
 0x58b   :  { %v4040_v48 = vsel %vm1276_vm5, %v4038_v9, %v3936_v21 }
 0x58e   :  { %v3944_v13 = vpop.permute.xlu1 %3943 }
 0x58f   :  { %v4043_v8 = vsel %vm4041_vm6, %v4040_v48, %v3944_v13 }
 0x592   :  { %v3952_v28 = vpop.permute.xlu1 %3951 }
 0x593   :  { %v4046_v54 = vsel %vm4044_vm7, %v4043_v8, %v3952_v28 }
 0x596   :  { %v3960_v55 = vpop.permute.xlu1 %3959 }
 0x597   :  { %v4049_v14 = vsel %vm4047_vm8, %v4046_v54, %v3960_v55 }
 0x59a   :  { %v3968_v17 = vpop.permute.xlu1 %3967 }
 0x59b   :  { %v4052_v5 = vsel %vm4050_vm9, %v4049_v14, %v3968_v17 }
 0x59c   :  { %v4055_v45 = vsel %vm4053_vm10, %v4052_v5, %v3976_v61 }
 0x59d   :  { %v4058_v2 = vsel %vm4056_vm11, %v4055_v45, %v3984_v38 }
 0x59e   :  { %v4061_v63 = vsel %vm4059_vm12, %v4058_v2, %v3992_v3  ;;  %v4024_v47 = vpop.permute.xlu1 %4023 }
 0x59f   :  { %v4064_v46 = vsel %vm4062_vm13, %v4061_v63, %v4000_v18 }
 0x5a0   :  { %v4067_v58 = vsel %vm4065_vm14, %v4064_v46, %v4008_v23 }
 0x5a1   :  { %v4070_v49 = vsel %vm4068_vm15, %v4067_v58, %v4016_v41 }
 0x5a2   :  { %v4073_v26 = vsel %vm4071_vm0, %v4070_v49, %v4024_v47  ;;  %v4032_v19 = vpop.permute.xlu1 %4031 }
 0x5a3   :  { %v4076_v59 = vsel %vm4074_vm1, %v4073_v26, %v4032_v19 }
 0x5a4   :  { %4078 = vst [vmem:[#allocation2 + $0x8] sm:$0xff] %v4076_v59 }
 0x5a5   :  { %4701 = shalt.err (!%p4698_p4)
}
 0x5a6   :  { %s4702_s18 = scalar_lea.hbm %s6924_s3, 256 }
 0x5a7   :  { %p4703_p5 = scmp.ne.s32.totalorder %s6924_s3, %s4702_s18  ;;  %p4706_p6 = scmp.lt.u32.totalorder %s4702_s18, %s6924_s3 }
 0x5a9   :  { %p4708_p7 = pnand %p4706_p6, %p4703_p5 }
 0x5ab   :  { %4711 = shalt.err (!%p4708_p7)
}
 0x5ac   :  { %s4732_s23 = smov 128  }
 0x5ad   :  { %4090 = dma.vmem_to_hbm [thread:$0]  %s4085_s14, 256, %s6924_s3, [#allocation3], %s4732_s23, %s4732_s23, %s4728_s30  }
 0x5ae   :  { %4712 = dma.done.wait [#allocation3], 256  }
 0x5af   :  { %4713 = vsyncadd [#allocation3], 4294967040 }
 0x5b0   :  { %4094 = vsyncpa [#allocation3], 1 }

</bundles_post_ra>
